<compile_context>
chip_gen: v7x
topology: tpu7x:2x2x1
jax: 0.10.0
libtpu: 0.0.40
codegen_flags: <defaults>
</compile_context>

<pallas_src>
import math

import jax
import jax.numpy as jnp
from jax.experimental import pallas as pl
from jax.experimental.pallas import tpu as pltpu


# --------------------------------------------------------------------------- #
# Fused kernel: qkv proj + g proj + attention + out_node proj + tv update.    #
# One grid step processes `bpb` (b*n) batch elements.                         #
# --------------------------------------------------------------------------- #
def _make_fused_kernel(bpb, T, D, D2, H, dk, clip_min, clip_max):
    scale = 1.0 / math.sqrt(dk)
    M = bpb * T                                     # rows handled per grid step

    def kernel(node_ref, tv_ref, mask_ref, lmask_ref,
               wqkv_ref, bqkv_ref, wg_ref, bg_ref,
               wout_ref, bout_ref, wupd_ref, bupd_ref,
               x_ref, tvout_ref):
        f32 = jnp.float32
        bf16 = jnp.bfloat16

        # ---- qkv projection: ONE (M, D) @ (D, 3D) bf16 MXU matmul -----------
        # wqkv columns were permuted in the wrapper to [q | k | v], each block
        # head-major, so q/k/v per head are contiguous lane slices.
        qkv = (jnp.dot(node_ref[...], wqkv_ref[...],
                       preferred_element_type=f32) + bqkv_ref[...])
        qkv3 = qkv.reshape(bpb, T, 3 * D).astype(bf16)   # sublane-boundary reshape

        # ---- g projection: ONE (M, T*D2) @ (T*D2, H*T) bf16 matmul ----------
        # wg was pre-expanded (block-diagonal in t2) so that
        # g_all[(b,t1), (h,t2)] == linear_g(tv)[b, t1, t2, h]; stays in VMEM.
        g_all = (jnp.dot(tv_ref[...], wg_ref[...],
                         preferred_element_type=f32) + bg_ref[...])

        lm = lmask_ref[...][None, :, :]             # (1, T, T)
        maskb = mask_ref[...] == 0.0                # (bpb, 1, T) key mask

        xh_parts = []                               # per-head attn @ v (f32)
        s_parts = []                                # per-head post-fill scores (f32)
        for h in range(H):                          # H is small and static
            q_h = qkv3[:, :, h * dk:(h + 1) * dk]                   # (bpb,T,dk) bf16
            k_h = qkv3[:, :, D + h * dk:D + (h + 1) * dk]
            v_h = qkv3[:, :, 2 * D + h * dk:2 * D + (h + 1) * dk]

            # scores, batched over the bpb block batch elements (bf16 -> f32 acc)
            s = jnp.einsum('bqd,bkd->bqk', q_h, k_h,
                           preferred_element_type=f32) * scale
            g_h = g_all[:, h * T:(h + 1) * T].reshape(bpb, T, T)
            s = s + g_h * lm
            s = jnp.clip(s, clip_min, clip_max)
            s = jnp.where(maskb, 1e-28, s)          # torch masked_fill(mask==0, 1e-28)

            # softmax over keys, all in f32
            mx = jnp.max(s, axis=-1, keepdims=True)
            e = jnp.exp(s - mx)
            denom = jnp.sum(e, axis=-1, keepdims=True)
            attn = e * pl.reciprocal(denom, approx=True)
            attn = jnp.where(maskb, 0.0, attn)
            # TODO(synk): attention dropout is identity in eval mode (rate treated as 0).

            xh = jnp.einsum('bqk,bkd->bqd', attn.astype(bf16), v_h,
                            preferred_element_type=f32)             # (bpb,T,dk)
            xh_parts.append(xh)
            s_parts.append(s)

        # ---- hoisted projections: one big matmul each, after the loop -------
        # out_node: lane-concat per-head outputs -> (M, D), single (M,D)@(D,D).
        x_all = jnp.concatenate(xh_parts, axis=-1).reshape(M, D).astype(bf16)
        y = jnp.dot(x_all, wout_ref[...], preferred_element_type=f32) + bout_ref[...]
        x_ref[...] = y.astype(x_ref.dtype)

        # tv-update: lane-concat per-head scores -> (M, H*T),
        # single (M,H*T)@(H*T,T*D2) against the flattened block-diag weight.
        s_all = jnp.concatenate(s_parts, axis=-1).reshape(M, H * T).astype(bf16)
        tv = jnp.dot(s_all, wupd_ref[...], preferred_element_type=f32) + bupd_ref[...]
        tvout_ref[...] = tv.astype(tvout_ref.dtype)

    return kernel


# --------------------------------------------------------------------------- #
# Parameter init (synthetic, deterministic — nn.Linear-like uniform init).    #
# Weights stored as (in_features, out_features); y = x @ W + b.               #
# --------------------------------------------------------------------------- #
def init_params(key, node_dim, edge_dim, heads):
    ks = jax.random.split(key, 8)

    def lin(kw, kb, fan_in, fan_out):
        bound = 1.0 / math.sqrt(fan_in)
        w = jax.random.uniform(kw, (fan_in, fan_out), jnp.float32, -bound, bound)
        b = jax.random.uniform(kb, (fan_out,), jnp.float32, -bound, bound)
        return w, b

    p = {}
    p["w_qkv"], p["b_qkv"] = lin(ks[0], ks[1], node_dim, node_dim * 3)
    p["w_g"],   p["b_g"]   = lin(ks[2], ks[3], edge_dim, heads)
    p["w_out"], p["b_out"] = lin(ks[4], ks[5], node_dim, node_dim)
    p["w_upd"], p["b_upd"] = lin(ks[6], ks[7], heads, edge_dim)
    return p


# --------------------------------------------------------------------------- #
# Generation-dependent grid split: 2-way only on chips with 2 TensorCores.    #
# --------------------------------------------------------------------------- #
def _two_tensorcore_chip() -> bool:
    try:
        kind = jax.devices()[0].device_kind.lower()
    except Exception:
        return False
    if "lite" in kind or "v5e" in kind or "v6" in kind:
        return False                               # single-TC chips
    return ("v7" in kind) or ("v4" in kind) or ("v5p" in kind) or kind.endswith(" v5")


# --------------------------------------------------------------------------- #
# Full forward pass: one fused pallas_call, layout plumbing in plain JAX.     #
# --------------------------------------------------------------------------- #
def temporal_attention_forward(params, node, tv, mask, local_mask, heads):
    """node (B,T,N,D)  tv (B,N,T,T,D2)  mask (B,1,T)  local_mask (T,T)."""
    B, T, N, D = node.shape
    D2 = tv.shape[-1]
    H = heads
    dk = D // H
    BN = B * N

    # grid: split over (b*n) only when there are 2 TensorCores to shard onto.
    G = 2 if (BN % 2 == 0 and _two_tensorcore_chip()) else 1
    bpb = BN // G
    assert (bpb * T) % 16 == 0, "bf16 block sublane dim must be a multiple of 16"

    # --- weight preprocessing (tiny, plain JAX, done outside the hot kernel) --
    # qkv columns: torch layout is (h, d1, x); reorder to (x, h, d1) so q/k/v
    # and each head are contiguous lane slices inside the kernel.
    old_idx = (jnp.arange(H)[:, None, None] * (dk * 3)
               + jnp.arange(dk)[None, :, None] * 3
               + jnp.arange(3)[None, None, :])                  # (H, dk, 3)
    perm = jnp.transpose(old_idx, (2, 0, 1)).reshape(-1)        # new -> old col
    w_qkv_p = params["w_qkv"][:, perm].astype(jnp.bfloat16)     # (D, 3D)
    b_qkv_p = params["b_qkv"][perm][None, :].astype(jnp.float32)

    eye_t = jnp.eye(T, dtype=jnp.float32)
    # linear_g folded over tv rows flattened as (t2, d2):
    #   g_all[(b,t1), (h,t2)] = sum_{d2} tv[b,t1,t2,d2] * w_g[d2,h] + b_g[h]
    # TODO(synk): at large T replace this block-diagonal expansion (O(T^2) VMEM,
    #             O(T) wasted MXU FLOPs) with a VPU broadcast-multiply + reduce.
    w_g_big = (jnp.einsum('dh,ts->tdhs', params["w_g"], eye_t)
               .reshape(T * D2, H * T).astype(jnp.bfloat16))
    b_g_big = jnp.repeat(params["b_g"], T)[None, :].astype(jnp.float32)
    # linear_update folded, block-diagonal in t2, flattened to (H*T, T*D2):
    #   tv_out[(b,t1),(t2,d2)] = sum_{h} scores_h[b,t1,t2] * w_upd[h,d2] + b_upd[d2]
    w_upd_flat = (jnp.einsum('hd,st->hstd', params["w_upd"], eye_t)
                  .reshape(H * T, T * D2).astype(jnp.bfloat16))
    b_upd_big = jnp.tile(params["b_upd"], T)[None, :].astype(jnp.float32)

    w_out = params["w_out"].astype(jnp.bfloat16)
    b_out = params["b_out"][None, :].astype(jnp.float32)

    # --- input layout: lane-friendly 2-D slabs, bf16 for MXU / half DMA bytes -
    node2 = jnp.transpose(node, (0, 2, 1, 3)).reshape(BN * T, D).astype(jnp.bfloat16)
    tv2 = tv.reshape(BN * T, T * D2).astype(jnp.bfloat16)
    mask3 = jnp.repeat(mask, N, axis=0).astype(jnp.float32)        # (BN, 1, T)
    lmask = local_mask.astype(jnp.float32)

    # --- advisory cost estimate so XLA can schedule around the opaque call ----
    flops = 2 * BN * T * (3 * D * D + 2 * H * T * T * D2 + 2 * H * T * dk + D * D)
    ins = (node2, tv2, mask3, lmask, w_qkv_p, b_qkv_p, w_g_big, b_g_big,
           w_out, b_out, w_upd_flat, b_upd_big)
    bytes_accessed = (sum(int(a.size) * a.dtype.itemsize for a in ins)
                      + (BN * T * D + BN * T * T * D2) * 4)
    cost = pl.CostEstimate(flops=flops, transcendentals=BN * H * T * T,
                           bytes_accessed=bytes_accessed)

    kernel = _make_fused_kernel(bpb, T, D, D2, H, dk, -5.0, 5.0)
    x2, tv_out2 = pl.pallas_call(
        kernel,
        out_shape=(jax.ShapeDtypeStruct((BN * T, D), jnp.float32),
                   jax.ShapeDtypeStruct((BN * T, T * D2), jnp.float32)),
        grid=(G,),
        in_specs=[
            pl.BlockSpec((bpb * T, D), lambda i: (i, 0)),          # node (bf16)
            pl.BlockSpec((bpb * T, T * D2), lambda i: (i, 0)),     # tv   (bf16)
            pl.BlockSpec((bpb, 1, T), lambda i: (i, 0, 0)),        # mask
            pl.BlockSpec((T, T), lambda i: (0, 0)),                # local_mask
            pl.BlockSpec((D, 3 * D), lambda i: (0, 0)),            # w_qkv (perm)
            pl.BlockSpec((1, 3 * D), lambda i: (0, 0)),            # b_qkv (perm)
            pl.BlockSpec((T * D2, H * T), lambda i: (0, 0)),       # w_g (expanded)
            pl.BlockSpec((1, H * T), lambda i: (0, 0)),            # b_g (expanded)
            pl.BlockSpec((D, D), lambda i: (0, 0)),                # w_out
            pl.BlockSpec((1, D), lambda i: (0, 0)),                # b_out
            pl.BlockSpec((H * T, T * D2), lambda i: (0, 0)),       # w_upd (flat)
            pl.BlockSpec((1, T * D2), lambda i: (0, 0)),           # b_upd (expanded)
        ],
        out_specs=(
            pl.BlockSpec((bpb * T, D), lambda i: (i, 0)),
            pl.BlockSpec((bpb * T, T * D2), lambda i: (i, 0)),
        ),
        compiler_params=pltpu.CompilerParams(
            dimension_semantics=("parallel",)),
        cost_estimate=cost,
    )(node2, tv2, mask3, lmask, w_qkv_p, b_qkv_p, w_g_big, b_g_big,
      w_out, b_out, w_upd_flat, b_upd_big)

    x = x2.reshape(B, N, T, D).transpose(0, 2, 1, 3)            # (B, T, N, D)
    tv_out = tv_out2.reshape(B, N, T, T, D2)                    # (B, N, T, T, D2)
    return x, tv_out


# --------------------------------------------------------------------------- #
# Pure-JAX reference (mirrors the PyTorch module) for a correctness check.    #
# --------------------------------------------------------------------------- #
def reference_forward(params, node, tv, mask, local_mask, heads):
    B, T, N, D = node.shape
    D2 = tv.shape[-1]
    H = heads
    dk = D // H
    BN = B * N
    hp = jax.lax.Precision.HIGHEST

    node_bn = jnp.transpose(node, (0, 2, 1, 3)).reshape(BN, T, D)
    qkv = jnp.einsum('btd,de->bte', node_bn, params["w_qkv"], precision=hp) + params["b_qkv"]
    qkv = qkv.reshape(BN, T, H, dk, 3)
    q = jnp.transpose(qkv[..., 0], (0, 2, 1, 3))
    k = jnp.transpose(qkv[..., 1], (0, 2, 1, 3))
    v = jnp.transpose(qkv[..., 2], (0, 2, 1, 3))

    tv_bn = tv.reshape(BN, T, T, D2)
    g = jnp.einsum('bstd,dh->bsth', tv_bn, params["w_g"], precision=hp) + params["b_g"]
    g = jnp.transpose(g, (0, 3, 1, 2))                           # (BN,H,T,T)

    mask_bn = jnp.repeat(mask, N, axis=0)
    scores = jnp.einsum('bhqd,bhkd->bhqk', q, k, precision=hp) / math.sqrt(dk)
    scores = scores + g * local_mask[None, None, :, :]
    scores = jnp.clip(scores, -5.0, 5.0)
    mb = mask_bn[:, None, :, :] == 0
    scores = jnp.where(mb, 1e-28, scores)
    attn = jax.nn.softmax(scores, axis=-1)
    attn = jnp.where(mb, 0.0, attn)
    x = jnp.einsum('bhqk,bhkd->bhqd', attn, v, precision=hp)

    x = jnp.transpose(x, (0, 2, 1, 3)).reshape(B, N, T, D)
    x = jnp.transpose(x, (0, 2, 1, 3))                           # (B,T,N,D)
    x = jnp.einsum('btnd,de->btne', x, params["w_out"], precision=hp) + params["b_out"]

    sc = jnp.transpose(scores, (0, 2, 3, 1)).reshape(B, N, T, T, H)
    tv_out = jnp.einsum('bnsth,hd->bnstd', sc, params["w_upd"], precision=hp) + params["b_upd"]
    return x, tv_out


if __name__ == "__main__":
    B, T, N, D = 2, 8, 4, 32
    H = 4                      # heads ; d_k = 8
    D2 = 8                     # edge_dim
    lwidth = 2                 # tv_local_width

    key = jax.random.PRNGKey(0)
    k_node, k_tv, k_params = jax.random.split(key, 3)

    node = jax.random.normal(k_node, (B, T, N, D), jnp.float32)
    tv = jax.random.normal(k_tv, (B, N, T, T, D2), jnp.float32)

    # mask (B, 1, T): sequence lengths 6 and 8
    lengths = jnp.array([6, 8])
    mask = (jnp.arange(T)[None, :] < lengths[:, None]).astype(jnp.float32)[:, None, :]

    # local band mask (T, T) built from tv_local_width
    idx = jnp.arange(T)
    local_mask = (jnp.abs(idx[:, None] - idx[None, :]) <= lwidth).astype(jnp.float32)

    params = init_params(k_params, D, D2, H)

    fwd = jax.jit(temporal_attention_forward, static_argnames=("heads",))
    x_out, tv_out_k = fwd(params, node, tv, mask, local_mask, heads=H)
    jax.block_until_ready(x_out)
    jax.block_until_ready(tv_out_k)

    assert x_out.shape == (B, T, N, D)
    assert tv_out_k.shape == (B, N, T, T, D2)

    # numerical check against the plain-JAX reference (loose tolerance covers
    # bf16 MXU operands and the approx reciprocal)
    x_ref, tv_out_ref = reference_forward(params, node, tv, mask, local_mask, H)
    err_x = float(jnp.max(jnp.abs(x_out - x_ref)))
    err_tv = float(jnp.max(jnp.abs(tv_out_k - tv_out_ref)))
    assert err_x < 1e-1, f"x mismatch: {err_x}"
    assert err_tv < 1e-1, f"tv mismatch: {err_tv}"

    print("KERNEL_OK")
</pallas_src>

<mosaic_0001>
module attributes {stable_mosaic.version = 11 : i64} {
  func.func @kernel(%arg0: i32, %arg1: memref<64x32xbf16, #tpu.memory_space<vmem>>, %arg2: memref<64x64xbf16, #tpu.memory_space<vmem>>, %arg3: memref<8x1x8xf32, #tpu.memory_space<vmem>>, %arg4: memref<8x8xf32, #tpu.memory_space<vmem>>, %arg5: memref<32x96xbf16, #tpu.memory_space<vmem>>, %arg6: memref<1x96xf32, #tpu.memory_space<vmem>>, %arg7: memref<64x32xbf16, #tpu.memory_space<vmem>>, %arg8: memref<1x32xf32, #tpu.memory_space<vmem>>, %arg9: memref<32x32xbf16, #tpu.memory_space<vmem>>, %arg10: memref<1x32xf32, #tpu.memory_space<vmem>>, %arg11: memref<32x64xbf16, #tpu.memory_space<vmem>>, %arg12: memref<1x64xf32, #tpu.memory_space<vmem>>, %arg13: memref<64x32xf32, #tpu.memory_space<vmem>>, %arg14: memref<64x64xf32, #tpu.memory_space<vmem>>) attributes {dimension_semantics = [#tpu.dimension_semantics<parallel>], iteration_bounds = array<i64: 1>, scalar_prefetch = 0 : i64, scratch_operands = 0 : i64, tpu.core_type = #tpu.core_type<tc>, window_params = [{transform_indices = @transform_0, window_bounds = array<i64: 64, 32>}, {transform_indices = @transform_1, window_bounds = array<i64: 64, 64>}, {transform_indices = @transform_2, window_bounds = array<i64: 8, 1, 8>}, {pipeline_mode = #tpu.pipeline_mode<synchronous>, transform_indices = @transform_3, window_bounds = array<i64: 8, 8>}, {pipeline_mode = #tpu.pipeline_mode<synchronous>, transform_indices = @transform_4, window_bounds = array<i64: 32, 96>}, {pipeline_mode = #tpu.pipeline_mode<synchronous>, transform_indices = @transform_5, window_bounds = array<i64: 1, 96>}, {pipeline_mode = #tpu.pipeline_mode<synchronous>, transform_indices = @transform_6, window_bounds = array<i64: 64, 32>}, {pipeline_mode = #tpu.pipeline_mode<synchronous>, transform_indices = @transform_7, window_bounds = array<i64: 1, 32>}, {pipeline_mode = #tpu.pipeline_mode<synchronous>, transform_indices = @transform_8, window_bounds = array<i64: 32, 32>}, {pipeline_mode = #tpu.pipeline_mode<synchronous>, transform_indices = @transform_9, window_bounds = array<i64: 1, 32>}, {pipeline_mode = #tpu.pipeline_mode<synchronous>, transform_indices = @transform_10, window_bounds = array<i64: 32, 64>}, {pipeline_mode = #tpu.pipeline_mode<synchronous>, transform_indices = @transform_11, window_bounds = array<i64: 1, 64>}, {transform_indices = @transform_12, window_bounds = array<i64: 64, 32>}, {transform_indices = @transform_13, window_bounds = array<i64: 64, 64>}]} {
    %c0 = arith.constant 0 : index
    %c0_0 = arith.constant 0 : index
    %0 = vector.load %arg1[%c0, %c0_0] : memref<64x32xbf16, #tpu.memory_space<vmem>>, vector<64x32xbf16>
    %c0_1 = arith.constant 0 : index
    %c0_2 = arith.constant 0 : index
    %1 = vector.load %arg5[%c0_1, %c0_2] : memref<32x96xbf16, #tpu.memory_space<vmem>>, vector<32x96xbf16>
    %cst = arith.constant dense<0.000000e+00> : vector<64x96xf32>
    %2 = tpu.matmul %0, %1, %cst {dimension_numbers = #tpu.dot_dimension_numbers<[1], [0], [0], [1], [0, 0, 1, 1], [], []>} : vector<64x32xbf16>, vector<32x96xbf16>, vector<64x96xf32> -> vector<64x96xf32>
    %c0_3 = arith.constant 0 : index
    %c0_4 = arith.constant 0 : index
    %3 = vector.load %arg6[%c0_3, %c0_4] : memref<1x96xf32, #tpu.memory_space<vmem>>, vector<1x96xf32>
    %4 = vector.broadcast %3 : vector<1x96xf32> to vector<64x96xf32>
    %5 = arith.addf %2, %4 : vector<64x96xf32>
    %6 = vector.shape_cast %5 : vector<64x96xf32> to vector<8x8x96xf32>
    %7 = arith.truncf %6 : vector<8x8x96xf32> to vector<8x8x96xbf16>
    %c0_5 = arith.constant 0 : index
    %c0_6 = arith.constant 0 : index
    %8 = vector.load %arg2[%c0_5, %c0_6] : memref<64x64xbf16, #tpu.memory_space<vmem>>, vector<64x64xbf16>
    %c0_7 = arith.constant 0 : index
    %c0_8 = arith.constant 0 : index
    %9 = vector.load %arg7[%c0_7, %c0_8] : memref<64x32xbf16, #tpu.memory_space<vmem>>, vector<64x32xbf16>
    %cst_9 = arith.constant dense<0.000000e+00> : vector<64x32xf32>
    %10 = tpu.matmul %8, %9, %cst_9 {dimension_numbers = #tpu.dot_dimension_numbers<[1], [0], [0], [1], [0, 0, 1, 1], [], []>} : vector<64x64xbf16>, vector<64x32xbf16>, vector<64x32xf32> -> vector<64x32xf32>
    %c0_10 = arith.constant 0 : index
    %c0_11 = arith.constant 0 : index
    %11 = vector.load %arg8[%c0_10, %c0_11] : memref<1x32xf32, #tpu.memory_space<vmem>>, vector<1x32xf32>
    %12 = vector.broadcast %11 : vector<1x32xf32> to vector<64x32xf32>
    %13 = arith.addf %10, %12 : vector<64x32xf32>
    %c0_12 = arith.constant 0 : index
    %c0_13 = arith.constant 0 : index
    %14 = vector.load %arg4[%c0_12, %c0_13] : memref<8x8xf32, #tpu.memory_space<vmem>>, vector<8x8xf32>
    %15 = vector.shape_cast %14 : vector<8x8xf32> to vector<1x8x8xf32>
    %c0_14 = arith.constant 0 : index
    %c0_15 = arith.constant 0 : index
    %c0_16 = arith.constant 0 : index
    %16 = vector.load %arg3[%c0_14, %c0_15, %c0_16] : memref<8x1x8xf32, #tpu.memory_space<vmem>>, vector<8x1x8xf32>
    %cst_17 = arith.constant 0.000000e+00 : f32
    %17 = vector.broadcast %cst_17 : f32 to vector<8x1x8xf32>
    %18 = arith.cmpf oeq, %16, %17 : vector<8x1x8xf32>
    %19 = vector.extract_strided_slice %7 {offsets = [0, 0, 0], sizes = [8, 8, 8], strides = [1, 1, 1]} : vector<8x8x96xbf16> to vector<8x8x8xbf16>
    %20 = vector.extract_strided_slice %7 {offsets = [0, 0, 32], sizes = [8, 8, 8], strides = [1, 1, 1]} : vector<8x8x96xbf16> to vector<8x8x8xbf16>
    %21 = vector.extract_strided_slice %7 {offsets = [0, 0, 64], sizes = [8, 8, 8], strides = [1, 1, 1]} : vector<8x8x96xbf16> to vector<8x8x8xbf16>
    "tpu.trace_start"() <{level = 10 : i32, message = "bqd,bkd->bqk"}> : () -> ()
    %cst_18 = arith.constant dense<0.000000e+00> : vector<8x8x8xf32>
    %22 = tpu.matmul %19, %20, %cst_18 {dimension_numbers = #tpu.dot_dimension_numbers<[2], [2], [1], [1], [0, 0, 0, 1, 1, 1], [0], [0]>} : vector<8x8x8xbf16>, vector<8x8x8xbf16>, vector<8x8x8xf32> -> vector<8x8x8xf32>
    "tpu.trace_stop"() : () -> ()
    %cst_19 = arith.constant 0.353553385 : f32
    %23 = vector.broadcast %cst_19 : f32 to vector<8x8x8xf32>
    %24 = arith.mulf %22, %23 : vector<8x8x8xf32>
    %25 = vector.extract_strided_slice %13 {offsets = [0, 0], sizes = [64, 8], strides = [1, 1]} : vector<64x32xf32> to vector<64x8xf32>
    %26 = vector.shape_cast %25 : vector<64x8xf32> to vector<8x8x8xf32>
    %27 = vector.broadcast %15 : vector<1x8x8xf32> to vector<8x8x8xf32>
    %28 = arith.mulf %26, %27 : vector<8x8x8xf32>
    %29 = arith.addf %24, %28 : vector<8x8x8xf32>
    %cst_20 = arith.constant -5.000000e+00 : f32
    %cst_21 = arith.constant 5.000000e+00 : f32
    %30 = vector.broadcast %cst_20 : f32 to vector<8x8x8xf32>
    %31 = arith.maximumf %30, %29 : vector<8x8x8xf32>
    %32 = vector.broadcast %cst_21 : f32 to vector<8x8x8xf32>
    %33 = arith.minimumf %32, %31 : vector<8x8x8xf32>
    %cst_22 = arith.constant 1.000000e-28 : f32
    %34 = vector.shape_cast %18 : vector<8x1x8xi1> to vector<8x1x8xi1>
    %35 = vector.broadcast %34 : vector<8x1x8xi1> to vector<8x8x8xi1>
    %36 = vector.broadcast %cst_22 : f32 to vector<8x8x8xf32>
    %37 = arith.select %35, %36, %33 : vector<8x8x8xi1>, vector<8x8x8xf32>
    %cst_23 = arith.constant dense<0xFF800000> : vector<8x8xf32>
    %38 = vector.multi_reduction <maximumf>, %37, %cst_23 [2] : vector<8x8x8xf32> to vector<8x8xf32>
    %39 = vector.shape_cast %38 : vector<8x8xf32> to vector<8x8x1xf32>
    %40 = vector.broadcast %39 : vector<8x8x1xf32> to vector<8x8x8xf32>
    %41 = arith.subf %37, %40 : vector<8x8x8xf32>
    %42 = math.exp %41 : vector<8x8x8xf32>
    %cst_24 = arith.constant dense<0.000000e+00> : vector<8x8xf32>
    %43 = vector.multi_reduction <add>, %42, %cst_24 [2] : vector<8x8x8xf32> to vector<8x8xf32>
    %44 = vector.shape_cast %43 : vector<8x8xf32> to vector<8x8x1xf32>
    %45 = tpu.reciprocal %44 {approx = true} : vector<8x8x1xf32> -> vector<8x8x1xf32>
    %46 = vector.broadcast %45 : vector<8x8x1xf32> to vector<8x8x8xf32>
    %47 = arith.mulf %42, %46 : vector<8x8x8xf32>
    %cst_25 = arith.constant 0.000000e+00 : f32
    %48 = vector.shape_cast %18 : vector<8x1x8xi1> to vector<8x1x8xi1>
    %49 = vector.broadcast %48 : vector<8x1x8xi1> to vector<8x8x8xi1>
    %50 = vector.broadcast %cst_25 : f32 to vector<8x8x8xf32>
    %51 = arith.select %49, %50, %47 : vector<8x8x8xi1>, vector<8x8x8xf32>
    %52 = arith.truncf %51 : vector<8x8x8xf32> to vector<8x8x8xbf16>
    "tpu.trace_start"() <{level = 10 : i32, message = "bqk,bkd->bqd"}> : () -> ()
    %cst_26 = arith.constant dense<0.000000e+00> : vector<8x8x8xf32>
    %53 = tpu.matmul %52, %21, %cst_26 {dimension_numbers = #tpu.dot_dimension_numbers<[2], [1], [1], [2], [0, 0, 0, 1, 1, 2], [0], [0]>} : vector<8x8x8xbf16>, vector<8x8x8xbf16>, vector<8x8x8xf32> -> vector<8x8x8xf32>
    "tpu.trace_stop"() : () -> ()
    %54 = vector.extract_strided_slice %7 {offsets = [0, 0, 8], sizes = [8, 8, 8], strides = [1, 1, 1]} : vector<8x8x96xbf16> to vector<8x8x8xbf16>
    %55 = vector.extract_strided_slice %7 {offsets = [0, 0, 40], sizes = [8, 8, 8], strides = [1, 1, 1]} : vector<8x8x96xbf16> to vector<8x8x8xbf16>
    %56 = vector.extract_strided_slice %7 {offsets = [0, 0, 72], sizes = [8, 8, 8], strides = [1, 1, 1]} : vector<8x8x96xbf16> to vector<8x8x8xbf16>
    "tpu.trace_start"() <{level = 10 : i32, message = "bqd,bkd->bqk"}> : () -> ()
    %cst_27 = arith.constant dense<0.000000e+00> : vector<8x8x8xf32>
    %57 = tpu.matmul %54, %55, %cst_27 {dimension_numbers = #tpu.dot_dimension_numbers<[2], [2], [1], [1], [0, 0, 0, 1, 1, 1], [0], [0]>} : vector<8x8x8xbf16>, vector<8x8x8xbf16>, vector<8x8x8xf32> -> vector<8x8x8xf32>
    "tpu.trace_stop"() : () -> ()
    %cst_28 = arith.constant 0.353553385 : f32
    %58 = vector.broadcast %cst_28 : f32 to vector<8x8x8xf32>
    %59 = arith.mulf %57, %58 : vector<8x8x8xf32>
    %60 = vector.extract_strided_slice %13 {offsets = [0, 8], sizes = [64, 8], strides = [1, 1]} : vector<64x32xf32> to vector<64x8xf32>
    %61 = vector.shape_cast %60 : vector<64x8xf32> to vector<8x8x8xf32>
    %62 = vector.broadcast %15 : vector<1x8x8xf32> to vector<8x8x8xf32>
    %63 = arith.mulf %61, %62 : vector<8x8x8xf32>
    %64 = arith.addf %59, %63 : vector<8x8x8xf32>
    %cst_29 = arith.constant -5.000000e+00 : f32
    %cst_30 = arith.constant 5.000000e+00 : f32
    %65 = vector.broadcast %cst_29 : f32 to vector<8x8x8xf32>
    %66 = arith.maximumf %65, %64 : vector<8x8x8xf32>
    %67 = vector.broadcast %cst_30 : f32 to vector<8x8x8xf32>
    %68 = arith.minimumf %67, %66 : vector<8x8x8xf32>
    %cst_31 = arith.constant 1.000000e-28 : f32
    %69 = vector.shape_cast %18 : vector<8x1x8xi1> to vector<8x1x8xi1>
    %70 = vector.broadcast %69 : vector<8x1x8xi1> to vector<8x8x8xi1>
    %71 = vector.broadcast %cst_31 : f32 to vector<8x8x8xf32>
    %72 = arith.select %70, %71, %68 : vector<8x8x8xi1>, vector<8x8x8xf32>
    %cst_32 = arith.constant dense<0xFF800000> : vector<8x8xf32>
    %73 = vector.multi_reduction <maximumf>, %72, %cst_32 [2] : vector<8x8x8xf32> to vector<8x8xf32>
    %74 = vector.shape_cast %73 : vector<8x8xf32> to vector<8x8x1xf32>
    %75 = vector.broadcast %74 : vector<8x8x1xf32> to vector<8x8x8xf32>
    %76 = arith.subf %72, %75 : vector<8x8x8xf32>
    %77 = math.exp %76 : vector<8x8x8xf32>
    %cst_33 = arith.constant dense<0.000000e+00> : vector<8x8xf32>
    %78 = vector.multi_reduction <add>, %77, %cst_33 [2] : vector<8x8x8xf32> to vector<8x8xf32>
    %79 = vector.shape_cast %78 : vector<8x8xf32> to vector<8x8x1xf32>
    %80 = tpu.reciprocal %79 {approx = true} : vector<8x8x1xf32> -> vector<8x8x1xf32>
    %81 = vector.broadcast %80 : vector<8x8x1xf32> to vector<8x8x8xf32>
    %82 = arith.mulf %77, %81 : vector<8x8x8xf32>
    %cst_34 = arith.constant 0.000000e+00 : f32
    %83 = vector.shape_cast %18 : vector<8x1x8xi1> to vector<8x1x8xi1>
    %84 = vector.broadcast %83 : vector<8x1x8xi1> to vector<8x8x8xi1>
    %85 = vector.broadcast %cst_34 : f32 to vector<8x8x8xf32>
    %86 = arith.select %84, %85, %82 : vector<8x8x8xi1>, vector<8x8x8xf32>
    %87 = arith.truncf %86 : vector<8x8x8xf32> to vector<8x8x8xbf16>
    "tpu.trace_start"() <{level = 10 : i32, message = "bqk,bkd->bqd"}> : () -> ()
    %cst_35 = arith.constant dense<0.000000e+00> : vector<8x8x8xf32>
    %88 = tpu.matmul %87, %56, %cst_35 {dimension_numbers = #tpu.dot_dimension_numbers<[2], [1], [1], [2], [0, 0, 0, 1, 1, 2], [0], [0]>} : vector<8x8x8xbf16>, vector<8x8x8xbf16>, vector<8x8x8xf32> -> vector<8x8x8xf32>
    "tpu.trace_stop"() : () -> ()
    %89 = vector.extract_strided_slice %7 {offsets = [0, 0, 16], sizes = [8, 8, 8], strides = [1, 1, 1]} : vector<8x8x96xbf16> to vector<8x8x8xbf16>
    %90 = vector.extract_strided_slice %7 {offsets = [0, 0, 48], sizes = [8, 8, 8], strides = [1, 1, 1]} : vector<8x8x96xbf16> to vector<8x8x8xbf16>
    %91 = vector.extract_strided_slice %7 {offsets = [0, 0, 80], sizes = [8, 8, 8], strides = [1, 1, 1]} : vector<8x8x96xbf16> to vector<8x8x8xbf16>
    "tpu.trace_start"() <{level = 10 : i32, message = "bqd,bkd->bqk"}> : () -> ()
    %cst_36 = arith.constant dense<0.000000e+00> : vector<8x8x8xf32>
    %92 = tpu.matmul %89, %90, %cst_36 {dimension_numbers = #tpu.dot_dimension_numbers<[2], [2], [1], [1], [0, 0, 0, 1, 1, 1], [0], [0]>} : vector<8x8x8xbf16>, vector<8x8x8xbf16>, vector<8x8x8xf32> -> vector<8x8x8xf32>
    "tpu.trace_stop"() : () -> ()
    %cst_37 = arith.constant 0.353553385 : f32
    %93 = vector.broadcast %cst_37 : f32 to vector<8x8x8xf32>
    %94 = arith.mulf %92, %93 : vector<8x8x8xf32>
    %95 = vector.extract_strided_slice %13 {offsets = [0, 16], sizes = [64, 8], strides = [1, 1]} : vector<64x32xf32> to vector<64x8xf32>
    %96 = vector.shape_cast %95 : vector<64x8xf32> to vector<8x8x8xf32>
    %97 = vector.broadcast %15 : vector<1x8x8xf32> to vector<8x8x8xf32>
    %98 = arith.mulf %96, %97 : vector<8x8x8xf32>
    %99 = arith.addf %94, %98 : vector<8x8x8xf32>
    %cst_38 = arith.constant -5.000000e+00 : f32
    %cst_39 = arith.constant 5.000000e+00 : f32
    %100 = vector.broadcast %cst_38 : f32 to vector<8x8x8xf32>
    %101 = arith.maximumf %100, %99 : vector<8x8x8xf32>
    %102 = vector.broadcast %cst_39 : f32 to vector<8x8x8xf32>
    %103 = arith.minimumf %102, %101 : vector<8x8x8xf32>
    %cst_40 = arith.constant 1.000000e-28 : f32
    %104 = vector.shape_cast %18 : vector<8x1x8xi1> to vector<8x1x8xi1>
    %105 = vector.broadcast %104 : vector<8x1x8xi1> to vector<8x8x8xi1>
    %106 = vector.broadcast %cst_40 : f32 to vector<8x8x8xf32>
    %107 = arith.select %105, %106, %103 : vector<8x8x8xi1>, vector<8x8x8xf32>
    %cst_41 = arith.constant dense<0xFF800000> : vector<8x8xf32>
    %108 = vector.multi_reduction <maximumf>, %107, %cst_41 [2] : vector<8x8x8xf32> to vector<8x8xf32>
    %109 = vector.shape_cast %108 : vector<8x8xf32> to vector<8x8x1xf32>
    %110 = vector.broadcast %109 : vector<8x8x1xf32> to vector<8x8x8xf32>
    %111 = arith.subf %107, %110 : vector<8x8x8xf32>
    %112 = math.exp %111 : vector<8x8x8xf32>
    %cst_42 = arith.constant dense<0.000000e+00> : vector<8x8xf32>
    %113 = vector.multi_reduction <add>, %112, %cst_42 [2] : vector<8x8x8xf32> to vector<8x8xf32>
    %114 = vector.shape_cast %113 : vector<8x8xf32> to vector<8x8x1xf32>
    %115 = tpu.reciprocal %114 {approx = true} : vector<8x8x1xf32> -> vector<8x8x1xf32>
    %116 = vector.broadcast %115 : vector<8x8x1xf32> to vector<8x8x8xf32>
    %117 = arith.mulf %112, %116 : vector<8x8x8xf32>
    %cst_43 = arith.constant 0.000000e+00 : f32
    %118 = vector.shape_cast %18 : vector<8x1x8xi1> to vector<8x1x8xi1>
    %119 = vector.broadcast %118 : vector<8x1x8xi1> to vector<8x8x8xi1>
    %120 = vector.broadcast %cst_43 : f32 to vector<8x8x8xf32>
    %121 = arith.select %119, %120, %117 : vector<8x8x8xi1>, vector<8x8x8xf32>
    %122 = arith.truncf %121 : vector<8x8x8xf32> to vector<8x8x8xbf16>
    "tpu.trace_start"() <{level = 10 : i32, message = "bqk,bkd->bqd"}> : () -> ()
    %cst_44 = arith.constant dense<0.000000e+00> : vector<8x8x8xf32>
    %123 = tpu.matmul %122, %91, %cst_44 {dimension_numbers = #tpu.dot_dimension_numbers<[2], [1], [1], [2], [0, 0, 0, 1, 1, 2], [0], [0]>} : vector<8x8x8xbf16>, vector<8x8x8xbf16>, vector<8x8x8xf32> -> vector<8x8x8xf32>
    "tpu.trace_stop"() : () -> ()
    %124 = vector.extract_strided_slice %7 {offsets = [0, 0, 24], sizes = [8, 8, 8], strides = [1, 1, 1]} : vector<8x8x96xbf16> to vector<8x8x8xbf16>
    %125 = vector.extract_strided_slice %7 {offsets = [0, 0, 56], sizes = [8, 8, 8], strides = [1, 1, 1]} : vector<8x8x96xbf16> to vector<8x8x8xbf16>
    %126 = vector.extract_strided_slice %7 {offsets = [0, 0, 88], sizes = [8, 8, 8], strides = [1, 1, 1]} : vector<8x8x96xbf16> to vector<8x8x8xbf16>
    "tpu.trace_start"() <{level = 10 : i32, message = "bqd,bkd->bqk"}> : () -> ()
    %cst_45 = arith.constant dense<0.000000e+00> : vector<8x8x8xf32>
    %127 = tpu.matmul %124, %125, %cst_45 {dimension_numbers = #tpu.dot_dimension_numbers<[2], [2], [1], [1], [0, 0, 0, 1, 1, 1], [0], [0]>} : vector<8x8x8xbf16>, vector<8x8x8xbf16>, vector<8x8x8xf32> -> vector<8x8x8xf32>
    "tpu.trace_stop"() : () -> ()
    %cst_46 = arith.constant 0.353553385 : f32
    %128 = vector.broadcast %cst_46 : f32 to vector<8x8x8xf32>
    %129 = arith.mulf %127, %128 : vector<8x8x8xf32>
    %130 = vector.extract_strided_slice %13 {offsets = [0, 24], sizes = [64, 8], strides = [1, 1]} : vector<64x32xf32> to vector<64x8xf32>
    %131 = vector.shape_cast %130 : vector<64x8xf32> to vector<8x8x8xf32>
    %132 = vector.broadcast %15 : vector<1x8x8xf32> to vector<8x8x8xf32>
    %133 = arith.mulf %131, %132 : vector<8x8x8xf32>
    %134 = arith.addf %129, %133 : vector<8x8x8xf32>
    %cst_47 = arith.constant -5.000000e+00 : f32
    %cst_48 = arith.constant 5.000000e+00 : f32
    %135 = vector.broadcast %cst_47 : f32 to vector<8x8x8xf32>
    %136 = arith.maximumf %135, %134 : vector<8x8x8xf32>
    %137 = vector.broadcast %cst_48 : f32 to vector<8x8x8xf32>
    %138 = arith.minimumf %137, %136 : vector<8x8x8xf32>
    %cst_49 = arith.constant 1.000000e-28 : f32
    %139 = vector.shape_cast %18 : vector<8x1x8xi1> to vector<8x1x8xi1>
    %140 = vector.broadcast %139 : vector<8x1x8xi1> to vector<8x8x8xi1>
    %141 = vector.broadcast %cst_49 : f32 to vector<8x8x8xf32>
    %142 = arith.select %140, %141, %138 : vector<8x8x8xi1>, vector<8x8x8xf32>
    %cst_50 = arith.constant dense<0xFF800000> : vector<8x8xf32>
    %143 = vector.multi_reduction <maximumf>, %142, %cst_50 [2] : vector<8x8x8xf32> to vector<8x8xf32>
    %144 = vector.shape_cast %143 : vector<8x8xf32> to vector<8x8x1xf32>
    %145 = vector.broadcast %144 : vector<8x8x1xf32> to vector<8x8x8xf32>
    %146 = arith.subf %142, %145 : vector<8x8x8xf32>
    %147 = math.exp %146 : vector<8x8x8xf32>
    %cst_51 = arith.constant dense<0.000000e+00> : vector<8x8xf32>
    %148 = vector.multi_reduction <add>, %147, %cst_51 [2] : vector<8x8x8xf32> to vector<8x8xf32>
    %149 = vector.shape_cast %148 : vector<8x8xf32> to vector<8x8x1xf32>
    %150 = tpu.reciprocal %149 {approx = true} : vector<8x8x1xf32> -> vector<8x8x1xf32>
    %151 = vector.broadcast %150 : vector<8x8x1xf32> to vector<8x8x8xf32>
    %152 = arith.mulf %147, %151 : vector<8x8x8xf32>
    %cst_52 = arith.constant 0.000000e+00 : f32
    %153 = vector.shape_cast %18 : vector<8x1x8xi1> to vector<8x1x8xi1>
    %154 = vector.broadcast %153 : vector<8x1x8xi1> to vector<8x8x8xi1>
    %155 = vector.broadcast %cst_52 : f32 to vector<8x8x8xf32>
    %156 = arith.select %154, %155, %152 : vector<8x8x8xi1>, vector<8x8x8xf32>
    %157 = arith.truncf %156 : vector<8x8x8xf32> to vector<8x8x8xbf16>
    "tpu.trace_start"() <{level = 10 : i32, message = "bqk,bkd->bqd"}> : () -> ()
    %cst_53 = arith.constant dense<0.000000e+00> : vector<8x8x8xf32>
    %158 = tpu.matmul %157, %126, %cst_53 {dimension_numbers = #tpu.dot_dimension_numbers<[2], [1], [1], [2], [0, 0, 0, 1, 1, 2], [0], [0]>} : vector<8x8x8xbf16>, vector<8x8x8xbf16>, vector<8x8x8xf32> -> vector<8x8x8xf32>
    "tpu.trace_stop"() : () -> ()
    %159 = tpu.concatenate %53, %88, %123, %158 in 2 : vector<8x8x8xf32>, vector<8x8x8xf32>, vector<8x8x8xf32>, vector<8x8x8xf32> -> vector<8x8x32xf32>
    %160 = vector.shape_cast %159 : vector<8x8x32xf32> to vector<64x32xf32>
    %161 = arith.truncf %160 : vector<64x32xf32> to vector<64x32xbf16>
    %c0_54 = arith.constant 0 : index
    %c0_55 = arith.constant 0 : index
    %162 = vector.load %arg9[%c0_54, %c0_55] : memref<32x32xbf16, #tpu.memory_space<vmem>>, vector<32x32xbf16>
    %cst_56 = arith.constant dense<0.000000e+00> : vector<64x32xf32>
    %163 = tpu.matmul %161, %162, %cst_56 {dimension_numbers = #tpu.dot_dimension_numbers<[1], [0], [0], [1], [0, 0, 1, 1], [], []>} : vector<64x32xbf16>, vector<32x32xbf16>, vector<64x32xf32> -> vector<64x32xf32>
    %c0_57 = arith.constant 0 : index
    %c0_58 = arith.constant 0 : index
    %164 = vector.load %arg10[%c0_57, %c0_58] : memref<1x32xf32, #tpu.memory_space<vmem>>, vector<1x32xf32>
    %165 = vector.broadcast %164 : vector<1x32xf32> to vector<64x32xf32>
    %166 = arith.addf %163, %165 : vector<64x32xf32>
    %c0_59 = arith.constant 0 : index
    %c0_60 = arith.constant 0 : index
    %167 = vector.load %arg13[%c0_59, %c0_60] : memref<64x32xf32, #tpu.memory_space<vmem>>, vector<64x32xf32>
    tpu.vector_store %arg13[%c0_59, %c0_60], %166 {strides = array<i32>} : memref<64x32xf32, #tpu.memory_space<vmem>>, vector<64x32xf32>,
    %168 = tpu.concatenate %37, %72, %107, %142 in 2 : vector<8x8x8xf32>, vector<8x8x8xf32>, vector<8x8x8xf32>, vector<8x8x8xf32> -> vector<8x8x32xf32>
    %169 = vector.shape_cast %168 : vector<8x8x32xf32> to vector<64x32xf32>
    %170 = arith.truncf %169 : vector<64x32xf32> to vector<64x32xbf16>
    %c0_61 = arith.constant 0 : index
    %c0_62 = arith.constant 0 : index
    %171 = vector.load %arg11[%c0_61, %c0_62] : memref<32x64xbf16, #tpu.memory_space<vmem>>, vector<32x64xbf16>
    %cst_63 = arith.constant dense<0.000000e+00> : vector<64x64xf32>
    %172 = tpu.matmul %170, %171, %cst_63 {dimension_numbers = #tpu.dot_dimension_numbers<[1], [0], [0], [1], [0, 0, 1, 1], [], []>} : vector<64x32xbf16>, vector<32x64xbf16>, vector<64x64xf32> -> vector<64x64xf32>
    %c0_64 = arith.constant 0 : index
    %c0_65 = arith.constant 0 : index
    %173 = vector.load %arg12[%c0_64, %c0_65] : memref<1x64xf32, #tpu.memory_space<vmem>>, vector<1x64xf32>
    %174 = vector.broadcast %173 : vector<1x64xf32> to vector<64x64xf32>
    %175 = arith.addf %172, %174 : vector<64x64xf32>
    %c0_66 = arith.constant 0 : index
    %c0_67 = arith.constant 0 : index
    %176 = vector.load %arg14[%c0_66, %c0_67] : memref<64x64xf32, #tpu.memory_space<vmem>>, vector<64x64xf32>
    tpu.vector_store %arg14[%c0_66, %c0_67], %175 {strides = array<i32>} : memref<64x64xf32, #tpu.memory_space<vmem>>, vector<64x64xf32>,
    return
  }
  func.func @transform_0(%arg0: i32) -> (i32, i32) {
    %c0_i32 = arith.constant 0 : i32
    %c0_i32_0 = arith.constant 0 : i32
    return %arg0, %c0_i32 : i32, i32
  }
  func.func @transform_1(%arg0: i32) -> (i32, i32) {
    %c0_i32 = arith.constant 0 : i32
    %c0_i32_0 = arith.constant 0 : i32
    return %arg0, %c0_i32 : i32, i32
  }
  func.func @transform_2(%arg0: i32) -> (i32, i32, i32) {
    %c0_i32 = arith.constant 0 : i32
    %c0_i32_0 = arith.constant 0 : i32
    %c0_i32_1 = arith.constant 0 : i32
    return %arg0, %c0_i32, %c0_i32_0 : i32, i32, i32
  }
  func.func @transform_3(%arg0: i32) -> (i32, i32) {
    %c0_i32 = arith.constant 0 : i32
    %c0_i32_0 = arith.constant 0 : i32
    %c0_i32_1 = arith.constant 0 : i32
    return %c0_i32, %c0_i32_0 : i32, i32
  }
  func.func @transform_4(%arg0: i32) -> (i32, i32) {
    %c0_i32 = arith.constant 0 : i32
    %c0_i32_0 = arith.constant 0 : i32
    %c0_i32_1 = arith.constant 0 : i32
    return %c0_i32, %c0_i32_0 : i32, i32
  }
  func.func @transform_5(%arg0: i32) -> (i32, i32) {
    %c0_i32 = arith.constant 0 : i32
    %c0_i32_0 = arith.constant 0 : i32
    %c0_i32_1 = arith.constant 0 : i32
    return %c0_i32, %c0_i32_0 : i32, i32
  }
  func.func @transform_6(%arg0: i32) -> (i32, i32) {
    %c0_i32 = arith.constant 0 : i32
    %c0_i32_0 = arith.constant 0 : i32
    %c0_i32_1 = arith.constant 0 : i32
    return %c0_i32, %c0_i32_0 : i32, i32
  }
  func.func @transform_7(%arg0: i32) -> (i32, i32) {
    %c0_i32 = arith.constant 0 : i32
    %c0_i32_0 = arith.constant 0 : i32
    %c0_i32_1 = arith.constant 0 : i32
    return %c0_i32, %c0_i32_0 : i32, i32
  }
  func.func @transform_8(%arg0: i32) -> (i32, i32) {
    %c0_i32 = arith.constant 0 : i32
    %c0_i32_0 = arith.constant 0 : i32
    %c0_i32_1 = arith.constant 0 : i32
    return %c0_i32, %c0_i32_0 : i32, i32
  }
  func.func @transform_9(%arg0: i32) -> (i32, i32) {
    %c0_i32 = arith.constant 0 : i32
    %c0_i32_0 = arith.constant 0 : i32
    %c0_i32_1 = arith.constant 0 : i32
    return %c0_i32, %c0_i32_0 : i32, i32
  }
  func.func @transform_10(%arg0: i32) -> (i32, i32) {
    %c0_i32 = arith.constant 0 : i32
    %c0_i32_0 = arith.constant 0 : i32
    %c0_i32_1 = arith.constant 0 : i32
    return %c0_i32, %c0_i32_0 : i32, i32
  }
  func.func @transform_11(%arg0: i32) -> (i32, i32) {
    %c0_i32 = arith.constant 0 : i32
    %c0_i32_0 = arith.constant 0 : i32
    %c0_i32_1 = arith.constant 0 : i32
    return %c0_i32, %c0_i32_0 : i32, i32
  }
  func.func @transform_12(%arg0: i32) -> (i32, i32) {
    %c0_i32 = arith.constant 0 : i32
    %c0_i32_0 = arith.constant 0 : i32
    return %arg0, %c0_i32 : i32, i32
  }
  func.func @transform_13(%arg0: i32) -> (i32, i32) {
    %c0_i32 = arith.constant 0 : i32
    %c0_i32_0 = arith.constant 0 : i32
    return %arg0, %c0_i32 : i32, i32
  }
}

</mosaic_0001>

<bundles_post_ra>
// kernel: tile.8
= control target key start
LH: loop header
LB: loop body
LE: loop exit
PB: predicated region body
PF: predicated region fallthrough
CT: control target
= control target key end

     0   :  { %s22_s0 = inlined_call_operand.vmem [shape: f32[8], index: 0, kind: input, shape index: {}]   ;;  %s23_s1 = inlined_call_operand.vmem [shape: f32[8,8], index: 1, kind: output, shape index: {}]  }
   0x1   :  { %v4_v0 = vld [vmem:[%s22_s0] ss:$0 sm:$0xff] }
   0x2   :  { %5 = vst [vmem:[%s23_s1] sm:$0xff] %v4_v0 }

// kernel: tile.9
= control target key start
LH: loop header
LB: loop body
LE: loop exit
PB: predicated region body
PF: predicated region fallthrough
CT: control target
= control target key end

     0   :  { %s67_s10 = smov 56   ;;  %s68_s11 = smov 40   ;;  %vm3_vm0 = vcmask 64512   ;;  %vm9_vm1 = vcmask 523712   ;;  %vm15_vm2 = vcmask 458112   ;;  %vm21_vm3 = vcmask 392512   ;;  %s111_s0 = inlined_call_operand.vmem [shape: f32[8,8], index: 0, kind: input, shape index: {}]   ;;  %s112_s1 = inlined_call_operand.vmem [shape: f32[1,64], index: 1, kind: output, shape index: {}]  }
   0x1   :  { %v53_v0 = vld [vmem:[%s111_s0 + $0x7] sm:$0x1]   ;;  %v55_v1 = vld [vmem:[%s111_s0 + $0x5] sm:$0x1]   ;;  %v54_v2 = vld [vmem:[%s111_s0 + $0x6] sm:$0x1]  }
   0x2   :  { %7 = vrot.lane.b32.xlu0 %v53_v0, %s67_s10  ;;  %19 = vrot.lane.b32.xlu1 %v55_v1, %s68_s11  ;;  %v56_v3 = vld [vmem:[%s111_s0 + $0x4] sm:$0x1]   ;;  %v2_v4 = vld [vmem:[%s111_s0] sm:$0x1]   ;;  %s69_s18 = smov 48   ;;  %s70_s19 = smov 32  }
   0x3   :  { %4 = vst.msk [vmem:[#allocation0] sm:$0x1] %vm3_vm0, %v2_v4   ;;  %v57_v5 = vld [vmem:[%s111_s0 + $0x3] sm:$0x1]   ;;  %v58_v6 = vld [vmem:[%s111_s0 + $0x2] sm:$0x1]  }
   0x4   :  { %s71_s24 = smov 24   ;;  %s72_s25 = smov 16   ;;  %v59_v7 = vld [vmem:[%s111_s0 + $0x1] sm:$0x1]   ;;  %vm27_vm4 = vcmask 326912   ;;  %vm33_vm5 = vcmask 261312  }
   0x5   :  { %s73_s0 = smov 8   ;;  %vm39_vm6 = vcmask 195712   ;;  %vm45_vm7 = vcmask 130112  }
   0x6   :  { %13 = vrot.lane.b32.xlu0 %v54_v2, %s69_s18  ;;  %25 = vrot.lane.b32.xlu1 %v56_v3, %s70_s19 }
   0xa   :  { %31 = vrot.lane.b32.xlu0 %v57_v5, %s71_s24  ;;  %37 = vrot.lane.b32.xlu1 %v58_v6, %s72_s25 }
   0xe   :  { %43 = vrot.lane.b32.xlu0 %v59_v7, %s73_s0 }
  0x74   :  { %v8_v8 = vpop.permute.xlu0 %7   ;;  %v20_v9 = vpop.permute.xlu1 %19  }
  0x75   :  { %10 = vst.msk [vmem:[#allocation0] sm:$0x1] %vm9_vm1, %v8_v8  }
  0x78   :  { %v14_v10 = vpop.permute.xlu0 %13   ;;  %v26_v11 = vpop.permute.xlu1 %25  }
  0x79   :  { %16 = vst.msk [vmem:[#allocation0] sm:$0x1] %vm15_vm2, %v14_v10  }
  0x7a   :  { %22 = vst.msk [vmem:[#allocation0] sm:$0x1] %vm21_vm3, %v20_v9  }
  0x7b   :  { %28 = vst.msk [vmem:[#allocation0] sm:$0x1] %vm27_vm4, %v26_v11  }
  0x7c   :  { %v32_v12 = vpop.permute.xlu0 %31   ;;  %v38_v13 = vpop.permute.xlu1 %37  }
  0x7d   :  { %34 = vst.msk [vmem:[#allocation0] sm:$0x1] %vm33_vm5, %v32_v12  }
  0x7e   :  { %40 = vst.msk [vmem:[#allocation0] sm:$0x1] %vm39_vm6, %v38_v13  }
  0x80   :  { %v44_v14 = vpop.permute.xlu0 %43  }
  0x81   :  { %46 = vst.msk [vmem:[#allocation0] sm:$0x1] %vm45_vm7, %v44_v14  }
  0x88   :  { %v50_v15 = vld [vmem:[#allocation0] sm:$0x1] }
  0x89   :  { %52 = vst [vmem:[%s112_s1] sm:$0x1] %v50_v15 }

// kernel: temporal_attention_forward.1
= control target key start
LH: loop header
LB: loop body
LE: loop exit
PB: predicated region body
PF: predicated region fallthrough
CT: control target
= control target key end

     0   :  { %vm95_vm0 = vcmask 261120   ;;  %vm248_vm1 = vcmask 523264   ;;  %v7402_v14 = vmov 0.0   ;;  %vm5718_vm2 = vmmov 0   ;;  %s5723_s17 = smov 120   ;;  %s5727_s18 = smov 112   ;;  %s7388_s4 = inlined_call_operand.vmem [shape: bf16[32,96], index: 4, kind: input, shape index: {}]   ;;  %s7389_s0 = inlined_call_operand.vmem [shape: bf16[64,32], index: 0, kind: input, shape index: {}]   ;;  %s7390_s6 = inlined_call_operand.vmem [shape: bf16[64,32], index: 6, kind: input, shape index: {}]   ;;  %s7391_s1 = inlined_call_operand.vmem [shape: bf16[64,64], index: 1, kind: input, shape index: {}]   ;;  %s7392_s5 = inlined_call_operand.vmem [shape: f32[1,96], index: 5, kind: input, shape index: {}]   ;;  %s7393_s2 = inlined_call_operand.vmem [shape: f32[8,1,8], index: 2, kind: input, shape index: {}]   ;;  %s7394_s7 = inlined_call_operand.vmem [shape: f32[1,32], index: 7, kind: input, shape index: {}]   ;;  %s7395_s3 = inlined_call_operand.vmem [shape: f32[8,8], index: 3, kind: input, shape index: {}]   ;;  %s7396_s10 = inlined_call_operand.vmem [shape: bf16[32,64], index: 10, kind: input, shape index: {}]   ;;  %s7397_s8 = inlined_call_operand.vmem [shape: bf16[32,32], index: 8, kind: input, shape index: {}]   ;;  %s7398_s11 = inlined_call_operand.vmem [shape: f32[1,64], index: 11, kind: input, shape index: {}]   ;;  %s7399_s13 = inlined_call_operand.vmem [shape: f32[64,64], index: 13, kind: output, shape index: {1}]   ;;  %s7400_s9 = inlined_call_operand.vmem [shape: f32[1,32], index: 9, kind: input, shape index: {}]   ;;  %s7401_s12 = inlined_call_operand.vmem [shape: f32[64,32], index: 12, kind: output, shape index: {0}]  }
   0x1   :  { %v5570_v0 = vld [vmem:[%s7388_s4] sm:$0xff]   ;;  %v5571_v1 = vld [vmem:[%s7388_s4 + $0x8] sm:$0xff]   ;;  %v5574_v4 = vld [vmem:[%s7389_s0 + $0x10] sm:$0xff]   ;;  %vm346_vm3 = vcmask 64512   ;;  %vm941_vm4 = vcmask 1043456   ;;  %s5726_s4 = smov 80  }
   0x2   :  { %4997 = vmatprep.subr.bf16.mxu0 %v5570_v0  ;;  %v5572_v2 = vld [vmem:[%s7389_s0] sm:$0xff]   ;;  %v5573_v3 = vld [vmem:[%s7389_s0 + $0x8] sm:$0xff]   ;;  %v5575_v5 = vld [vmem:[%s7389_s0 + $0x18] sm:$0xff]   ;;  %s5728_s21 = smov 16   ;;  %s5730_s22 = smov 72  }
   0x3   :  { %4998 = vmatpush3.bf16.msra.mxu0 %v5570_v0  ;;  %5001 = vmatprep.mubr.msk.bf16.mxu0 %vm95_vm0, %v5572_v2  ;;  %v5576_v6 = vld [vmem:[%s7390_s6] sm:$0xff]   ;;  %v5577_v7 = vld [vmem:[%s7390_s6 + $0x8] sm:$0xff]   ;;  %v5578_v8 = vld [vmem:[%s7390_s6 + $0x10] sm:$0xff]   ;;  %s5731_s23 = smov 104   ;;  %s5732_s24 = smov 24  }
   0x4   :  { %4999 = vmatprep.subr.bf16.mxu0 %v5571_v1  ;;  %5009 = vmatprep.subr.bf16.mxu1 %v5576_v6  ;;  %v5580_v9 = vld [vmem:[%s7391_s1] sm:$0xff]   ;;  %v5579_v10 = vld [vmem:[%s7390_s6 + $0x18] sm:$0xff]   ;;  %v5581_v11 = vld [vmem:[%s7391_s1 + $0x8] sm:$0xff]  }
   0x5   :  { %5010 = vmatpush3.bf16.msra.mxu1 %v5576_v6  ;;  %5017 = vmatprep.mubr.msk.bf16.mxu1 %vm248_vm1, %v5580_v9  ;;  %v5582_v12 = vld [vmem:[%s7391_s1 + $0x10] sm:$0xff]   ;;  %v5583_v13 = vld [vmem:[%s7391_s1 + $0x18] sm:$0xff]   ;;  %v4709_v15 = vld [vmem:[%s7392_s5] ss:$0 sm:$0xff]  ;;  %s5719_s1 = smov 96   ;;  %s5720_s5 = smov 64  }
   0x6   :  { %5011 = vmatprep.subr.bf16.mxu1 %v5577_v7  ;;  %v5961_v6 = vld [vmem:[%s7394_s7] ss:$0 sm:$0xff]  ;;  %s5733_s7 = smov 40  }
   0x7   :  { %5000 = vmatpush3.bf16.msra.mxu0 %v5571_v1 }
   0x8   :  { %5025 = vmatprep.subr.bf16.mxu0 %v7402_v14 }
   0x9   :  { %5012 = vmatpush3.bf16.msra.mxu1 %v5577_v7 }
   0xa   :  { %5002 = vmatmul.mubr.msk.bf16.vlgmr.msra.gmra.mrb[0].mxu0 %vm95_vm0, %v5573_v3  ;;  %5013 = vmatprep.subr.bf16.mxu1 %v5578_v8 }
   0xb   :  { %5005 = vmatprep.mubr.msk.bf16.mxu0 %vm95_vm0, %v5574_v4  ;;  %v784_v4 = vlaneseq }
   0xd   :  { %5014 = vmatpush3.bf16.msra.mxu1 %v5578_v8  ;;  %v785_v7 = vshrl.u32 %v784_v4, 7  ;;  %v327_v8 = vld [vmem:[%s7393_s2] sm:$0x1] }
   0xe   :  { %5015 = vmatprep.subr.bf16.mxu1 %v5579_v10  ;;  %vm335_vm6 = vcmp.eq.f32.partialorder %v327_v8, 0.0 }
  0x11   :  { %5016 = vmatpush3.bf16.msra.mxu1 %v5579_v10  ;;  %v5972_v10 = vld [vmem:[%s7395_s3] sm:$0xff] }
  0x12   :  { %5006 = vmatmul.mubr.msk.bf16.gmra.mrb[4].mxu0 %vm95_vm0, %v5575_v5  ;;  %5037 = vmatprep.subr.bf16.mxu1 %v7402_v14  ;;  %v329_v5 = vld [vmem:[%s7393_s2 + $0x2] sm:$0x1] }
  0x13   :  { %5027 = vmatprep.mubr.msk.bf16.mxu0 %vm5718_vm2, %v7402_v14  ;;  %vm337_vm5 = vcmp.eq.f32.partialorder %v329_v5, 0.0 }
  0x14   :  { %5018 = vmatmul.mubr.msk.bf16.vlgmr.msra.gmra.mrb[0].mxu1 %vm248_vm1, %v5581_v11  ;;  %v5974_v11 = vsub.s32 0, %v785_v7 }
  0x15   :  { %5021 = vmatprep.mubr.msk.bf16.mxu1 %vm248_vm1, %v5582_v12  ;;  %v5721_v12 = vmov 0  }
  0x1c   :  { %5022 = vmatmul.mubr.msk.bf16.gmra.mrb[4].mxu1 %vm248_vm1, %v5583_v13  ;;  %v778_v13 = vsel %vm337_vm5, 1, %v5721_v12 }
  0x1d   :  { %5039 = vmatprep.mubr.msk.bf16.mxu1 %vm5718_vm2, %v7402_v14 }
  0xdd   :  { %v5003_v16 = vpop.f32.mrb[0].mxu0 }
  0xde   :  { %v151_v17 = vadd.f32 %v5003_v16, %v4709_v15  ;;  %v142_v18 = vpop.f32.mrb[1].mxu0 }
  0xdf   :  { %v143_v19 = vadd.f32 %v4709_v15, %v142_v18  ;;  %v5004_v20 = vpop.f32.mrb[2].mxu0 }
  0xe0   :  { %v5863_v21 = vpack.c.bf16 %v151_v17, %v151_v17  ;;  %v154_v22 = vadd.f32 %v5004_v20, %v4709_v15  ;;  %v145_v23 = vpop.f32.mrb[3].mxu0  ;;  %v776_v17 = vsel %vm335_vm6, 1, %v5721_v12  ;;  %v328_v20 = vld [vmem:[%s7393_s2 + $0x1] sm:$0x1] }
  0xe1   :  { %v5865_v24 = vpack.c.bf16 %v143_v19, %v143_v19  ;;  %v146_v25 = vadd.f32 %v4709_v15, %v145_v23  ;;  %v795_v19 = vrot.slane %v778_v13, %v5974_v11  ;;  %vm336_vm7 = vcmp.eq.f32.partialorder %v328_v20, 0.0 }
  0xe2   :  { %443 = vrot.lane.b32.xlu1 %v5863_v21, %s5719_s1  ;;  %v5869_v26 = vpack.c.bf16 %v154_v22, %v154_v22  ;;  %v331_v22 = vld [vmem:[%s7393_s2 + $0x4] sm:$0x1] }
  0xe3   :  { %344 = vrot.lane.b32.xlu0 %v5865_v24, %s5719_s1  ;;  %v5871_v27 = vpack.c.bf16 %v146_v25, %v146_v25  ;;  %vm339_vm8 = vcmp.eq.f32.partialorder %v331_v22, 0.0  ;;  %vm5993_vm9 = vcmp.eq.s32.totalorder %v795_v19, 1 }
  0xe5   :  { %v5007_v28 = vpop.f32.mrb[4].mxu0 }
  0xe6   :  { %492 = vrot.lane.b32.xlu1 %v5869_v26, %s5719_s1  ;;  %v158_v29 = vpop.f32.mrb[5].mxu0  ;;  %v167_v30 = vadd.f32 %v5007_v28, %v4709_v15 }
  0xe7   :  { %v159_v31 = vadd.f32 %v4709_v15, %v158_v29  ;;  %v5008_v32 = vpop.f32.mrb[6].mxu0  ;;  %394 = vrot.lane.b32.xlu0 %v5871_v27, %s5719_s1  ;;  %v5019_v50 = vpop.f32.mrb[0].mxu1 }
  0xe8   :  { %v161_v33 = vpop.f32.mrb[7].mxu0  ;;  %v170_v35 = vadd.f32 %v5008_v32, %v4709_v15  ;;  %v5877_v37 = vpack.c.bf16 %v167_v30, %v167_v30  ;;  %v295_v51 = vpop.f32.mrb[1].mxu1  ;;  %v5967_v9 = vadd.f32 %v5019_v50, %v5961_v6  ;;  %v780_v50 = vsel %vm339_vm8, 1, %v5721_v12 }
  0xe9   :  { %v5875_v34 = vpack.c.bf16 %v159_v31, %v159_v31  ;;  %v162_v36 = vadd.f32 %v4709_v15, %v161_v33  ;;  %v5909_v52 = vpop.f32.mrb[2].mxu1  ;;  %v5978_v15 = vadd.f32 %v5961_v6, %v295_v51  ;;  %v787_v33 = vrot.slane %v776_v17, %v5974_v11 }
  0xea   :  { %v5882_v39 = vpack.c.bf16 %v170_v35, %v170_v35  ;;  %v5911_v53 = vpop.f32.mrb[3].mxu1  ;;  %v746_v16 = vmul.f32 %v5972_v10, %v5967_v9  ;;  %v6036_v20 = vadd.f32 %v5909_v52, %v5961_v6 }
  0xeb   :  { %v5879_v38 = vpack.c.bf16 %v162_v36, %v162_v36  ;;  %541 = vrot.lane.b32.xlu0 %v5875_v34, %s5719_s1  ;;  %v744_v30 = vmul.f32 %v5972_v10, %v5978_v15  ;;  %vm6004_vm10 = vcmp.eq.s32.totalorder %v787_v33, 1 }
  0xed   :  { %590 = vrot.lane.b32.xlu1 %v5879_v38, %s5719_s1 }
  0xef   :  { %639 = vrot.lane.b32.xlu0 %v5877_v37, %s5719_s1  ;;  %v5949_v0 = vpop.f32.mrb[4].mxu1 }
  0xf0   :  { %v311_v1 = vpop.f32.mrb[5].mxu1  ;;  %v6040_v22 = vadd.f32 %v5949_v0, %v5961_v6  ;;  %v332_v0 = vld [vmem:[%s7393_s2 + $0x5] sm:$0x1] }
  0xf1   :  { %688 = vrot.lane.b32.xlu1 %v5882_v39, %s5719_s1  ;;  %v5951_v2 = vpop.f32.mrb[6].mxu1  ;;  %vm340_vm15 = vcmp.eq.f32.partialorder %v332_v0, 0.0  ;;  %s5724_s1 = smov 8  }
  0xf2   :  { %v5953_v3 = vpop.f32.mrb[7].mxu1 }
  0xf3   :  { %985 = vrot.lane.b32.xlu0 %v5871_v27, %s5720_s5 }
  0xf5   :  { %936 = vrot.lane.b32.xlu1 %v5865_v24, %s5720_s5 }
  0xf9   :  { %1033 = vrot.lane.b32.xlu1 %v5863_v21, %s5720_s5 }
 0x154   :  { %v444_v40 = vpop.permute.xlu1 %443 }
 0x155   :  { %v449_v41 = vsel %vm346_vm3, %v444_v40, 0  ;;  %v345_v42 = vpop.permute.xlu0 %344 }
 0x156   :  { %v351_v43 = vsel %vm346_vm3, %v345_v42, 0  ;;  %5038 = vmatpush3.bf16.xpose.msra.mxu1 %v449_v41 }
 0x157   :  { %5026 = vmatpush3.bf16.xpose.msra.mxu0 %v351_v43  ;;  %5049 = vmatprep.subr.bf16.mxu1 %v7402_v14 }
 0x158   :  { %5031 = vmatprep.subr.bf16.mxu0 %v7402_v14  ;;  %v493_v45 = vpop.permute.xlu1 %492 }
 0x159   :  { %v395_v44 = vpop.permute.xlu0 %394  ;;  %v498_v57 = vsel %vm346_vm3, %v493_v45, 0  ;;  %v6002_v45 = vadd.f32 %v5961_v6, %v311_v1 }
 0x15a   :  { %v400_v47 = vsel %vm346_vm3, %v395_v44, 0  ;;  %v5999_v44 = vadd.f32 %v5961_v6, %v5911_v53 }
 0x15b   :  { %v748_v1 = vmul.f32 %v5972_v10, %v6002_v45 }
 0x15d   :  { %5040 = vmatmul.mubr.msk.bf16.vlgmr.msra.gmra.mrb[8].mxu1 %vm346_vm3, %v5863_v21  ;;  %v542_v46 = vpop.permute.xlu0 %541 }
 0x15e   :  { %v547_v48 = vsel %vm346_vm3, %v542_v46, 0  ;;  %5028 = vmatmul.mubr.msk.bf16.vlgmr.msra.gmra.mrb[8].mxu0 %vm346_vm3, %v5865_v24  ;;  %5051 = vmatprep.mubr.msk.bf16.mxu1 %vm5718_vm2, %v7402_v14 }
 0x15f   :  { %v591_v49 = vpop.permute.xlu1 %590  ;;  %5032 = vmatpush3.bf16.xpose.msra.mxu0 %v400_v47  ;;  %5050 = vmatpush3.bf16.xpose.msra.mxu1 %v547_v48  ;;  %v7423_v48 = vmov 0 }
 0x160   :  { %5033 = vmatprep.mubr.msk.bf16.mxu0 %vm5718_vm2, %v7402_v14  ;;  %5043 = vmatprep.subr.bf16.mxu0 %v7402_v14  ;;  %v596_v59 = vsel %vm346_vm3, %v591_v49, 0  ;;  %v7424_v48 = vsel %vm6004_vm10, 4294967295, %v7423_v48  ;;  %v777_v49 = vsel %vm336_vm7, 1, %v5721_v12 }
 0x161   :  { %5061 = vmatprep.subr.bf16.mxu1 %v7402_v14  ;;  %v640_v54 = vpop.permute.xlu0 %639  ;;  %7425 = vst [vmem:[#allocation2_spill] sm:$0xff] %v7424_v48 }
 0x162   :  { %v645_v55 = vsel %vm346_vm3, %v640_v54, 0  ;;  %v330_v54 = vld [vmem:[%s7393_s2 + $0x3] sm:$0x1] }
 0x163   :  { %v689_v56 = vpop.permute.xlu1 %688  ;;  %vm338_vm11 = vcmp.eq.f32.partialorder %v330_v54, 0.0 }
 0x164   :  { %v694_v61 = vsel %vm346_vm3, %v689_v56, 0 }
 0x165   :  { %v986_v62 = vpop.permute.xlu0 %985 }
 0x166   :  { %5034 = vmatmul.mubr.msk.bf16.vlgmr.msra.gmra.mrb[12].mxu0 %vm346_vm3, %v5871_v27  ;;  %5052 = vmatmul.mubr.msk.bf16.vlgmr.msra.gmra.mrb[12].mxu1 %vm346_vm3, %v5875_v34  ;;  %v991_v63 = vsel %vm941_vm4, %v986_v62, 0  ;;  %v745_v62 = vmul.f32 %v5972_v10, %v5999_v44 }
 0x167   :  { %5044 = vmatpush3.bf16.xpose.msra.mxu0 %v498_v57  ;;  %5062 = vmatpush3.bf16.xpose.msra.mxu1 %v645_v55  ;;  %v937_v58 = vpop.permute.xlu1 %936  ;;  %v333_v55 = vld [vmem:[%s7393_s2 + $0x6] sm:$0x1] }
 0x168   :  { %5045 = vmatprep.mubr.msk.bf16.mxu0 %vm5718_vm2, %v7402_v14  ;;  %5063 = vmatprep.mubr.msk.bf16.mxu1 %vm5718_vm2, %v7402_v14  ;;  %v943_v60 = vsel %vm941_vm4, %v937_v58, 0  ;;  %vm341_vm12 = vcmp.eq.f32.partialorder %v333_v55, 0.0 }
 0x169   :  { %5055 = vmatprep.subr.bf16.mxu0 %v7402_v14  ;;  %5073 = vmatprep.subr.bf16.mxu1 %v7402_v14  ;;  %v782_v52 = vsel %vm341_vm12, 1, %v5721_v12 }
 0x16e   :  { %5046 = vmatmul.mubr.msk.bf16.vlgmr.msra.gmra.mrb[16].mxu0 %vm346_vm3, %v5869_v26  ;;  %5064 = vmatmul.mubr.msk.bf16.vlgmr.msra.gmra.mrb[16].mxu1 %vm346_vm3, %v5877_v37 }
 0x16f   :  { %5056 = vmatpush3.bf16.xpose.msra.mxu0 %v596_v59  ;;  %5074 = vmatpush3.bf16.msra.mxu1 %v943_v60  ;;  %v791_v59 = vrot.slane %v777_v49, %v5974_v11  ;;  %v803_v60 = vrot.slane %v780_v50, %v5974_v11  ;;  %v750_v49 = vmul.f32 %v5972_v10, %v6040_v22 }
 0x170   :  { %5057 = vmatprep.mubr.msk.bf16.mxu0 %vm5718_vm2, %v7402_v14  ;;  %5067 = vmatprep.subr.bf16.mxu0 %v7402_v14 }
 0x171   :  { %5075 = vmatprep.mubr.msk.bf16.mxu1 %vm5718_vm2, %v7402_v14  ;;  %5085 = vmatprep.subr.bf16.mxu1 %v7402_v14  ;;  %vm6042_vm13 = vcmp.eq.s32.totalorder %v791_v59, 1  ;;  %vm6046_vm14 = vcmp.eq.s32.totalorder %v803_v60, 1 }
 0x176   :  { %5058 = vmatmul.mubr.msk.bf16.vlgmr.msra.gmra.mrb[20].mxu0 %vm346_vm3, %v5879_v38 }
 0x177   :  { %5068 = vmatpush3.bf16.xpose.msra.mxu0 %v694_v61  ;;  %5069 = vmatprep.mubr.msk.bf16.mxu0 %vm5718_vm2, %v7402_v14 }
 0x178   :  { %5079 = vmatprep.subr.bf16.mxu0 %v7402_v14 }
 0x17e   :  { %5070 = vmatmul.mubr.msk.bf16.vlgmr.msra.gmra.mrb[24].mxu0 %vm346_vm3, %v5882_v39 }
 0x17f   :  { %5080 = vmatpush3.bf16.msra.mxu0 %v991_v63  ;;  %5081 = vmatprep.mubr.msk.bf16.mxu0 %vm5718_vm2, %v7402_v14 }
 0x180   :  { %5091 = vmatprep.subr.bf16.mxu0 %v7402_v14 }
 0x230   :  { %v485_v18 = vpop.f32.mrb[8].mxu1 }
 0x231   :  { %v738_v23 = vmul.f32 0.35355338, %v485_v18  ;;  %v387_v25 = vpop.f32.mrb[8].mxu0  ;;  %v5041_v28 = vpop.f32.mrb[9].mxu1 }
 0x232   :  { %v736_v29 = vmul.f32 0.35355338, %v387_v25  ;;  %v5029_v31 = vpop.f32.mrb[9].mxu0  ;;  %v488_v32 = vpop.f32.mrb[10].mxu1 }
 0x233   :  { %v754_v35 = vadd.f32 %v746_v16, %v738_v23  ;;  %v390_v36 = vpop.f32.mrb[10].mxu0  ;;  %v5042_v40 = vpop.f32.mrb[11].mxu1 }
 0x234   :  { %v752_v41 = vadd.f32 %v744_v30, %v736_v29  ;;  %v5030_v42 = vpop.f32.mrb[11].mxu0  ;;  %v779_v30 = vsel %vm338_vm11, 1, %v5721_v12 }
 0x235   :  { %v4743_v46 = vclamps-f32 %v754_v35, 5.0  ;;  %v799_v40 = vrot.slane %v779_v30, %v5974_v11 }
 0x236   :  { %v4741_v47 = vclamps-f32 %v752_v41, 5.0  ;;  %v811_v41 = vrot.slane %v782_v52, %v5974_v11 }
 0x237   :  { %v6012_v51 = vsel %vm5993_vm9, 1e-28, %v4743_v46  ;;  %v747_v46 = vmul.f32 %v5972_v10, %v6036_v20  ;;  %vm6073_vm5 = vcmp.eq.s32.totalorder %v799_v40, 1 }
 0x238   :  { %7426 = vst [vmem:[#allocation3_spill] sm:$0xff] %v6012_v51  ;;  %v838_v53 = vsel %vm346_vm3, %v6012_v51, -inf  ;;  %v6024_v58 = vsel %vm6004_vm10, 1e-28, %v4741_v47  ;;  %vm6077_vm6 = vcmp.eq.s32.totalorder %v811_v41, 1 }
 0x239   :  { %839 = vmax.xlane.f32.xlu0 %v838_v53  ;;  %v436_v56 = vpop.f32.mrb[12].mxu0  ;;  %v583_v57 = vpop.f32.mrb[12].mxu1  ;;  %7427 = vst [vmem:[#allocation4_spill] sm:$0xff] %v6024_v58  ;;  %v832_v19 = vsel %vm346_vm3, %v6024_v58, -inf }
 0x23a   :  { %v737_v61 = vmul.f32 0.35355338, %v436_v56  ;;  %v740_v63 = vmul.f32 0.35355338, %v583_v57  ;;  %v5035_v4 = vpop.f32.mrb[13].mxu0  ;;  %v5053_v5 = vpop.f32.mrb[13].mxu1 }
 0x23b   :  { %v439_v7 = vpop.f32.mrb[14].mxu0  ;;  %v586_v8 = vpop.f32.mrb[14].mxu1 }
 0x23c   :  { %v753_v13 = vadd.f32 %v745_v62, %v737_v61  ;;  %v756_v16 = vadd.f32 %v748_v1, %v740_v63  ;;  %v5036_v17 = vpop.f32.mrb[15].mxu0  ;;  %v5054_v18 = vpop.f32.mrb[15].mxu1  ;;  %v6083_v1 = vadd.f32 %v5961_v6, %v5953_v3  ;;  %v781_v7 = vsel %vm340_vm15, 1, %v5721_v12 }
 0x23d   :  { %833 = vmax.xlane.f32.xlu0 %v832_v19  ;;  %v807_v19 = vrot.slane %v781_v7, %v5974_v11 }
 0x23e   :  { %v4742_v28 = vclamps-f32 %v753_v13, 5.0  ;;  %v4745_v29 = vclamps-f32 %v756_v16, 5.0  ;;  %v334_v16 = vld [vmem:[%s7393_s2 + $0x7] sm:$0x1]  ;;  %s5722_s2 = smov 88  }
 0x23f   :  { %vm342_vm7 = vcmp.eq.f32.partialorder %v334_v16, 0.0  ;;  %vm6104_vm8 = vcmp.eq.s32.totalorder %v807_v19, 1 }
 0x240   :  { %v6054_v31 = vsel %vm6042_vm13, 1e-28, %v4742_v28  ;;  %v6063_v36 = vsel %vm6046_vm14, 1e-28, %v4745_v29  ;;  %v749_v29 = vmul.f32 %v5972_v10, %v6083_v1  ;;  %v783_v41 = vsel %vm342_vm7, 1, %v5721_v12  ;;  %v7482_v63 = vld [vmem:[#allocation4_spill] sm:$0xff] }
 0x241   :  { %7432 = vst [vmem:[#allocation5_spill] sm:$0xff] %v6054_v31  ;;  %v534_v32 = vpop.f32.mrb[16].mxu0  ;;  %v681_v33 = vpop.f32.mrb[16].mxu1  ;;  %v835_v35 = vsel %vm346_vm3, %v6054_v31, -inf  ;;  %7433 = vst [vmem:[#allocation6_spill] sm:$0xff] %v6063_v36  ;;  %v844_v61 = vsel %vm346_vm3, %v6063_v36, -inf }
 0x242   :  { %v739_v42 = vmul.f32 0.35355338, %v534_v32  ;;  %v742_v47 = vmul.f32 0.35355338, %v681_v33  ;;  %836 = vmax.xlane.f32.xlu1 %v835_v35  ;;  %v5047_v50 = vpop.f32.mrb[17].mxu0  ;;  %v5065_v53 = vpop.f32.mrb[17].mxu1  ;;  %v6110_v35 = vadd.f32 %v5951_v2, %v5961_v6 }
 0x243   :  { %v537_v54 = vpop.f32.mrb[18].mxu0  ;;  %v684_v55 = vpop.f32.mrb[18].mxu1 }
 0x244   :  { %v755_v56 = vadd.f32 %v747_v46, %v739_v42  ;;  %v758_v57 = vadd.f32 %v750_v49, %v742_v47  ;;  %v5048_v59 = vpop.f32.mrb[19].mxu0  ;;  %v5066_v60 = vpop.f32.mrb[19].mxu1  ;;  %v815_v49 = vrot.slane %v783_v41, %v5974_v11  ;;  %v751_v53 = vmul.f32 %v5972_v10, %v6110_v35 }
 0x246   :  { %v4744_v4 = vclamps-f32 %v755_v56, 5.0  ;;  %v4747_v5 = vclamps-f32 %v758_v57, 5.0  ;;  %845 = vmax.xlane.f32.xlu1 %v844_v61  ;;  %vm6122_vm11 = vcmp.eq.s32.totalorder %v815_v49, 1 }
 0x248   :  { %v6088_v8 = vsel %vm6073_vm5, 1e-28, %v4744_v4  ;;  %v6092_v13 = vsel %vm6077_vm6, 1e-28, %v4747_v5  ;;  %v6137_v5 = vpop.permute.xlu1 %1033 }
 0x249   :  { %7438 = vst [vmem:[#allocation7_spill] sm:$0xff] %v6088_v8  ;;  %7439 = vst [vmem:[#allocation8_spill] sm:$0xff] %v6092_v13  ;;  %v632_v17 = vpop.f32.mrb[20].mxu0  ;;  %v841_v3 = vsel %vm346_vm3, %v6088_v8, -inf  ;;  %v850_v18 = vsel %vm346_vm3, %v6092_v13, -inf }
 0x24a   :  { %v741_v28 = vmul.f32 0.35355338, %v632_v17  ;;  %842 = vmax.xlane.f32.xlu0 %v841_v3  ;;  %v5059_v30 = vpop.f32.mrb[21].mxu0  ;;  %851 = vmax.xlane.f32.xlu1 %v850_v18 }
 0x24b   :  { %v635_v52 = vpop.f32.mrb[22].mxu0 }
 0x24c   :  { %v757_v0 = vadd.f32 %v749_v29, %v741_v28  ;;  %v5060_v32 = vpop.f32.mrb[23].mxu0 }
 0x24e   :  { %v4746_v40 = vclamps-f32 %v757_v0, 5.0 }
 0x250   :  { %v6115_v42 = vsel %vm6104_vm8, 1e-28, %v4746_v40 }
 0x251   :  { %7442 = vst [vmem:[#allocation9_spill] sm:$0xff] %v6115_v42  ;;  %v730_v46 = vpop.f32.mrb[24].mxu0  ;;  %v847_v47 = vsel %vm346_vm3, %v6115_v42, -inf }
 0x252   :  { %v743_v50 = vmul.f32 0.35355338, %v730_v46  ;;  %848 = vmax.xlane.f32.xlu0 %v847_v47  ;;  %v5071_v2 = vpop.f32.mrb[25].mxu0 }
 0x253   :  { %v733_v6 = vpop.f32.mrb[26].mxu0 }
 0x254   :  { %v759_v54 = vadd.f32 %v751_v53, %v743_v50  ;;  %v5072_v55 = vpop.f32.mrb[27].mxu0 }
 0x256   :  { %v4748_v56 = vclamps-f32 %v759_v54, 5.0 }
 0x258   :  { %v6128_v57 = vsel %vm6122_vm11, 1e-28, %v4748_v56 }
 0x259   :  { %7445 = vst [vmem:[#allocation10_spill] sm:$0xff] %v6128_v57  ;;  %v853_v11 = vsel %vm346_vm3, %v6128_v57, -inf }
 0x25a   :  { %854 = vmax.xlane.f32.xlu0 %v853_v11 }
 0x25b   :  { %1081 = vrot.lane.b32.xlu1 %v5869_v26, %s5720_s5 }
 0x270   :  { %1129 = vrot.lane.b32.xlu0 %v5875_v34, %s5720_s5 }
 0x2c6   :  { %v840_v59 = vpop.xlane.xlu0 %839 }
 0x2c7   :  { %v858_v60 = vsub.f32 %v6012_v51, %v840_v59 }
 0x2c9   :  { %v868_v61 = vmul.f32 1.442695, %v858_v60 }
 0x2ca   :  { %v834_v4 = vpop.xlane.xlu0 %833 }
 0x2cb   :  { %5588 = vpow2.f32 %v868_v61  ;;  %v856_v7 = vsub.f32 %v6024_v58, %v834_v4 }
 0x2cd   :  { %v864_v16 = vmul.f32 1.442695, %v856_v7 }
 0x2cf   :  { %5590 = vpow2.f32 %v864_v16  ;;  %v837_v17 = vpop.xlane.xlu1 %836 }
 0x2d0   :  { %v857_v3 = vsub.f32 %v6054_v31, %v837_v17 }
 0x2d2   :  { %v866_v18 = vmul.f32 1.442695, %v857_v3 }
 0x2d3   :  { %v846_v54 = vpop.xlane.xlu1 %845 }
 0x2d4   :  { %5592 = vpow2.f32 %v866_v18  ;;  %v860_v55 = vsub.f32 %v6063_v36, %v846_v54 }
 0x2d5   :  { %v6141_v19 = vpop.eup %5588 }
 0x2d6   :  { %v886_v28 = vsel %vm346_vm3, %v6141_v19, 0.0  ;;  %v872_v11 = vmul.f32 1.442695, %v860_v55 }
 0x2d7   :  { %887 = vadd.xlane.f32.xlu1 %v886_v28  ;;  %v843_v29 = vpop.xlane.xlu0 %842  ;;  %v852_v56 = vpop.xlane.xlu1 %851 }
 0x2d8   :  { %v859_v30 = vsub.f32 %v6088_v8, %v843_v29  ;;  %v862_v59 = vsub.f32 %v6092_v13, %v852_v56 }
 0x2d9   :  { %v6146_v52 = vpop.eup %5590 }
 0x2da   :  { %v870_v0 = vmul.f32 1.442695, %v859_v30  ;;  %v880_v32 = vsel %vm346_vm3, %v6146_v52, 0.0  ;;  %v876_v60 = vmul.f32 1.442695, %v862_v59 }
 0x2db   :  { %881 = vadd.xlane.f32.xlu1 %v880_v32  ;;  %v1082_v30 = vpop.permute.xlu1 %1081 }
 0x2dc   :  { %5594 = vpow2.f32 %v870_v0 }
 0x2de   :  { %v6150_v40 = vpop.eup %5592 }
 0x2df   :  { %v849_v41 = vpop.xlane.xlu0 %848  ;;  %v883_v46 = vsel %vm346_vm3, %v6150_v40, 0.0 }
 0x2e0   :  { %v861_v47 = vsub.f32 %v6115_v42, %v849_v41  ;;  %884 = vadd.xlane.f32.xlu0 %v883_v46 }
 0x2e2   :  { %v874_v49 = vmul.f32 1.442695, %v861_v47 }
 0x2e4   :  { %5596 = vpow2.f32 %v874_v49 }
 0x2e5   :  { %5598 = vpow2.f32 %v872_v11  ;;  %v1039_v11 = vsel %vm941_vm4, %v6137_v5, 0  ;;  %v1087_v5 = vsel %vm941_vm4, %v1082_v30, 0 }
 0x2e6   :  { %v6155_v50 = vpop.eup %5594  ;;  %5600 = vpow2.f32 %v876_v60 }
 0x2e7   :  { %v889_v53 = vsel %vm346_vm3, %v6155_v50, 0.0  ;;  %v855_v4 = vpop.xlane.xlu0 %854 }
 0x2e8   :  { %890 = vadd.xlane.f32.xlu0 %v889_v53  ;;  %v863_v7 = vsub.f32 %v6128_v57, %v855_v4 }
 0x2ea   :  { %v878_v3 = vmul.f32 1.442695, %v863_v7 }
 0x2eb   :  { %v1130_v41 = vpop.permute.xlu0 %1129 }
 0x2ec   :  { %1177 = vrot.lane.b32.xlu1 %v5879_v38, %s5720_s5  ;;  %5602 = vpow2.f32 %v878_v3 }
 0x2ee   :  { %v6161_v2 = vpop.eup %5596 }
 0x2ef   :  { %v895_v6 = vsel %vm346_vm3, %v6161_v2, 0.0  ;;  %v6169_v61 = vpop.eup %5598 }
 0x2f0   :  { %896 = vadd.xlane.f32.xlu0 %v895_v6  ;;  %v892_v16 = vsel %vm346_vm3, %v6169_v61, 0.0  ;;  %v6174_v17 = vpop.eup %5600 }
 0x2f1   :  { %v898_v18 = vsel %vm346_vm3, %v6174_v17, 0.0 }
 0x2f6   :  { %v6178_v28 = vpop.eup %5602 }
 0x2f7   :  { %v901_v29 = vsel %vm346_vm3, %v6178_v28, 0.0 }
 0x306   :  { %1225 = vrot.lane.b32.xlu0 %v5877_v37, %s5720_s5 }
 0x310   :  { %893 = vadd.xlane.f32.xlu1 %v892_v16  ;;  %v1135_v16 = vsel %vm941_vm4, %v1130_v41, 0 }
 0x314   :  { %899 = vadd.xlane.f32.xlu1 %v898_v18 }
 0x325   :  { %1273 = vrot.lane.b32.xlu1 %v5882_v39, %s5720_s5  ;;  %902 = vadd.xlane.f32.xlu0 %v901_v29  ;;  %s5725_s5 = smov 56  }
 0x329   :  { %1373 = vrot.lane.b32.xlu1 %v5871_v27, %s5722_s2 }
 0x32d   :  { %1371 = vrot.lane.b32.xlu1 %v5871_v27, %s5723_s17 }
 0x331   :  { %1473 = vrot.lane.b32.xlu1 %v5869_v26, %s5722_s2 }
 0x335   :  { %1471 = vrot.lane.b32.xlu1 %v5869_v26, %s5723_s17 }
 0x339   :  { %1573 = vrot.lane.b32.xlu1 %v5879_v38, %s5722_s2 }
 0x33b   :  { %1323 = vrot.lane.b32.xlu0 %v5865_v24, %s5722_s2 }
 0x33d   :  { %1571 = vrot.lane.b32.xlu1 %v5879_v38, %s5723_s17 }
 0x33f   :  { %1321 = vrot.lane.b32.xlu0 %v5865_v24, %s5723_s17 }
 0x341   :  { %1673 = vrot.lane.b32.xlu1 %v5882_v39, %s5722_s2 }
 0x343   :  { %1423 = vrot.lane.b32.xlu0 %v5863_v21, %s5722_s2 }
 0x345   :  { %1671 = vrot.lane.b32.xlu1 %v5882_v39, %s5723_s17 }
 0x347   :  { %1421 = vrot.lane.b32.xlu0 %v5863_v21, %s5723_s17 }
 0x34b   :  { %1523 = vrot.lane.b32.xlu0 %v5875_v34, %s5722_s2 }
 0x34f   :  { %1521 = vrot.lane.b32.xlu0 %v5875_v34, %s5723_s17 }
 0x353   :  { %1623 = vrot.lane.b32.xlu0 %v5877_v37, %s5722_s2 }
 0x357   :  { %1621 = vrot.lane.b32.xlu0 %v5877_v37, %s5723_s17 }
 0x35b   :  { %1730 = vrot.lane.b32.xlu0 %v5972_v10, %s5724_s1 }
 0x364   :  { %v888_v0 = vpop.xlane.xlu1 %887 }
 0x368   :  { %v882_v32 = vpop.xlane.xlu1 %881 }
 0x369   :  { %5604 = vrcp.f32 %v882_v32 }
 0x36a   :  { %5606 = vrcp.f32 %v888_v0 }
 0x36c   :  { %v1178_v18 = vpop.permute.xlu1 %1177 }
 0x36d   :  { %v885_v46 = vpop.xlane.xlu0 %884  ;;  %v1183_v0 = vsel %vm941_vm4, %v1178_v18, 0 }
 0x36e   :  { %5608 = vrcp.f32 %v885_v46 }
 0x373   :  { %v5605_v47 = vpop.eup %5604 }
 0x374   :  { %v912_v49 = vmul.f32 %v5605_v47, %v6146_v52  ;;  %v5607_v53 = vpop.eup %5606 }
 0x375   :  { %v891_v6 = vpop.xlane.xlu0 %890  ;;  %v914_v10 = vmul.f32 %v5607_v53, %v6141_v19 }
 0x376   :  { %v920_v54 = vsel %vm6004_vm10, 0.0, %v912_v49  ;;  %5610 = vrcp.f32 %v891_v6 }
 0x377   :  { %v928_v55 = vpack.c.bf16 %v920_v54, %v920_v54  ;;  %v922_v19 = vsel %vm5993_vm9, 0.0, %v914_v10 }
 0x378   :  { %v5609_v56 = vpop.eup %5608 }
 0x379   :  { %v913_v59 = vmul.f32 %v5609_v56, %v6150_v40  ;;  %5076 = vmatmul.mubr.msk.bf16.vlgmr.msra.gmra.mrb[20].mxu1 %vm346_vm3, %v928_v55  ;;  %v930_v40 = vpack.c.bf16 %v922_v19, %v922_v19 }
 0x37a   :  { %5086 = vmatpush3.bf16.msra.mxu1 %v1039_v11  ;;  %5087 = vmatprep.mubr.msk.bf16.mxu1 %vm5718_vm2, %v7402_v14 }
 0x37b   :  { %v921_v52 = vsel %vm6042_vm13, 0.0, %v913_v59  ;;  %5097 = vmatprep.subr.bf16.mxu1 %v7402_v14 }
 0x37c   :  { %v929_v60 = vpack.c.bf16 %v921_v52, %v921_v52 }
 0x37d   :  { %v897_v4 = vpop.xlane.xlu0 %896 }
 0x37e   :  { %5612 = vrcp.f32 %v897_v4  ;;  %5082 = vmatmul.mubr.msk.bf16.vlgmr.msra.gmra.mrb[28].mxu0 %vm346_vm3, %v929_v60 }
 0x37f   :  { %5092 = vmatpush3.bf16.msra.mxu0 %v1087_v5  ;;  %5093 = vmatprep.mubr.msk.bf16.mxu0 %vm5718_vm2, %v7402_v14 }
 0x380   :  { %5103 = vmatprep.subr.bf16.mxu0 %v7402_v14  ;;  %v5611_v7 = vpop.eup %5610 }
 0x381   :  { %5088 = vmatmul.mubr.msk.bf16.vlgmr.msra.gmra.mrb[24].mxu1 %vm346_vm3, %v930_v40  ;;  %v915_v3 = vmul.f32 %v5611_v7, %v6155_v50  ;;  %v1226_v55 = vpop.permute.xlu0 %1225 }
 0x382   :  { %5098 = vmatpush3.bf16.msra.mxu1 %v1135_v16  ;;  %5099 = vmatprep.mubr.msk.bf16.mxu1 %vm5718_vm2, %v7402_v14  ;;  %v1231_v52 = vsel %vm941_vm4, %v1226_v55, 0 }
 0x383   :  { %5109 = vmatprep.subr.bf16.mxu1 %v7402_v14  ;;  %v923_v29 = vsel %vm6073_vm5, 0.0, %v915_v3 }
 0x384   :  { %v931_v30 = vpack.c.bf16 %v923_v29, %v923_v29 }
 0x386   :  { %5094 = vmatmul.mubr.msk.bf16.vlgmr.msra.gmra.mrb[32].mxu0 %vm346_vm3, %v931_v30 }
 0x387   :  { %5104 = vmatpush3.bf16.msra.mxu0 %v1183_v0  ;;  %5105 = vmatprep.mubr.msk.bf16.mxu0 %vm5718_vm2, %v7402_v14 }
 0x388   :  { %v5613_v32 = vpop.eup %5612  ;;  %5115 = vmatprep.subr.bf16.mxu0 %v7402_v14 }
 0x389   :  { %v917_v50 = vmul.f32 %v5613_v32, %v6161_v2 }
 0x38b   :  { %v925_v41 = vsel %vm6104_vm8, 0.0, %v917_v50 }
 0x38c   :  { %v933_v46 = vpack.c.bf16 %v925_v41, %v925_v41 }
 0x38e   :  { %5106 = vmatmul.mubr.msk.bf16.vlgmr.msra.gmra.mrb[36].mxu0 %vm346_vm3, %v933_v46 }
 0x38f   :  { %5117 = vmatprep.mubr.msk.bf16.mxu0 %vm5718_vm2, %v7402_v14 }
 0x39d   :  { %v894_v47 = vpop.xlane.xlu1 %893 }
 0x39e   :  { %5614 = vrcp.f32 %v894_v47 }
 0x3a1   :  { %v900_v49 = vpop.xlane.xlu1 %899 }
 0x3a2   :  { %5616 = vrcp.f32 %v900_v49 }
 0x3a5   :  { %v1274_v53 = vpop.permute.xlu1 %1273 }
 0x3a6   :  { %v1279_v6 = vsel %vm941_vm4, %v1274_v53, 0 }
 0x3a7   :  { %5116 = vmatpush3.bf16.msra.mxu0 %v1279_v6 }
 0x3a8   :  { %v5615_v2 = vpop.eup %5614  ;;  %5127 = vmatprep.subr.bf16.mxu0 %v7402_v14 }
 0x3a9   :  { %v916_v54 = vmul.f32 %v5615_v2, %v6169_v61  ;;  %v1374_v19 = vpop.permute.xlu1 %1373 }
 0x3aa   :  { %v1379_v41 = vsel %vm346_vm3, %v1374_v19, 0 }
 0x3ab   :  { %v924_v56 = vsel %vm6046_vm14, 0.0, %v916_v54 }
 0x3ac   :  { %v5617_v10 = vpop.eup %5616  ;;  %v932_v11 = vpack.c.bf16 %v924_v56, %v924_v56 }
 0x3ad   :  { %v918_v59 = vmul.f32 %v5617_v10, %v6174_v17  ;;  %v1372_v40 = vpop.permute.xlu1 %1371 }
 0x3ae   :  { %5100 = vmatmul.mubr.msk.bf16.vlgmr.msra.gmra.mrb[28].mxu1 %vm346_vm3, %v932_v11 }
 0x3af   :  { %5110 = vmatpush3.bf16.msra.mxu1 %v1231_v52  ;;  %5111 = vmatprep.mubr.msk.bf16.mxu1 %vm5718_vm2, %v7402_v14  ;;  %v926_v61 = vsel %vm6077_vm6, 0.0, %v918_v59 }
 0x3b0   :  { %5121 = vmatprep.subr.bf16.mxu1 %v7402_v14  ;;  %v934_v4 = vpack.c.bf16 %v926_v61, %v926_v61 }
 0x3b1   :  { %v1474_v30 = vpop.permute.xlu1 %1473 }
 0x3b2   :  { %v903_v60 = vpop.xlane.xlu0 %902  ;;  %v1479_v53 = vsel %vm346_vm3, %v1474_v30, 0 }
 0x3b3   :  { %5618 = vrcp.f32 %v903_v60 }
 0x3b6   :  { %5112 = vmatmul.mubr.msk.bf16.vlgmr.msra.gmra.mrb[32].mxu1 %vm346_vm3, %v934_v4  ;;  %v1324_v17 = vpop.permute.xlu0 %1323 }
 0x3b7   :  { %v1329_v5 = vsel %vm346_vm3, %v1324_v17, 0  ;;  %5123 = vmatprep.mubr.msk.bf16.mxu1 %vm5718_vm2, %v7402_v14 }
 0x3b8   :  { %5122 = vmatpush3.bf16.xpose.msra.mxu1 %v1329_v5 }
 0x3b9   :  { %5133 = vmatprep.subr.bf16.mxu1 %v7402_v14 }
 0x3ba   :  { %v1322_v7 = vpop.permute.xlu0 %1321 }
 0x3bd   :  { %v5619_v16 = vpop.eup %5618 }
 0x3be   :  { %v919_v3 = vmul.f32 %v5619_v16, %v6178_v28  ;;  %v1424_v18 = vpop.permute.xlu0 %1423  ;;  %v1472_v28 = vpop.permute.xlu1 %1471 }
 0x3bf   :  { %v1429_v29 = vsel %vm346_vm3, %v1424_v18, 0  ;;  %5124 = vmatmul.mubr.msk.bf16.vlgmr.msra.gmra.mrb[36].mxu1 %vm346_vm3, %v1322_v7 }
 0x3c0   :  { %5134 = vmatpush3.bf16.xpose.msra.mxu1 %v1429_v29  ;;  %v927_v0 = vsel %vm6122_vm11, 0.0, %v919_v3  ;;  %5135 = vmatprep.mubr.msk.bf16.mxu1 %vm5718_vm2, %v7402_v14 }
 0x3c1   :  { %v935_v32 = vpack.c.bf16 %v927_v0, %v927_v0  ;;  %5145 = vmatprep.subr.bf16.mxu1 %v7402_v14 }
 0x3c2   :  { %v1422_v50 = vpop.permute.xlu0 %1421  ;;  %v1574_v6 = vpop.permute.xlu1 %1573 }
 0x3c3   :  { %5118 = vmatmul.mubr.msk.bf16.vlgmr.msra.gmra.mrb[40].mxu0 %vm346_vm3, %v935_v32  ;;  %v1579_v10 = vsel %vm346_vm3, %v1574_v6, 0 }
 0x3c4   :  { %5128 = vmatpush3.bf16.xpose.msra.mxu0 %v1379_v41  ;;  %5129 = vmatprep.mubr.msk.bf16.mxu0 %vm5718_vm2, %v7402_v14 }
 0x3c5   :  { %5139 = vmatprep.subr.bf16.mxu0 %v7402_v14 }
 0x3c6   :  { %v1524_v46 = vpop.permute.xlu0 %1523  ;;  %v1572_v55 = vpop.permute.xlu1 %1571 }
 0x3c7   :  { %v1529_v47 = vsel %vm346_vm3, %v1524_v46, 0  ;;  %5136 = vmatmul.mubr.msk.bf16.vlgmr.msra.gmra.mrb[40].mxu1 %vm346_vm3, %v1422_v50 }
 0x3c8   :  { %5146 = vmatpush3.bf16.xpose.msra.mxu1 %v1529_v47  ;;  %5147 = vmatprep.mubr.msk.bf16.mxu1 %vm5718_vm2, %v7402_v14 }
 0x3c9   :  { %5157 = vmatprep.subr.bf16.mxu1 %v7402_v14 }
 0x3ca   :  { %v1522_v49 = vpop.permute.xlu0 %1521  ;;  %v1674_v61 = vpop.permute.xlu1 %1673 }
 0x3cb   :  { %5130 = vmatmul.mubr.msk.bf16.vlgmr.msra.gmra.mrb[44].mxu0 %vm346_vm3, %v1372_v40  ;;  %v1679_v60 = vsel %vm346_vm3, %v1674_v61, 0 }
 0x3cc   :  { %5140 = vmatpush3.bf16.xpose.msra.mxu0 %v1479_v53  ;;  %5141 = vmatprep.mubr.msk.bf16.mxu0 %vm5718_vm2, %v7402_v14 }
 0x3cd   :  { %5151 = vmatprep.subr.bf16.mxu0 %v7402_v14 }
 0x3ce   :  { %v1624_v2 = vpop.permute.xlu0 %1623  ;;  %v1672_v40 = vpop.permute.xlu1 %1671 }
 0x3cf   :  { %v1629_v54 = vsel %vm346_vm3, %v1624_v2, 0  ;;  %5148 = vmatmul.mubr.msk.bf16.vlgmr.msra.gmra.mrb[44].mxu1 %vm346_vm3, %v1522_v49 }
 0x3d0   :  { %5158 = vmatpush3.bf16.xpose.msra.mxu1 %v1629_v54  ;;  %5159 = vmatprep.mubr.msk.bf16.mxu1 %vm5718_vm2, %v7402_v14 }
 0x3d1   :  { %5169 = vmatprep.subr.bf16.mxu1 %v7402_v14 }
 0x3d2   :  { %v1622_v56 = vpop.permute.xlu0 %1621 }
 0x3d3   :  { %5142 = vmatmul.mubr.msk.bf16.vlgmr.msra.gmra.mrb[48].mxu0 %vm346_vm3, %v1472_v28 }
 0x3d4   :  { %5152 = vmatpush3.bf16.xpose.msra.mxu0 %v1579_v10  ;;  %5153 = vmatprep.mubr.msk.bf16.mxu0 %vm5718_vm2, %v7402_v14 }
 0x3d5   :  { %5163 = vmatprep.subr.bf16.mxu0 %v7402_v14 }
 0x3d6   :  { %v1731_v11 = vpop.permute.xlu0 %1730 }
 0x3d7   :  { %5160 = vmatmul.mubr.msk.bf16.vlgmr.msra.gmra.mrb[48].mxu1 %vm346_vm3, %v1622_v56  ;;  %v1734_v59 = vmul.f32 %v1731_v11, %v5999_v44  ;;  %v1733_v52 = vmul.f32 %v1731_v11, %v5978_v15  ;;  %v1736_v19 = vmul.f32 %v1731_v11, %v6036_v20  ;;  %v1735_v4 = vmul.f32 %v1731_v11, %v5967_v9 }
 0x3d8   :  { %5171 = vmatprep.mubr.msk.bf16.mxu1 %vm5718_vm2, %v7402_v14  ;;  %v1738_v17 = vmul.f32 %v1731_v11, %v6083_v1  ;;  %v1737_v5 = vmul.f32 %v1731_v11, %v6002_v45  ;;  %v1740_v7 = vmul.f32 %v1731_v11, %v6110_v35  ;;  %v1739_v16 = vmul.f32 %v1731_v11, %v6040_v22 }
 0x3d9   :  { %1751 = vrot.lane.b32.xlu0 %v1734_v59, %s5723_s17  ;;  %1749 = vrot.lane.b32.xlu1 %v1733_v52, %s5723_s17 }
 0x3db   :  { %5154 = vmatmul.mubr.msk.bf16.vlgmr.msra.gmra.mrb[52].mxu0 %vm346_vm3, %v1572_v55 }
 0x3dc   :  { %5164 = vmatpush3.bf16.xpose.msra.mxu0 %v1679_v60  ;;  %5165 = vmatprep.mubr.msk.bf16.mxu0 %vm5718_vm2, %v7402_v14 }
 0x3dd   :  { %1755 = vrot.lane.b32.xlu0 %v1736_v19, %s5723_s17  ;;  %1753 = vrot.lane.b32.xlu1 %v1735_v4, %s5723_s17 }
 0x3de   :  { %5175 = vmatprep.subr.bf16.mxu0 %v7402_v14 }
 0x3e1   :  { %1759 = vrot.lane.b32.xlu0 %v1738_v17, %s5723_s17  ;;  %1757 = vrot.lane.b32.xlu1 %v1737_v5, %s5723_s17 }
 0x3e3   :  { %5166 = vmatmul.mubr.msk.bf16.vlgmr.msra.gmra.mrb[56].mxu0 %vm346_vm3, %v1672_v40 }
 0x3e4   :  { %5177 = vmatprep.mubr.msk.bf16.mxu0 %vm5718_vm2, %v7402_v14 }
 0x3e5   :  { %1763 = vrot.lane.b32.xlu0 %v1740_v7, %s5723_s17  ;;  %1761 = vrot.lane.b32.xlu1 %v1739_v16, %s5723_s17 }
 0x3e9   :  { %1909 = vrot.lane.b32.xlu0 %v5865_v24, %s5725_s5  ;;  %1957 = vrot.lane.b32.xlu1 %v5871_v27, %s5725_s5 }
 0x3ed   :  { %2053 = vrot.lane.b32.xlu0 %v5869_v26, %s5725_s5  ;;  %2005 = vrot.lane.b32.xlu1 %v5863_v21, %s5725_s5 }
 0x3f1   :  { %2101 = vrot.lane.b32.xlu1 %v5875_v34, %s5725_s5 }
 0x44b   :  { %v6337_v3 = vpop.permute.xlu0 %1751  ;;  %v1750_v18 = vpop.permute.xlu1 %1749 }
 0x44c   :  { %v6339_v29 = vpop.f32.mrb[20].mxu1 }
 0x44d   :  { %7446 = vst [vmem:[#allocation11_spill] sm:$0xff] %v6339_v29  ;;  %v5077_v30 = vpop.f32.mrb[21].mxu1 }
 0x44e   :  { %v982_v0 = vpop.f32.mrb[22].mxu1 }
 0x44f   :  { %v5078_v32 = vpop.f32.mrb[23].mxu1  ;;  %v6341_v50 = vpop.permute.xlu0 %1755 }
 0x450   :  { %v1754_v41 = vpop.permute.xlu1 %1753 }
 0x451   :  { %v6343_v28 = vpop.f32.mrb[28].mxu0 }
 0x452   :  { %7447 = vst [vmem:[#allocation12_spill] sm:$0xff] %v6343_v28  ;;  %v5083_v46 = vpop.f32.mrb[29].mxu0 }
 0x453   :  { %v1030_v47 = vpop.f32.mrb[30].mxu0  ;;  %v6345_v49 = vpop.permute.xlu0 %1759 }
 0x454   :  { %v6347_v53 = vpop.permute.xlu1 %1757  ;;  %v5084_v6 = vpop.f32.mrb[31].mxu0 }
 0x455   :  { %v6349_v2 = vpop.f32.mrb[24].mxu1 }
 0x456   :  { %7448 = vst [vmem:[#allocation13_spill] sm:$0xff] %v6349_v2  ;;  %v5089_v54 = vpop.f32.mrb[25].mxu1 }
 0x457   :  { %v1078_v55 = vpop.f32.mrb[26].mxu1  ;;  %v6351_v56 = vpop.permute.xlu0 %1763 }
 0x458   :  { %v5090_v10 = vpop.f32.mrb[27].mxu1  ;;  %v6353_v11 = vpop.permute.xlu1 %1761 }
 0x459   :  { %v6355_v59 = vpop.f32.mrb[32].mxu0 }
 0x45a   :  { %7449 = vst [vmem:[#allocation14_spill] sm:$0xff] %v6355_v59  ;;  %v5095_v52 = vpop.f32.mrb[33].mxu0 }
 0x45b   :  { %v1910_v61 = vpop.permute.xlu0 %1909  ;;  %v1126_v60 = vpop.f32.mrb[34].mxu0 }
 0x45c   :  { %v1915_v19 = vsel %vm941_vm4, %v1910_v61, 0  ;;  %v1958_v4 = vpop.permute.xlu1 %1957  ;;  %v5096_v5 = vpop.f32.mrb[35].mxu0 }
 0x45d   :  { %v1963_v17 = vsel %vm941_vm4, %v1958_v4, 0  ;;  %5170 = vmatpush3.bf16.msra.mxu1 %v1915_v19 }
 0x45e   :  { %5176 = vmatpush3.bf16.msra.mxu0 %v1963_v17  ;;  %5181 = vmatprep.subr.bf16.mxu1 %v7402_v14 }
 0x45f   :  { %5187 = vmatprep.subr.bf16.mxu0 %v7402_v14 }
 0x461   :  { %v6361_v40 = vpop.f32.mrb[36].mxu0 }
 0x462   :  { %7450 = vst [vmem:[#allocation15_spill] sm:$0xff] %v6361_v40  ;;  %v5107_v7 = vpop.f32.mrb[37].mxu0 }
 0x463   :  { %v1222_v16 = vpop.f32.mrb[38].mxu0 }
 0x464   :  { %v5108_v30 = vpop.f32.mrb[39].mxu0 }
 0x481   :  { %v6363_v0 = vpop.f32.mrb[28].mxu1 }
 0x482   :  { %7451 = vst [vmem:[#allocation16_spill] sm:$0xff] %v6363_v0  ;;  %v5101_v32 = vpop.f32.mrb[29].mxu1  ;;  %v7456_v0 = vmov 0.0  }
 0x483   :  { %v1174_v46 = vpop.f32.mrb[30].mxu1 }
 0x484   :  { %v5102_v47 = vpop.f32.mrb[31].mxu1 }
 0x489   :  { %v6365_v6 = vpop.f32.mrb[32].mxu1 }
 0x48a   :  { %7452 = vst [vmem:[#allocation17_spill] sm:$0xff] %v6365_v6  ;;  %v5113_v54 = vpop.f32.mrb[33].mxu1 }
 0x48b   :  { %v1270_v55 = vpop.f32.mrb[34].mxu1 }
 0x48c   :  { %v5114_v10 = vpop.f32.mrb[35].mxu1 }
 0x492   :  { %v1365_v52 = vpop.f32.mrb[36].mxu1 }
 0x493   :  { %v1721_v61 = vmul.f32 0.35355338, %v1365_v52  ;;  %v5125_v60 = vpop.f32.mrb[37].mxu1 }
 0x494   :  { %v1368_v19 = vpop.f32.mrb[38].mxu1 }
 0x495   :  { %v1773_v4 = vadd.f32 %v1750_v18, %v1721_v61  ;;  %v5126_v17 = vpop.f32.mrb[39].mxu1 }
 0x496   :  { %v6367_v5 = vpop.f32.mrb[40].mxu0 }
 0x497   :  { %7453 = vst [vmem:[#allocation18_spill] sm:$0xff] %v6367_v5  ;;  %v4765_v7 = vclamps-f32 %v1773_v4, 5.0  ;;  %v5119_v16 = vpop.f32.mrb[41].mxu0 }
 0x498   :  { %v1318_v30 = vpop.f32.mrb[42].mxu0 }
 0x499   :  { %v5120_v14 = vpop.f32.mrb[43].mxu0  ;;  %v6371_v32 = vsel %vm6004_vm10, 1e-28, %v4765_v7 }
 0x49a   :  { %v1465_v46 = vpop.f32.mrb[40].mxu1  ;;  %v1805_v47 = vsel %vm346_vm3, %v6371_v32, -inf }
 0x49b   :  { %v1723_v54 = vmul.f32 0.35355338, %v1465_v46  ;;  %v5137_v55 = vpop.f32.mrb[41].mxu1  ;;  %1806 = vmax.xlane.f32.xlu1 %v1805_v47 }
 0x49c   :  { %v1468_v10 = vpop.f32.mrb[42].mxu1 }
 0x49d   :  { %v5138_v18 = vpop.f32.mrb[43].mxu1  ;;  %v1775_v61 = vadd.f32 %v1754_v41, %v1723_v54 }
 0x49e   :  { %v1415_v52 = vpop.f32.mrb[44].mxu0 }
 0x49f   :  { %v1722_v60 = vmul.f32 0.35355338, %v1415_v52  ;;  %v5131_v19 = vpop.f32.mrb[45].mxu0  ;;  %v4767_v7 = vclamps-f32 %v1775_v61, 5.0 }
 0x4a0   :  { %v1418_v4 = vpop.f32.mrb[46].mxu0 }
 0x4a1   :  { %v1774_v14 = vadd.f32 %v6337_v3, %v1722_v60  ;;  %v5132_v17 = vpop.f32.mrb[47].mxu0  ;;  %v6385_v52 = vsel %vm5993_vm9, 1e-28, %v4767_v7 }
 0x4a2   :  { %v1565_v16 = vpop.f32.mrb[44].mxu1  ;;  %v1811_v61 = vsel %vm346_vm3, %v6385_v52, -inf }
 0x4a3   :  { %v4766_v30 = vclamps-f32 %v1774_v14, 5.0  ;;  %v1725_v6 = vmul.f32 0.35355338, %v1565_v16  ;;  %v5149_v5 = vpop.f32.mrb[45].mxu1 }
 0x4a4   :  { %v1568_v13 = vpop.f32.mrb[46].mxu1 }
 0x4a5   :  { %v1777_v46 = vadd.f32 %v6347_v53, %v1725_v6  ;;  %v5150_v55 = vpop.f32.mrb[47].mxu1  ;;  %v6379_v47 = vsel %vm6042_vm13, 1e-28, %v4766_v30 }
 0x4a6   :  { %v1515_v41 = vpop.f32.mrb[48].mxu0  ;;  %v1808_v54 = vsel %vm346_vm3, %v6379_v47, -inf }
 0x4a7   :  { %v4769_v10 = vclamps-f32 %v1777_v46, 5.0  ;;  %v1724_v3 = vmul.f32 0.35355338, %v1515_v41  ;;  %v5143_v18 = vpop.f32.mrb[49].mxu0  ;;  %1809 = vmax.xlane.f32.xlu0 %v1808_v54 }
 0x4a8   :  { %v1518_v13 = vpop.f32.mrb[50].mxu0 }
 0x4a9   :  { %v1776_v53 = vadd.f32 %v6341_v50, %v1724_v3  ;;  %v5144_v6 = vpop.f32.mrb[51].mxu0  ;;  %v6392_v14 = vsel %vm6046_vm14, 1e-28, %v4769_v10 }
 0x4aa   :  { %v1665_v5 = vpop.f32.mrb[48].mxu1  ;;  %v1817_v55 = vsel %vm346_vm3, %v6392_v14, -inf }
 0x4ab   :  { %v4768_v60 = vclamps-f32 %v1776_v53, 5.0  ;;  %v1727_v19 = vmul.f32 0.35355338, %v1665_v5  ;;  %v5161_v4 = vpop.f32.mrb[49].mxu1  ;;  %1812 = vmax.xlane.f32.xlu0 %v1811_v61 }
 0x4ac   :  { %v1668_v17 = vpop.f32.mrb[50].mxu1 }
 0x4ad   :  { %v1779_v16 = vadd.f32 %v6353_v11, %v1727_v19  ;;  %v5162_v7 = vpop.f32.mrb[51].mxu1  ;;  %v6397_v50 = vsel %vm6073_vm5, 1e-28, %v4768_v60 }
 0x4ae   :  { %v1615_v30 = vpop.f32.mrb[52].mxu0  ;;  %v1814_v46 = vsel %vm346_vm3, %v6397_v50, -inf }
 0x4af   :  { %v4771_v41 = vclamps-f32 %v1779_v16, 5.0  ;;  %v1726_v54 = vmul.f32 0.35355338, %v1615_v30  ;;  %v5155_v3 = vpop.f32.mrb[53].mxu0  ;;  %1815 = vmax.xlane.f32.xlu1 %v1814_v46  ;;  %1818 = vmax.xlane.f32.xlu0 %v1817_v55  ;;  %v6427_v55 = vpop.permute.xlu1 %2005 }
 0x4b0   :  { %v1618_v10 = vpop.f32.mrb[54].mxu0  ;;  %v2011_v42 = vsel %vm941_vm4, %v6427_v55, 0 }
 0x4b1   :  { %v1778_v11 = vadd.f32 %v6345_v49, %v1726_v54  ;;  %v5156_v18 = vpop.f32.mrb[55].mxu0  ;;  %v6406_v13 = vsel %vm6077_vm6, 1e-28, %v4771_v41  ;;  %v6432_v10 = vpop.permute.xlu0 %2053 }
 0x4b2   :  { %7454 = vst [vmem:[#allocation19_spill] sm:$0xff] %v6406_v13  ;;  %v1823_v53 = vsel %vm346_vm3, %v6406_v13, -inf }
 0x4b3   :  { %v4770_v6 = vclamps-f32 %v1778_v11, 5.0  ;;  %1824 = vmax.xlane.f32.xlu0 %v1823_v53  ;;  %v6429_v41 = vpop.permute.xlu1 %2101 }
 0x4b5   :  { %v6412_v5 = vsel %vm6104_vm8, 1e-28, %v4770_v6 }
 0x4b6   :  { %v1715_v61 = vpop.f32.mrb[56].mxu0  ;;  %v1820_v60 = vsel %vm346_vm3, %v6412_v5, -inf }
 0x4b7   :  { %v1728_v19 = vmul.f32 0.35355338, %v1715_v61  ;;  %v5167_v49 = vpop.f32.mrb[57].mxu0  ;;  %1821 = vmax.xlane.f32.xlu1 %v1820_v60 }
 0x4b8   :  { %v1718_v4 = vpop.f32.mrb[58].mxu0 }
 0x4b9   :  { %v1780_v17 = vadd.f32 %v6351_v56, %v1728_v19  ;;  %v5168_v16 = vpop.f32.mrb[59].mxu0 }
 0x4bb   :  { %v4772_v7 = vclamps-f32 %v1780_v17, 5.0 }
 0x4bd   :  { %v6419_v30 = vsel %vm6122_vm11, 1e-28, %v4772_v7 }
 0x4be   :  { %7455 = vst [vmem:[#allocation20_spill] sm:$0xff] %v6419_v30  ;;  %v1826_v46 = vsel %vm346_vm3, %v6419_v30, -inf }
 0x4bf   :  { %1827 = vmax.xlane.f32.xlu1 %v1826_v46 }
 0x4c9   :  { %2149 = vrot.lane.b32.xlu0 %v5879_v38, %s5725_s5 }
 0x4d0   :  { %2197 = vrot.lane.b32.xlu1 %v5877_v37, %s5725_s5 }
 0x528   :  { %v1807_v56 = vpop.xlane.xlu1 %1806 }
 0x529   :  { %v1829_v54 = vsub.f32 %v6371_v32, %v1807_v56 }
 0x52b   :  { %v1837_v3 = vmul.f32 1.442695, %v1829_v54 }
 0x52d   :  { %5620 = vpow2.f32 %v1837_v3 }
 0x534   :  { %v1810_v11 = vpop.xlane.xlu0 %1809 }
 0x535   :  { %v1830_v18 = vsub.f32 %v6379_v47, %v1810_v11 }
 0x537   :  { %v6435_v53 = vpop.eup %5620  ;;  %v1839_v6 = vmul.f32 1.442695, %v1830_v18 }
 0x538   :  { %v1813_v61 = vpop.xlane.xlu0 %1812  ;;  %v1853_v60 = vsel %vm346_vm3, %v6435_v53, 0.0 }
 0x539   :  { %5622 = vpow2.f32 %v1839_v6  ;;  %v1831_v19 = vsub.f32 %v6385_v52, %v1813_v61  ;;  %1854 = vadd.xlane.f32.xlu0 %v1853_v60 }
 0x53b   :  { %v1841_v49 = vmul.f32 1.442695, %v1831_v19 }
 0x53c   :  { %v1819_v4 = vpop.xlane.xlu0 %1818  ;;  %v1816_v17 = vpop.xlane.xlu1 %1815 }
 0x53d   :  { %5624 = vpow2.f32 %v1841_v49  ;;  %v1833_v16 = vsub.f32 %v6392_v14, %v1819_v4  ;;  %v1832_v7 = vsub.f32 %v6397_v50, %v1816_v17 }
 0x53f   :  { %v1845_v46 = vmul.f32 1.442695, %v1833_v16  ;;  %v1843_v56 = vmul.f32 1.442695, %v1832_v7 }
 0x541   :  { %5626 = vpow2.f32 %v1845_v46  ;;  %v1825_v46 = vpop.xlane.xlu0 %1824 }
 0x542   :  { %5628 = vpow2.f32 %v1843_v56  ;;  %v1835_v56 = vsub.f32 %v6406_v13, %v1825_v46  ;;  %v6502_v46 = vld [vmem:[%s7395_s3] sm:$0xff]  ;;  %s5729_s3 = smov 48  }
 0x543   :  { %v6442_v54 = vpop.eup %5622 }
 0x544   :  { %v1822_v3 = vpop.xlane.xlu1 %1821  ;;  %v1856_v11 = vsel %vm346_vm3, %v6442_v54, 0.0 }
 0x545   :  { %v1834_v18 = vsub.f32 %v6412_v5, %v1822_v3  ;;  %1857 = vadd.xlane.f32.xlu1 %v1856_v11  ;;  %v1849_v3 = vmul.f32 1.442695, %v1835_v56  ;;  %v2150_v56 = vpop.permute.xlu0 %2149 }
 0x547   :  { %v6447_v6 = vpop.eup %5624  ;;  %v1847_v61 = vmul.f32 1.442695, %v1834_v18 }
 0x548   :  { %v1859_v60 = vsel %vm346_vm3, %v6447_v6, 0.0 }
 0x549   :  { %5630 = vpow2.f32 %v1847_v61  ;;  %1860 = vadd.xlane.f32.xlu0 %v1859_v60 }
 0x54a   :  { %5632 = vpow2.f32 %v1849_v3 }
 0x54b   :  { %v6451_v19 = vpop.eup %5626 }
 0x54c   :  { %v6453_v49 = vpop.eup %5628  ;;  %v1865_v4 = vsel %vm346_vm3, %v6451_v19, 0.0  ;;  %v1828_v11 = vpop.xlane.xlu1 %1827 }
 0x54d   :  { %1866 = vadd.xlane.f32.xlu0 %v1865_v4  ;;  %v1862_v17 = vsel %vm346_vm3, %v6453_v49, 0.0  ;;  %v1836_v18 = vsub.f32 %v6419_v30, %v1828_v11 }
 0x54e   :  { %1863 = vadd.xlane.f32.xlu1 %v1862_v17 }
 0x54f   :  { %v1851_v61 = vmul.f32 1.442695, %v1836_v18 }
 0x550   :  { %v2198_v11 = vpop.permute.xlu1 %2197 }
 0x551   :  { %5634 = vpow2.f32 %v1851_v61 }
 0x553   :  { %v6459_v16 = vpop.eup %5630 }
 0x554   :  { %v1868_v7 = vsel %vm346_vm3, %v6459_v16, 0.0  ;;  %v6468_v60 = vpop.eup %5632 }
 0x555   :  { %1869 = vadd.xlane.f32.xlu1 %v1868_v7  ;;  %v1871_v4 = vsel %vm346_vm3, %v6468_v60, 0.0 }
 0x55b   :  { %v6472_v17 = vpop.eup %5634 }
 0x55c   :  { %v1874_v7 = vsel %vm346_vm3, %v6472_v17, 0.0 }
 0x563   :  { %2245 = vrot.lane.b32.xlu0 %v5882_v39, %s5725_s5 }
 0x566   :  { %2295 = vrot.lane.b32.xlu1 %v5865_v24, %s5726_s4 }
 0x582   :  { %1872 = vadd.xlane.f32.xlu0 %v1871_v4 }
 0x58a   :  { %1875 = vadd.xlane.f32.xlu1 %v1874_v7 }
 0x598   :  { %2345 = vrot.lane.b32.xlu0 %v5871_v27, %s5726_s4 }
 0x59b   :  { %2293 = vrot.lane.b32.xlu1 %v5865_v24, %s5727_s18 }
 0x59c   :  { %2343 = vrot.lane.b32.xlu0 %v5871_v27, %s5727_s18 }
 0x59f   :  { %2395 = vrot.lane.b32.xlu1 %v5863_v21, %s5726_s4 }
 0x5a0   :  { %2445 = vrot.lane.b32.xlu0 %v5869_v26, %s5726_s4 }
 0x5a3   :  { %2393 = vrot.lane.b32.xlu1 %v5863_v21, %s5727_s18 }
 0x5a4   :  { %2443 = vrot.lane.b32.xlu0 %v5869_v26, %s5727_s18 }
 0x5a7   :  { %2495 = vrot.lane.b32.xlu1 %v5875_v34, %s5726_s4 }
 0x5a8   :  { %2545 = vrot.lane.b32.xlu0 %v5879_v38, %s5726_s4 }
 0x5ab   :  { %2493 = vrot.lane.b32.xlu1 %v5875_v34, %s5727_s18 }
 0x5ac   :  { %2543 = vrot.lane.b32.xlu0 %v5879_v38, %s5727_s18 }
 0x5af   :  { %2595 = vrot.lane.b32.xlu1 %v5877_v37, %s5726_s4 }
 0x5b0   :  { %2645 = vrot.lane.b32.xlu0 %v5882_v39, %s5726_s4 }
 0x5b3   :  { %2593 = vrot.lane.b32.xlu1 %v5877_v37, %s5727_s18 }
 0x5b4   :  { %2643 = vrot.lane.b32.xlu0 %v5882_v39, %s5727_s18 }
 0x5b7   :  { %2701 = vrot.lane.b32.xlu1 %v6502_v46, %s5728_s21 }
 0x5c6   :  { %v1855_v3 = vpop.xlane.xlu0 %1854 }
 0x5c7   :  { %5636 = vrcp.f32 %v1855_v3 }
 0x5d1   :  { %v5637_v18 = vpop.eup %5636 }
 0x5d2   :  { %v1885_v61 = vmul.f32 %v5637_v18, %v6435_v53  ;;  %v1858_v4 = vpop.xlane.xlu1 %1857 }
 0x5d3   :  { %5638 = vrcp.f32 %v1858_v4 }
 0x5d4   :  { %v1893_v7 = vsel %vm6004_vm10, 0.0, %v1885_v61 }
 0x5d5   :  { %v1901_v57 = vpack.c.bf16 %v1893_v7, %v1893_v7  ;;  %v2059_v7 = vsel %vm941_vm4, %v6432_v10, 0  ;;  %v2107_v10 = vsel %vm941_vm4, %v6429_v41, 0 }
 0x5d6   :  { %v1861_v36 = vpop.xlane.xlu0 %1860 }
 0x5d7   :  { %5640 = vrcp.f32 %v1861_v36  ;;  %5172 = vmatmul.mubr.msk.bf16.vlgmr.msra.gmra.mrb[52].mxu1 %vm346_vm3, %v1901_v57 }
 0x5d8   :  { %5182 = vmatpush3.bf16.msra.mxu1 %v2011_v42  ;;  %5183 = vmatprep.mubr.msk.bf16.mxu1 %vm5718_vm2, %v7456_v0 }
 0x5d9   :  { %5193 = vmatprep.subr.bf16.mxu1 %v7456_v0 }
 0x5da   :  { %v1867_v53 = vpop.xlane.xlu0 %1866 }
 0x5db   :  { %5642 = vrcp.f32 %v1867_v53  ;;  %v1864_v3 = vpop.xlane.xlu1 %1863 }
 0x5dc   :  { %5644 = vrcp.f32 %v1864_v3 }
 0x5dd   :  { %v5639_v18 = vpop.eup %5638 }
 0x5de   :  { %v1886_v61 = vmul.f32 %v5639_v18, %v6442_v54 }
 0x5e0   :  { %v1894_v4 = vsel %vm6042_vm13, 0.0, %v1886_v61 }
 0x5e1   :  { %v5641_v55 = vpop.eup %5640  ;;  %v1902_v36 = vpack.c.bf16 %v1894_v4, %v1894_v4 }
 0x5e2   :  { %v1887_v57 = vmul.f32 %v5641_v55, %v6447_v6  ;;  %v1870_v42 = vpop.xlane.xlu1 %1869 }
 0x5e3   :  { %5646 = vrcp.f32 %v1870_v42  ;;  %5178 = vmatmul.mubr.msk.bf16.vlgmr.msra.gmra.mrb[60].mxu0 %vm346_vm3, %v1902_v36  ;;  %v2155_v36 = vsel %vm941_vm4, %v2150_v56, 0  ;;  %v2203_v42 = vsel %vm941_vm4, %v2198_v11, 0 }
 0x5e4   :  { %5188 = vmatpush3.bf16.msra.mxu0 %v2059_v7  ;;  %v1895_v53 = vsel %vm5993_vm9, 0.0, %v1887_v57  ;;  %5189 = vmatprep.mubr.msk.bf16.mxu0 %vm5718_vm2, %v7456_v0  ;;  %v2246_v7 = vpop.permute.xlu0 %2245 }
 0x5e5   :  { %v5643_v54 = vpop.eup %5642  ;;  %v1903_v3 = vpack.c.bf16 %v1895_v53, %v1895_v53  ;;  %5199 = vmatprep.subr.bf16.mxu0 %v7456_v0 }
 0x5e6   :  { %v5645_v18 = vpop.eup %5644  ;;  %v1889_v6 = vmul.f32 %v5643_v54, %v6451_v19  ;;  %v2251_v54 = vsel %vm941_vm4, %v2246_v7, 0  ;;  %v2296_v11 = vpop.permute.xlu1 %2295 }
 0x5e7   :  { %v1888_v61 = vmul.f32 %v5645_v18, %v6453_v49  ;;  %5184 = vmatmul.mubr.msk.bf16.vlgmr.msra.gmra.mrb[56].mxu1 %vm346_vm3, %v1903_v3 }
 0x5e8   :  { %5194 = vmatpush3.bf16.msra.mxu1 %v2107_v10  ;;  %5195 = vmatprep.mubr.msk.bf16.mxu1 %vm5718_vm2, %v7456_v0  ;;  %v1897_v19 = vsel %vm6046_vm14, 0.0, %v1889_v6 }
 0x5e9   :  { %v1896_v4 = vsel %vm6073_vm5, 0.0, %v1888_v61  ;;  %5205 = vmatprep.subr.bf16.mxu1 %v7456_v0  ;;  %v1905_v49 = vpack.c.bf16 %v1897_v19, %v1897_v19 }
 0x5ea   :  { %v1904_v55 = vpack.c.bf16 %v1896_v4, %v1896_v4 }
 0x5ec   :  { %5190 = vmatmul.mubr.msk.bf16.vlgmr.msra.gmra.mrb[64].mxu0 %vm346_vm3, %v1904_v55 }
 0x5ed   :  { %v5647_v41 = vpop.eup %5646  ;;  %5200 = vmatpush3.bf16.msra.mxu0 %v2155_v36  ;;  %5201 = vmatprep.mubr.msk.bf16.mxu0 %vm5718_vm2, %v7456_v0 }
 0x5ee   :  { %v1890_v57 = vmul.f32 %v5647_v41, %v6459_v16  ;;  %5211 = vmatprep.subr.bf16.mxu0 %v7456_v0  ;;  %v2301_v41 = vsel %vm346_vm3, %v2296_v11, 0 }
 0x5ef   :  { %5196 = vmatmul.mubr.msk.bf16.vlgmr.msra.gmra.mrb[60].mxu1 %vm346_vm3, %v1905_v49 }
 0x5f0   :  { %5206 = vmatpush3.bf16.msra.mxu1 %v2203_v42  ;;  %v1898_v56 = vsel %vm6104_vm8, 0.0, %v1890_v57  ;;  %5207 = vmatprep.mubr.msk.bf16.mxu1 %vm5718_vm2, %v7456_v0 }
 0x5f1   :  { %v1906_v53 = vpack.c.bf16 %v1898_v56, %v1898_v56  ;;  %5217 = vmatprep.subr.bf16.mxu1 %v7456_v0 }
 0x5f4   :  { %5202 = vmatmul.mubr.msk.bf16.vlgmr.msra.gmra.mrb[68].mxu0 %vm346_vm3, %v1906_v53 }
 0x5f5   :  { %5212 = vmatpush3.bf16.msra.mxu0 %v2251_v54  ;;  %5213 = vmatprep.mubr.msk.bf16.mxu0 %vm5718_vm2, %v7456_v0 }
 0x5f6   :  { %5223 = vmatprep.subr.bf16.mxu0 %v7456_v0 }
 0x60f   :  { %v1873_v16 = vpop.xlane.xlu0 %1872 }
 0x610   :  { %5648 = vrcp.f32 %v1873_v16 }
 0x613   :  { %v2346_v18 = vpop.permute.xlu0 %2345 }
 0x614   :  { %v2351_v54 = vsel %vm346_vm3, %v2346_v18, 0 }
 0x617   :  { %v1876_v3 = vpop.xlane.xlu1 %1875  ;;  %v2344_v19 = vpop.permute.xlu0 %2343 }
 0x618   :  { %5650 = vrcp.f32 %v1876_v3 }
 0x61a   :  { %v5649_v6 = vpop.eup %5648 }
 0x61b   :  { %v1891_v10 = vmul.f32 %v5649_v6, %v6468_v60  ;;  %v2294_v61 = vpop.permute.xlu1 %2293  ;;  %v2446_v42 = vpop.permute.xlu0 %2445 }
 0x61c   :  { %v2451_v18 = vsel %vm346_vm3, %v2446_v42, 0 }
 0x61d   :  { %v1899_v4 = vsel %vm6077_vm6, 0.0, %v1891_v10 }
 0x61e   :  { %v1907_v55 = vpack.c.bf16 %v1899_v4, %v1899_v4 }
 0x61f   :  { %v2396_v36 = vpop.permute.xlu1 %2395 }
 0x620   :  { %5208 = vmatmul.mubr.msk.bf16.vlgmr.msra.gmra.mrb[64].mxu1 %vm346_vm3, %v1907_v55  ;;  %v2401_v16 = vsel %vm346_vm3, %v2396_v36, 0 }
 0x621   :  { %5218 = vmatpush3.bf16.xpose.msra.mxu1 %v2301_v41  ;;  %5219 = vmatprep.mubr.msk.bf16.mxu1 %vm5718_vm2, %v7456_v0 }
 0x622   :  { %v5651_v49 = vpop.eup %5650  ;;  %5229 = vmatprep.subr.bf16.mxu1 %v7456_v0 }
 0x623   :  { %v1892_v60 = vmul.f32 %v5651_v49, %v6472_v17  ;;  %v2394_v57 = vpop.permute.xlu1 %2393  ;;  %v2444_v17 = vpop.permute.xlu0 %2443 }
 0x625   :  { %v1900_v56 = vsel %vm6122_vm11, 0.0, %v1892_v60 }
 0x626   :  { %v1908_v7 = vpack.c.bf16 %v1900_v56, %v1900_v56 }
 0x627   :  { %v2496_v53 = vpop.permute.xlu1 %2495  ;;  %v2546_v10 = vpop.permute.xlu0 %2545 }
 0x628   :  { %5214 = vmatmul.mubr.msk.bf16.vlgmr.msra.gmra.mrb[72].mxu0 %vm346_vm3, %v1908_v7  ;;  %5220 = vmatmul.mubr.msk.bf16.vlgmr.msra.gmra.mrb[68].mxu1 %vm346_vm3, %v2294_v61  ;;  %v2501_v6 = vsel %vm346_vm3, %v2496_v53, 0 }
 0x629   :  { %5224 = vmatpush3.bf16.xpose.msra.mxu0 %v2351_v54  ;;  %5230 = vmatpush3.bf16.xpose.msra.mxu1 %v2401_v16 }
 0x62a   :  { %5225 = vmatprep.mubr.msk.bf16.mxu0 %vm5718_vm2, %v7456_v0  ;;  %5231 = vmatprep.mubr.msk.bf16.mxu1 %vm5718_vm2, %v7456_v0 }
 0x62b   :  { %v2494_v11 = vpop.permute.xlu1 %2493  ;;  %5235 = vmatprep.subr.bf16.mxu0 %v7456_v0  ;;  %5241 = vmatprep.subr.bf16.mxu1 %v7456_v0  ;;  %v2544_v4 = vpop.permute.xlu0 %2543 }
 0x62f   :  { %v2596_v3 = vpop.permute.xlu1 %2595  ;;  %v2646_v42 = vpop.permute.xlu0 %2645 }
 0x630   :  { %5226 = vmatmul.mubr.msk.bf16.vlgmr.msra.gmra.mrb[76].mxu0 %vm346_vm3, %v2344_v19  ;;  %5232 = vmatmul.mubr.msk.bf16.vlgmr.msra.gmra.mrb[72].mxu1 %vm346_vm3, %v2394_v57  ;;  %v2551_v19 = vsel %vm346_vm3, %v2546_v10, 0  ;;  %v2601_v36 = vsel %vm346_vm3, %v2596_v3, 0  ;;  %v2651_v56 = vsel %vm346_vm3, %v2646_v42, 0 }
 0x631   :  { %5236 = vmatpush3.bf16.xpose.msra.mxu0 %v2451_v18  ;;  %5242 = vmatpush3.bf16.xpose.msra.mxu1 %v2501_v6 }
 0x632   :  { %5237 = vmatprep.mubr.msk.bf16.mxu0 %vm5718_vm2, %v7456_v0  ;;  %5243 = vmatprep.mubr.msk.bf16.mxu1 %vm5718_vm2, %v7456_v0 }
 0x633   :  { %v2594_v61 = vpop.permute.xlu1 %2593  ;;  %5247 = vmatprep.subr.bf16.mxu0 %v7456_v0  ;;  %5253 = vmatprep.subr.bf16.mxu1 %v7456_v0 }
 0x637   :  { %v2702_v55 = vpop.permute.xlu1 %2701 }
 0x638   :  { %5238 = vmatmul.mubr.msk.bf16.vlgmr.msra.gmra.mrb[80].mxu0 %vm346_vm3, %v2444_v17  ;;  %5244 = vmatmul.mubr.msk.bf16.vlgmr.msra.gmra.mrb[76].mxu1 %vm346_vm3, %v2494_v11  ;;  %v2705_v41 = vmul.f32 %v2702_v55, %v5999_v44  ;;  %v2704_v49 = vmul.f32 %v2702_v55, %v5978_v15  ;;  %v2707_v60 = vmul.f32 %v2702_v55, %v6036_v20  ;;  %v2644_v17 = vpop.permute.xlu0 %2643 }
 0x639   :  { %5248 = vmatpush3.bf16.xpose.msra.mxu0 %v2551_v19  ;;  %5254 = vmatpush3.bf16.xpose.msra.mxu1 %v2601_v36  ;;  %v2706_v57 = vmul.f32 %v2702_v55, %v5967_v9  ;;  %v2709_v7 = vmul.f32 %v2702_v55, %v6083_v1  ;;  %v2708_v53 = vmul.f32 %v2702_v55, %v6002_v45 }
 0x63a   :  { %2722 = vrot.lane.b32.xlu1 %v2705_v41, %s5727_s18  ;;  %2720 = vrot.lane.b32.xlu0 %v2704_v49, %s5727_s18  ;;  %v2711_v54 = vmul.f32 %v2702_v55, %v6110_v35  ;;  %v2710_v16 = vmul.f32 %v2702_v55, %v6040_v22 }
 0x63b   :  { %5249 = vmatprep.mubr.msk.bf16.mxu0 %vm5718_vm2, %v7456_v0  ;;  %5255 = vmatprep.mubr.msk.bf16.mxu1 %vm5718_vm2, %v7456_v0 }
 0x63c   :  { %5259 = vmatprep.subr.bf16.mxu0 %v7456_v0  ;;  %5265 = vmatprep.subr.bf16.mxu1 %v7456_v0 }
 0x63e   :  { %2726 = vrot.lane.b32.xlu1 %v2707_v60, %s5727_s18  ;;  %2724 = vrot.lane.b32.xlu0 %v2706_v57, %s5727_s18 }
 0x640   :  { %5250 = vmatmul.mubr.msk.bf16.vlgmr.msra.gmra.mrb[84].mxu0 %vm346_vm3, %v2544_v4  ;;  %5256 = vmatmul.mubr.msk.bf16.vlgmr.msra.gmra.mrb[80].mxu1 %vm346_vm3, %v2594_v61 }
 0x641   :  { %5260 = vmatpush3.bf16.xpose.msra.mxu0 %v2651_v56  ;;  %5261 = vmatprep.mubr.msk.bf16.mxu0 %vm5718_vm2, %v7456_v0 }
 0x642   :  { %2730 = vrot.lane.b32.xlu1 %v2709_v7, %s5727_s18  ;;  %2728 = vrot.lane.b32.xlu0 %v2708_v53, %s5727_s18 }
 0x643   :  { %5271 = vmatprep.subr.bf16.mxu0 %v7456_v0  ;;  %5267 = vmatprep.mubr.msk.bf16.mxu1 %vm5718_vm2, %v7456_v0 }
 0x646   :  { %2734 = vrot.lane.b32.xlu1 %v2711_v54, %s5727_s18  ;;  %2732 = vrot.lane.b32.xlu0 %v2710_v16, %s5727_s18 }
 0x648   :  { %5262 = vmatmul.mubr.msk.bf16.vlgmr.msra.gmra.mrb[88].mxu0 %vm346_vm3, %v2644_v17 }
 0x649   :  { %5273 = vmatprep.mubr.msk.bf16.mxu0 %vm5718_vm2, %v7456_v0 }
 0x64a   :  { %2880 = vrot.lane.b32.xlu1 %v5865_v24, %s5729_s3  ;;  %2928 = vrot.lane.b32.xlu0 %v5871_v27, %s5729_s3 }
 0x64e   :  { %2976 = vrot.lane.b32.xlu1 %v5863_v21, %s5729_s3 }
 0x652   :  { %3024 = vrot.lane.b32.xlu1 %v5869_v26, %s5729_s3 }
 0x6aa   :  { %v6633_v11 = vpop.f32.mrb[52].mxu1 }
 0x6ab   :  { %v5173_v3 = vpop.f32.mrb[53].mxu1 }
 0x6ac   :  { %v1954_v18 = vpop.f32.mrb[54].mxu1  ;;  %v6635_v6 = vpop.permute.xlu1 %2722 }
 0x6ad   :  { %v2721_v10 = vpop.permute.xlu0 %2720  ;;  %v5174_v61 = vpop.f32.mrb[55].mxu1 }
 0x6b0   :  { %v6637_v4 = vpop.permute.xlu1 %2726 }
 0x6b1   :  { %v6639_v55 = vpop.permute.xlu0 %2724 }
 0x6b4   :  { %v6641_v19 = vpop.permute.xlu1 %2730 }
 0x6b5   :  { %v6643_v36 = vpop.permute.xlu0 %2728 }
 0x6b6   :  { %v6645_v41 = vpop.f32.mrb[60].mxu0 }
 0x6b7   :  { %v5179_v60 = vpop.f32.mrb[61].mxu0 }
 0x6b8   :  { %v2002_v57 = vpop.f32.mrb[62].mxu0  ;;  %v6649_v42 = vpop.permute.xlu1 %2734 }
 0x6b9   :  { %v6651_v56 = vpop.permute.xlu0 %2732  ;;  %v5180_v7 = vpop.f32.mrb[63].mxu0 }
 0x6ba   :  { %v6653_v53 = vpop.f32.mrb[56].mxu1 }
 0x6bb   :  { %v5185_v54 = vpop.f32.mrb[57].mxu1 }
 0x6bc   :  { %v2050_v16 = vpop.f32.mrb[58].mxu1  ;;  %v2881_v17 = vpop.permute.xlu1 %2880 }
 0x6bd   :  { %v2886_v3 = vsel %vm941_vm4, %v2881_v17, 0  ;;  %v2929_v18 = vpop.permute.xlu0 %2928  ;;  %v5186_v61 = vpop.f32.mrb[59].mxu1 }
 0x6be   :  { %v2934_v40 = vsel %vm941_vm4, %v2929_v18, 0  ;;  %5266 = vmatpush3.bf16.msra.mxu1 %v2886_v3 }
 0x6bf   :  { %v6657_v49 = vpop.f32.mrb[64].mxu0  ;;  %5272 = vmatpush3.bf16.msra.mxu0 %v2934_v40  ;;  %5277 = vmatprep.subr.bf16.mxu1 %v7456_v0 }
 0x6c0   :  { %v5191_v57 = vpop.f32.mrb[65].mxu0  ;;  %5283 = vmatprep.subr.bf16.mxu0 %v7456_v0 }
 0x6c1   :  { %v2098_v7 = vpop.f32.mrb[66].mxu0 }
 0x6c2   :  { %v5192_v54 = vpop.f32.mrb[67].mxu0  ;;  %v6663_v16 = vpop.f32.mrb[60].mxu1 }
 0x6c3   :  { %v5197_v17 = vpop.f32.mrb[61].mxu1 }
 0x6c4   :  { %v2146_v61 = vpop.f32.mrb[62].mxu1 }
 0x6c5   :  { %v5198_v51 = vpop.f32.mrb[63].mxu1 }
 0x6c7   :  { %v6665_v18 = vpop.f32.mrb[68].mxu0 }
 0x6c8   :  { %v5203_v3 = vpop.f32.mrb[69].mxu0 }
 0x6c9   :  { %v2194_v8 = vpop.f32.mrb[70].mxu0 }
 0x6ca   :  { %v5204_v58 = vpop.f32.mrb[71].mxu0 }
 0x6f3   :  { %v6669_v31 = vpop.f32.mrb[64].mxu1 }
 0x6f4   :  { %7457 = vst [vmem:[#allocation21_spill] sm:$0xff] %v6669_v31  ;;  %v5209_v57 = vpop.f32.mrb[65].mxu1 }
 0x6f5   :  { %v2242_v60 = vpop.f32.mrb[66].mxu1 }
 0x6f6   :  { %v5210_v2 = vpop.f32.mrb[67].mxu1 }
 0x6fb   :  { %v6671_v7 = vpop.f32.mrb[72].mxu0  ;;  %v2337_v54 = vpop.f32.mrb[68].mxu1 }
 0x6fc   :  { %v2693_v51 = vmul.f32 0.35355338, %v2337_v54  ;;  %v5215_v61 = vpop.f32.mrb[73].mxu0  ;;  %v5221_v59 = vpop.f32.mrb[69].mxu1 }
 0x6fd   :  { %v2290_v29 = vpop.f32.mrb[74].mxu0  ;;  %v2340_v28 = vpop.f32.mrb[70].mxu1 }
 0x6fe   :  { %v2744_v40 = vadd.f32 %v2721_v10, %v2693_v51  ;;  %v5216_v3 = vpop.f32.mrb[75].mxu0  ;;  %v5222_v8 = vpop.f32.mrb[71].mxu1 }
 0x700   :  { %v4789_v58 = vclamps-f32 %v2744_v40, 5.0 }
 0x702   :  { %v6677_v57 = vsel %vm6004_vm10, 1e-28, %v4789_v58 }
 0x703   :  { %v2387_v2 = vpop.f32.mrb[76].mxu0  ;;  %v2437_v60 = vpop.f32.mrb[72].mxu1  ;;  %v2776_v30 = vsel %vm346_vm3, %v6677_v57, -inf }
 0x704   :  { %v2694_v13 = vmul.f32 0.35355338, %v2387_v2  ;;  %v2695_v17 = vmul.f32 0.35355338, %v2437_v60  ;;  %v5227_v54 = vpop.f32.mrb[77].mxu0  ;;  %v5233_v61 = vpop.f32.mrb[73].mxu1  ;;  %2777 = vmax.xlane.f32.xlu0 %v2776_v30 }
 0x705   :  { %v2390_v29 = vpop.f32.mrb[78].mxu0  ;;  %v2440_v28 = vpop.f32.mrb[74].mxu1 }
 0x706   :  { %v2745_v59 = vadd.f32 %v6635_v6, %v2694_v13  ;;  %v2746_v10 = vadd.f32 %v6639_v55, %v2695_v17  ;;  %v5228_v40 = vpop.f32.mrb[79].mxu0  ;;  %v5234_v51 = vpop.f32.mrb[75].mxu1 }
 0x708   :  { %v4790_v3 = vclamps-f32 %v2745_v59, 5.0  ;;  %v4791_v8 = vclamps-f32 %v2746_v10, 5.0 }
 0x70a   :  { %v6685_v58 = vsel %vm6042_vm13, 1e-28, %v4790_v3  ;;  %v6689_v2 = vsel %vm5993_vm9, 1e-28, %v4791_v8 }
 0x70b   :  { %v2487_v60 = vpop.f32.mrb[80].mxu0  ;;  %v2537_v30 = vpop.f32.mrb[76].mxu1  ;;  %v2779_v54 = vsel %vm346_vm3, %v6685_v58, -inf  ;;  %v2782_v13 = vsel %vm346_vm3, %v6689_v2, -inf }
 0x70c   :  { %v2696_v6 = vmul.f32 0.35355338, %v2487_v60  ;;  %v2697_v55 = vmul.f32 0.35355338, %v2537_v30  ;;  %v5239_v17 = vpop.f32.mrb[81].mxu0  ;;  %v5245_v61 = vpop.f32.mrb[77].mxu1  ;;  %2780 = vmax.xlane.f32.xlu1 %v2779_v54  ;;  %2783 = vmax.xlane.f32.xlu0 %v2782_v13 }
 0x70d   :  { %v2490_v29 = vpop.f32.mrb[82].mxu0  ;;  %v2540_v28 = vpop.f32.mrb[78].mxu1 }
 0x70e   :  { %v2747_v59 = vadd.f32 %v6637_v4, %v2696_v6  ;;  %v2748_v10 = vadd.f32 %v6643_v36, %v2697_v55  ;;  %v5240_v40 = vpop.f32.mrb[83].mxu0  ;;  %v5246_v51 = vpop.f32.mrb[79].mxu1 }
 0x710   :  { %v4792_v3 = vclamps-f32 %v2747_v59, 5.0  ;;  %v4793_v8 = vclamps-f32 %v2748_v10, 5.0 }
 0x712   :  { %v6699_v31 = vsel %vm6073_vm5, 1e-28, %v4792_v3  ;;  %v6703_v60 = vsel %vm6046_vm14, 1e-28, %v4793_v8 }
 0x713   :  { %7458 = vst [vmem:[#allocation22_spill] sm:$0xff] %v6703_v60  ;;  %v2587_v30 = vpop.f32.mrb[84].mxu0  ;;  %v2637_v54 = vpop.f32.mrb[80].mxu1  ;;  %v2785_v13 = vsel %vm346_vm3, %v6699_v31, -inf  ;;  %v2788_v4 = vsel %vm346_vm3, %v6703_v60, -inf }
 0x714   :  { %v2698_v36 = vmul.f32 0.35355338, %v2587_v30  ;;  %v2699_v6 = vmul.f32 0.35355338, %v2637_v54  ;;  %v5251_v55 = vpop.f32.mrb[85].mxu0  ;;  %v5257_v17 = vpop.f32.mrb[81].mxu1  ;;  %2786 = vmax.xlane.f32.xlu0 %v2785_v13  ;;  %2789 = vmax.xlane.f32.xlu1 %v2788_v4 }
 0x715   :  { %v2590_v61 = vpop.f32.mrb[86].mxu0  ;;  %v2640_v29 = vpop.f32.mrb[82].mxu1 }
 0x716   :  { %v2749_v28 = vadd.f32 %v6641_v19, %v2698_v36  ;;  %v2750_v59 = vadd.f32 %v6651_v56, %v2699_v6  ;;  %v5252_v10 = vpop.f32.mrb[87].mxu0  ;;  %v5258_v40 = vpop.f32.mrb[83].mxu1 }
 0x718   :  { %v4794_v51 = vclamps-f32 %v2749_v28, 5.0  ;;  %v4795_v3 = vclamps-f32 %v2750_v59, 5.0  ;;  %v6734_v28 = vpop.permute.xlu1 %2976 }
 0x71a   :  { %v6713_v8 = vsel %vm6104_vm8, 1e-28, %v4794_v51  ;;  %v6717_v30 = vsel %vm6077_vm6, 1e-28, %v4795_v3 }
 0x71b   :  { %7459 = vst [vmem:[#allocation23_spill] sm:$0xff] %v6713_v8  ;;  %7460 = vst [vmem:[#allocation24_spill] sm:$0xff] %v6717_v30  ;;  %v2687_v54 = vpop.f32.mrb[88].mxu0  ;;  %v2791_v13 = vsel %vm346_vm3, %v6713_v8, -inf  ;;  %v2794_v19 = vsel %vm346_vm3, %v6717_v30, -inf }
 0x71c   :  { %v2700_v56 = vmul.f32 0.35355338, %v2687_v54  ;;  %v5263_v4 = vpop.f32.mrb[89].mxu0  ;;  %2792 = vmax.xlane.f32.xlu0 %v2791_v13  ;;  %2795 = vmax.xlane.f32.xlu1 %v2794_v19  ;;  %v6737_v40 = vpop.permute.xlu1 %3024 }
 0x71d   :  { %v2690_v36 = vpop.f32.mrb[90].mxu0 }
 0x71e   :  { %v2751_v6 = vadd.f32 %v6649_v42, %v2700_v56  ;;  %v5264_v55 = vpop.f32.mrb[91].mxu0 }
 0x720   :  { %v4796_v17 = vclamps-f32 %v2751_v6, 5.0 }
 0x722   :  { %v6726_v61 = vsel %vm6122_vm11, 1e-28, %v4796_v17 }
 0x723   :  { %7461 = vst [vmem:[#allocation25_spill] sm:$0xff] %v6726_v61  ;;  %v2797_v29 = vsel %vm346_vm3, %v6726_v61, -inf }
 0x724   :  { %2798 = vmax.xlane.f32.xlu0 %v2797_v29 }
 0x72d   :  { %3120 = vrot.lane.b32.xlu1 %v5879_v38, %s5729_s3 }
 0x73a   :  { %3072 = vrot.lane.b32.xlu0 %v5875_v34, %s5729_s3 }
 0x791   :  { %v2778_v59 = vpop.xlane.xlu0 %2777 }
 0x792   :  { %v2800_v42 = vsub.f32 %v6677_v57, %v2778_v59 }
 0x794   :  { %v2808_v10 = vmul.f32 1.442695, %v2800_v42 }
 0x796   :  { %5652 = vpow2.f32 %v2808_v10 }
 0x799   :  { %v2781_v51 = vpop.xlane.xlu1 %2780  ;;  %v2784_v3 = vpop.xlane.xlu0 %2783 }
 0x79a   :  { %v2801_v54 = vsub.f32 %v6685_v58, %v2781_v51  ;;  %v2802_v13 = vsub.f32 %v6689_v2, %v2784_v3 }
 0x79c   :  { %v2810_v19 = vmul.f32 1.442695, %v2801_v54  ;;  %v2812_v56 = vmul.f32 1.442695, %v2802_v13 }
 0x79e   :  { %5654 = vpow2.f32 %v2810_v19 }
 0x79f   :  { %5656 = vpow2.f32 %v2812_v56 }
 0x7a0   :  { %v6741_v4 = vpop.eup %5652 }
 0x7a1   :  { %v2790_v36 = vpop.xlane.xlu1 %2789  ;;  %v2787_v6 = vpop.xlane.xlu0 %2786  ;;  %v2824_v55 = vsel %vm346_vm3, %v6741_v4, 0.0 }
 0x7a2   :  { %v2804_v17 = vsub.f32 %v6703_v60, %v2790_v36  ;;  %v2803_v29 = vsub.f32 %v6699_v31, %v2787_v6  ;;  %2825 = vadd.xlane.f32.xlu1 %v2824_v55  ;;  %v2982_v60 = vsel %vm941_vm4, %v6734_v28, 0 }
 0x7a4   :  { %v2816_v59 = vmul.f32 1.442695, %v2804_v17  ;;  %v2814_v42 = vmul.f32 1.442695, %v2803_v29 }
 0x7a6   :  { %5658 = vpow2.f32 %v2816_v59 }
 0x7a7   :  { %5660 = vpow2.f32 %v2814_v42 }
 0x7a8   :  { %v6747_v10 = vpop.eup %5654 }
 0x7a9   :  { %v6749_v51 = vpop.eup %5656  ;;  %v2793_v3 = vpop.xlane.xlu0 %2792  ;;  %v2827_v54 = vsel %vm346_vm3, %v6747_v10, 0.0 }
 0x7aa   :  { %v2805_v13 = vsub.f32 %v6713_v8, %v2793_v3  ;;  %2828 = vadd.xlane.f32.xlu0 %v2827_v54  ;;  %v2830_v19 = vsel %vm346_vm3, %v6749_v51, 0.0  ;;  %v2796_v42 = vpop.xlane.xlu1 %2795 }
 0x7ab   :  { %2831 = vadd.xlane.f32.xlu1 %v2830_v19  ;;  %v2806_v3 = vsub.f32 %v6717_v30, %v2796_v42 }
 0x7ac   :  { %v2818_v56 = vmul.f32 1.442695, %v2805_v13 }
 0x7ad   :  { %v2820_v54 = vmul.f32 1.442695, %v2806_v3 }
 0x7ae   :  { %5662 = vpow2.f32 %v2818_v56  ;;  %v3121_v3 = vpop.permute.xlu1 %3120 }
 0x7af   :  { %5664 = vpow2.f32 %v2820_v54 }
 0x7b0   :  { %v6756_v36 = vpop.eup %5658 }
 0x7b1   :  { %v6758_v6 = vpop.eup %5660  ;;  %v2836_v55 = vsel %vm346_vm3, %v6756_v36, 0.0  ;;  %v2799_v13 = vpop.xlane.xlu0 %2798 }
 0x7b2   :  { %2837 = vadd.xlane.f32.xlu1 %v2836_v55  ;;  %v2833_v17 = vsel %vm346_vm3, %v6758_v6, 0.0  ;;  %v2807_v19 = vsub.f32 %v6726_v61, %v2799_v13 }
 0x7b3   :  { %2834 = vadd.xlane.f32.xlu0 %v2833_v17 }
 0x7b4   :  { %v2822_v56 = vmul.f32 1.442695, %v2807_v19 }
 0x7b5   :  { %v3073_v13 = vpop.permute.xlu0 %3072 }
 0x7b6   :  { %5666 = vpow2.f32 %v2822_v56 }
 0x7b8   :  { %v6764_v29 = vpop.eup %5662 }
 0x7b9   :  { %v2839_v59 = vsel %vm346_vm3, %v6764_v29, 0.0  ;;  %v6774_v55 = vpop.eup %5664 }
 0x7ba   :  { %2840 = vadd.xlane.f32.xlu0 %v2839_v59  ;;  %v2842_v17 = vsel %vm346_vm3, %v6774_v55, 0.0 }
 0x7c0   :  { %v6778_v59 = vpop.eup %5666 }
 0x7c1   :  { %v2845_v42 = vsel %vm346_vm3, %v6778_v59, 0.0 }
 0x7c3   :  { %3216 = vrot.lane.b32.xlu1 %v5882_v39, %s5729_s3 }
 0x7d0   :  { %3168 = vrot.lane.b32.xlu0 %v5877_v37, %s5729_s3 }
 0x7e7   :  { %2843 = vadd.xlane.f32.xlu1 %v2842_v17 }
 0x7ef   :  { %2846 = vadd.xlane.f32.xlu0 %v2845_v42 }
 0x7f8   :  { %3316 = vrot.lane.b32.xlu1 %v5871_v27, %s5730_s22 }
 0x7fc   :  { %3314 = vrot.lane.b32.xlu1 %v5871_v27, %s5731_s23 }
 0x800   :  { %3416 = vrot.lane.b32.xlu1 %v5869_v26, %s5730_s22 }
 0x804   :  { %3414 = vrot.lane.b32.xlu1 %v5869_v26, %s5731_s23 }
 0x805   :  { %3266 = vrot.lane.b32.xlu0 %v5865_v24, %s5730_s22 }
 0x808   :  { %3516 = vrot.lane.b32.xlu1 %v5879_v38, %s5730_s22 }
 0x809   :  { %3264 = vrot.lane.b32.xlu0 %v5865_v24, %s5731_s23 }
 0x80c   :  { %3514 = vrot.lane.b32.xlu1 %v5879_v38, %s5731_s23 }
 0x80d   :  { %3366 = vrot.lane.b32.xlu0 %v5863_v21, %s5730_s22 }
 0x810   :  { %3616 = vrot.lane.b32.xlu1 %v5882_v39, %s5730_s22 }
 0x811   :  { %3364 = vrot.lane.b32.xlu0 %v5863_v21, %s5731_s23 }
 0x814   :  { %3614 = vrot.lane.b32.xlu1 %v5882_v39, %s5731_s23 }
 0x815   :  { %3466 = vrot.lane.b32.xlu0 %v5875_v34, %s5730_s22 }
 0x819   :  { %3464 = vrot.lane.b32.xlu0 %v5875_v34, %s5731_s23 }
 0x81d   :  { %3566 = vrot.lane.b32.xlu0 %v5877_v37, %s5730_s22 }
 0x821   :  { %3564 = vrot.lane.b32.xlu0 %v5877_v37, %s5731_s23 }
 0x825   :  { %3672 = vrot.lane.b32.xlu0 %v6502_v46, %s5732_s24 }
 0x82f   :  { %v2826_v54 = vpop.xlane.xlu1 %2825 }
 0x830   :  { %5668 = vrcp.f32 %v2826_v54 }
 0x837   :  { %v2829_v19 = vpop.xlane.xlu0 %2828 }
 0x838   :  { %v2832_v56 = vpop.xlane.xlu1 %2831  ;;  %5670 = vrcp.f32 %v2829_v19 }
 0x839   :  { %5672 = vrcp.f32 %v2832_v56 }
 0x83a   :  { %v5669_v17 = vpop.eup %5668 }
 0x83b   :  { %v2856_v42 = vmul.f32 %v5669_v17, %v6741_v4 }
 0x83d   :  { %v2864_v61 = vsel %vm6004_vm10, 0.0, %v2856_v42  ;;  %v3078_v42 = vsel %vm941_vm4, %v3073_v13, 0 }
 0x83e   :  { %v2872_v30 = vpack.c.bf16 %v2864_v61, %v2864_v61 }
 0x83f   :  { %v2838_v8 = vpop.xlane.xlu1 %2837 }
 0x840   :  { %5674 = vrcp.f32 %v2838_v8  ;;  %v2835_v46 = vpop.xlane.xlu0 %2834  ;;  %5268 = vmatmul.mubr.msk.bf16.vlgmr.msra.gmra.mrb[84].mxu1 %vm346_vm3, %v2872_v30 }
 0x841   :  { %5676 = vrcp.f32 %v2835_v46  ;;  %5278 = vmatpush3.bf16.msra.mxu1 %v2982_v60  ;;  %5279 = vmatprep.mubr.msk.bf16.mxu1 %vm5718_vm2, %v7456_v0  ;;  %v3030_v60 = vsel %vm941_vm4, %v6737_v40, 0 }
 0x842   :  { %v5671_v54 = vpop.eup %5670  ;;  %5289 = vmatprep.subr.bf16.mxu1 %v7456_v0 }
 0x843   :  { %v5673_v4 = vpop.eup %5672  ;;  %v2857_v19 = vmul.f32 %v5671_v54, %v6747_v10 }
 0x844   :  { %v2858_v61 = vmul.f32 %v5673_v4, %v6749_v51 }
 0x845   :  { %v2865_v28 = vsel %vm6042_vm13, 0.0, %v2857_v19 }
 0x846   :  { %v2873_v8 = vpack.c.bf16 %v2865_v28, %v2865_v28  ;;  %v2866_v30 = vsel %vm5993_vm9, 0.0, %v2858_v61 }
 0x847   :  { %v2874_v56 = vpack.c.bf16 %v2866_v30, %v2866_v30  ;;  %v2841_v17 = vpop.xlane.xlu0 %2840 }
 0x848   :  { %5274 = vmatmul.mubr.msk.bf16.vlgmr.msra.gmra.mrb[92].mxu0 %vm346_vm3, %v2873_v8  ;;  %5678 = vrcp.f32 %v2841_v17 }
 0x849   :  { %5280 = vmatmul.mubr.msk.bf16.vlgmr.msra.gmra.mrb[88].mxu1 %vm346_vm3, %v2874_v56  ;;  %5284 = vmatpush3.bf16.msra.mxu0 %v3030_v60 }
 0x84a   :  { %v5675_v10 = vpop.eup %5674  ;;  %5290 = vmatpush3.bf16.msra.mxu1 %v3078_v42  ;;  %5285 = vmatprep.mubr.msk.bf16.mxu0 %vm5718_vm2, %v7456_v0 }
 0x84b   :  { %v5677_v51 = vpop.eup %5676  ;;  %v2860_v46 = vmul.f32 %v5675_v10, %v6756_v36  ;;  %5291 = vmatprep.mubr.msk.bf16.mxu1 %vm5718_vm2, %v7456_v0  ;;  %5295 = vmatprep.subr.bf16.mxu0 %v7456_v0  ;;  %v3169_v54 = vpop.permute.xlu0 %3168  ;;  %v3126_v36 = vsel %vm941_vm4, %v3121_v3, 0 }
 0x84c   :  { %v2859_v40 = vmul.f32 %v5677_v51, %v6758_v6  ;;  %5301 = vmatprep.subr.bf16.mxu1 %v7456_v0  ;;  %v3174_v28 = vsel %vm941_vm4, %v3169_v54, 0  ;;  %v3217_v3 = vpop.permute.xlu1 %3216 }
 0x84d   :  { %v2868_v13 = vsel %vm6046_vm14, 0.0, %v2860_v46  ;;  %v3222_v60 = vsel %vm941_vm4, %v3217_v3, 0 }
 0x84e   :  { %v2867_v4 = vsel %vm6073_vm5, 0.0, %v2859_v40  ;;  %v2876_v19 = vpack.c.bf16 %v2868_v13, %v2868_v13 }
 0x84f   :  { %v2875_v61 = vpack.c.bf16 %v2867_v4, %v2867_v4 }
 0x851   :  { %5286 = vmatmul.mubr.msk.bf16.vlgmr.msra.gmra.mrb[96].mxu0 %vm346_vm3, %v2875_v61  ;;  %5292 = vmatmul.mubr.msk.bf16.vlgmr.msra.gmra.mrb[92].mxu1 %vm346_vm3, %v2876_v19 }
 0x852   :  { %5296 = vmatpush3.bf16.msra.mxu0 %v3126_v36  ;;  %5302 = vmatpush3.bf16.msra.mxu1 %v3174_v28  ;;  %v5679_v6 = vpop.eup %5678 }
 0x853   :  { %5297 = vmatprep.mubr.msk.bf16.mxu0 %vm5718_vm2, %v7456_v0  ;;  %5307 = vmatprep.subr.bf16.mxu0 %v7456_v0  ;;  %v2861_v8 = vmul.f32 %v5679_v6, %v6764_v29 }
 0x854   :  { %5303 = vmatprep.mubr.msk.bf16.mxu1 %vm5718_vm2, %v7456_v0  ;;  %5313 = vmatprep.subr.bf16.mxu1 %v7456_v0 }
 0x855   :  { %v2869_v30 = vsel %vm6104_vm8, 0.0, %v2861_v8 }
 0x856   :  { %v2877_v56 = vpack.c.bf16 %v2869_v30, %v2869_v30 }
 0x859   :  { %5298 = vmatmul.mubr.msk.bf16.vlgmr.msra.gmra.mrb[100].mxu0 %vm346_vm3, %v2877_v56 }
 0x85a   :  { %5308 = vmatpush3.bf16.msra.mxu0 %v3222_v60  ;;  %5309 = vmatprep.mubr.msk.bf16.mxu0 %vm5718_vm2, %v7456_v0 }
 0x85b   :  { %5319 = vmatprep.subr.bf16.mxu0 %v7456_v0 }
 0x874   :  { %v2844_v29 = vpop.xlane.xlu1 %2843 }
 0x875   :  { %5680 = vrcp.f32 %v2844_v29 }
 0x878   :  { %v3317_v10 = vpop.permute.xlu1 %3316 }
 0x879   :  { %v3322_v56 = vsel %vm346_vm3, %v3317_v10, 0 }
 0x87c   :  { %v2847_v17 = vpop.xlane.xlu0 %2846  ;;  %v3315_v54 = vpop.permute.xlu1 %3314 }
 0x87d   :  { %5682 = vrcp.f32 %v2847_v17 }
 0x87f   :  { %v5681_v42 = vpop.eup %5680 }
 0x880   :  { %v2862_v51 = vmul.f32 %v5681_v42, %v6774_v55  ;;  %v3267_v46 = vpop.permute.xlu0 %3266  ;;  %v3417_v28 = vpop.permute.xlu1 %3416 }
 0x881   :  { %v3272_v4 = vsel %vm346_vm3, %v3267_v46, 0  ;;  %v3422_v42 = vsel %vm346_vm3, %v3417_v28, 0 }
 0x882   :  { %v2870_v40 = vsel %vm6077_vm6, 0.0, %v2862_v51 }
 0x883   :  { %v2878_v13 = vpack.c.bf16 %v2870_v40, %v2870_v40 }
 0x884   :  { %v3265_v19 = vpop.permute.xlu0 %3264 }
 0x885   :  { %5304 = vmatmul.mubr.msk.bf16.vlgmr.msra.gmra.mrb[96].mxu1 %vm346_vm3, %v2878_v13 }
 0x886   :  { %5314 = vmatpush3.bf16.xpose.msra.mxu1 %v3272_v4  ;;  %5315 = vmatprep.mubr.msk.bf16.mxu1 %vm5718_vm2, %v7456_v0 }
 0x887   :  { %5325 = vmatprep.subr.bf16.mxu1 %v7456_v0  ;;  %v5683_v61 = vpop.eup %5682 }
 0x888   :  { %v2863_v55 = vmul.f32 %v5683_v61, %v6778_v59  ;;  %v3367_v36 = vpop.permute.xlu0 %3366  ;;  %v3415_v59 = vpop.permute.xlu1 %3414 }
 0x889   :  { %v3372_v3 = vsel %vm346_vm3, %v3367_v36, 0 }
 0x88a   :  { %v2871_v6 = vsel %vm6122_vm11, 0.0, %v2863_v55 }
 0x88b   :  { %v2879_v8 = vpack.c.bf16 %v2871_v6, %v2871_v6 }
 0x88c   :  { %v3365_v30 = vpop.permute.xlu0 %3364  ;;  %v3517_v10 = vpop.permute.xlu1 %3516 }
 0x88d   :  { %5316 = vmatmul.mubr.msk.bf16.vlgmr.msra.gmra.mrb[100].mxu1 %vm346_vm3, %v3265_v19  ;;  %5310 = vmatmul.mubr.msk.bf16.vlgmr.msra.gmra.mrb[104].mxu0 %vm346_vm3, %v2879_v8 }
 0x88e   :  { %5326 = vmatpush3.bf16.xpose.msra.mxu1 %v3372_v3  ;;  %5320 = vmatpush3.bf16.xpose.msra.mxu0 %v3322_v56 }
 0x88f   :  { %5321 = vmatprep.mubr.msk.bf16.mxu0 %vm5718_vm2, %v7456_v0  ;;  %5327 = vmatprep.mubr.msk.bf16.mxu1 %vm5718_vm2, %v7456_v0 }
 0x890   :  { %5331 = vmatprep.subr.bf16.mxu0 %v7456_v0  ;;  %v3467_v60 = vpop.permute.xlu0 %3466  ;;  %5337 = vmatprep.subr.bf16.mxu1 %v7456_v0  ;;  %v3515_v46 = vpop.permute.xlu1 %3514 }
 0x891   :  { %v3472_v29 = vsel %vm346_vm3, %v3467_v60, 0 }
 0x894   :  { %v3465_v17 = vpop.permute.xlu0 %3464  ;;  %v3617_v55 = vpop.permute.xlu1 %3616 }
 0x895   :  { %5328 = vmatmul.mubr.msk.bf16.vlgmr.msra.gmra.mrb[104].mxu1 %vm346_vm3, %v3365_v30  ;;  %5322 = vmatmul.mubr.msk.bf16.vlgmr.msra.gmra.mrb[108].mxu0 %vm346_vm3, %v3315_v54  ;;  %v3522_v54 = vsel %vm346_vm3, %v3517_v10, 0  ;;  %v3622_v36 = vsel %vm346_vm3, %v3617_v55, 0 }
 0x896   :  { %5338 = vmatpush3.bf16.xpose.msra.mxu1 %v3472_v29  ;;  %5332 = vmatpush3.bf16.xpose.msra.mxu0 %v3422_v42 }
 0x897   :  { %5333 = vmatprep.mubr.msk.bf16.mxu0 %vm5718_vm2, %v7456_v0  ;;  %5339 = vmatprep.mubr.msk.bf16.mxu1 %vm5718_vm2, %v7456_v0 }
 0x898   :  { %5343 = vmatprep.subr.bf16.mxu0 %v7456_v0  ;;  %v3567_v51 = vpop.permute.xlu0 %3566  ;;  %5349 = vmatprep.subr.bf16.mxu1 %v7456_v0 }
 0x899   :  { %v3572_v40 = vsel %vm346_vm3, %v3567_v51, 0 }
 0x89c   :  { %v3565_v13 = vpop.permute.xlu0 %3564 }
 0x89d   :  { %5340 = vmatmul.mubr.msk.bf16.vlgmr.msra.gmra.mrb[108].mxu1 %vm346_vm3, %v3465_v17  ;;  %5334 = vmatmul.mubr.msk.bf16.vlgmr.msra.gmra.mrb[112].mxu0 %vm346_vm3, %v3415_v59 }
 0x89e   :  { %5350 = vmatpush3.bf16.xpose.msra.mxu1 %v3572_v40  ;;  %5344 = vmatpush3.bf16.xpose.msra.mxu0 %v3522_v54 }
 0x89f   :  { %5345 = vmatprep.mubr.msk.bf16.mxu0 %vm5718_vm2, %v7456_v0  ;;  %5351 = vmatprep.mubr.msk.bf16.mxu1 %vm5718_vm2, %v7456_v0 }
 0x8a0   :  { %5355 = vmatprep.subr.bf16.mxu0 %v7456_v0  ;;  %v3673_v4 = vpop.permute.xlu0 %3672  ;;  %5361 = vmatprep.subr.bf16.mxu1 %v7456_v0 }
 0x8a1   :  { %v3676_v19 = vmul.f32 %v3673_v4, %v5999_v44  ;;  %v3675_v61 = vmul.f32 %v3673_v4, %v5978_v15  ;;  %v3678_v28 = vmul.f32 %v3673_v4, %v6036_v20  ;;  %v3677_v6 = vmul.f32 %v3673_v4, %v5967_v9  ;;  %v3615_v9 = vpop.permute.xlu1 %3614 }
 0x8a2   :  { %v3680_v15 = vmul.f32 %v3673_v4, %v6083_v1  ;;  %v3679_v44 = vmul.f32 %v3673_v4, %v6002_v45  ;;  %v3682_v20 = vmul.f32 %v3673_v4, %v6110_v35  ;;  %v3681_v8 = vmul.f32 %v3673_v4, %v6040_v22 }
 0x8a3   :  { %3693 = vrot.lane.b32.xlu0 %v3676_v19, %s5731_s23  ;;  %3691 = vrot.lane.b32.xlu1 %v3675_v61, %s5731_s23 }
 0x8a5   :  { %5352 = vmatmul.mubr.msk.bf16.vlgmr.msra.gmra.mrb[112].mxu1 %vm346_vm3, %v3565_v13  ;;  %5346 = vmatmul.mubr.msk.bf16.vlgmr.msra.gmra.mrb[116].mxu0 %vm346_vm3, %v3515_v46 }
 0x8a6   :  { %5363 = vmatprep.mubr.msk.bf16.mxu1 %vm5718_vm2, %v7456_v0  ;;  %5356 = vmatpush3.bf16.xpose.msra.mxu0 %v3622_v36 }
 0x8a7   :  { %5357 = vmatprep.mubr.msk.bf16.mxu0 %vm5718_vm2, %v7456_v0  ;;  %3697 = vrot.lane.b32.xlu0 %v3678_v28, %s5731_s23 }
 0x8a8   :  { %3695 = vrot.lane.b32.xlu1 %v3677_v6, %s5731_s23  ;;  %5367 = vmatprep.subr.bf16.mxu0 %v7456_v0 }
 0x8ab   :  { %3701 = vrot.lane.b32.xlu0 %v3680_v15, %s5731_s23 }
 0x8ac   :  { %3699 = vrot.lane.b32.xlu1 %v3679_v44, %s5731_s23 }
 0x8ad   :  { %5358 = vmatmul.mubr.msk.bf16.vlgmr.msra.gmra.mrb[120].mxu0 %vm346_vm3, %v3615_v9 }
 0x8ae   :  { %5369 = vmatprep.mubr.msk.bf16.mxu0 %vm5718_vm2, %v7456_v0 }
 0x8af   :  { %3705 = vrot.lane.b32.xlu0 %v3682_v20, %s5731_s23 }
 0x8b0   :  { %3703 = vrot.lane.b32.xlu1 %v3681_v8, %s5731_s23 }
 0x8b3   :  { %3851 = vrot.lane.b32.xlu0 %v5865_v24, %s5733_s7 }
 0x8b4   :  { %3899 = vrot.lane.b32.xlu1 %v5871_v27, %s5733_s7 }
 0x913   :  { %v6930_v45 = vpop.f32.mrb[84].mxu1 }
 0x914   :  { %v5269_v1 = vpop.f32.mrb[85].mxu1 }
 0x915   :  { %v2925_v35 = vpop.f32.mrb[86].mxu1  ;;  %v6932_v3 = vpop.permute.xlu0 %3693 }
 0x916   :  { %v3692_v22 = vpop.permute.xlu1 %3691  ;;  %v5270_v30 = vpop.f32.mrb[87].mxu1 }
 0x919   :  { %v6934_v56 = vpop.permute.xlu0 %3697 }
 0x91a   :  { %v3696_v59 = vpop.permute.xlu1 %3695 }
 0x91b   :  { %v6936_v60 = vpop.f32.mrb[92].mxu0 }
 0x91c   :  { %v6940_v24 = vpop.f32.mrb[88].mxu1  ;;  %v5275_v17 = vpop.f32.mrb[93].mxu0 }
 0x91d   :  { %v5281_v27 = vpop.f32.mrb[89].mxu1  ;;  %v2973_v42 = vpop.f32.mrb[94].mxu0 }
 0x91e   :  { %v3021_v10 = vpop.f32.mrb[90].mxu1  ;;  %v6942_v51 = vpop.permute.xlu0 %3701 }
 0x91f   :  { %v6944_v46 = vpop.permute.xlu1 %3699  ;;  %v5276_v40 = vpop.f32.mrb[95].mxu0 }
 0x920   :  { %v5282_v13 = vpop.f32.mrb[91].mxu1 }
 0x922   :  { %v6946_v54 = vpop.permute.xlu0 %3705 }
 0x923   :  { %v6948_v4 = vpop.permute.xlu1 %3703 }
 0x924   :  { %v6950_v19 = vpop.f32.mrb[96].mxu0  ;;  %v6952_v61 = vpop.f32.mrb[92].mxu1 }
 0x925   :  { %v5287_v36 = vpop.f32.mrb[97].mxu0  ;;  %v5293_v28 = vpop.f32.mrb[93].mxu1 }
 0x926   :  { %v3069_v6 = vpop.f32.mrb[98].mxu0  ;;  %v3117_v15 = vpop.f32.mrb[94].mxu1 }
 0x927   :  { %v3852_v44 = vpop.permute.xlu0 %3851  ;;  %v3900_v9 = vpop.permute.xlu1 %3899 }
 0x928   :  { %v3857_v20 = vsel %vm941_vm4, %v3852_v44, 0  ;;  %v3905_v8 = vsel %vm941_vm4, %v3900_v9, 0  ;;  %v5288_v1 = vpop.f32.mrb[99].mxu0  ;;  %v5294_v35 = vpop.f32.mrb[95].mxu1 }
 0x929   :  { %5362 = vmatpush3.bf16.msra.mxu1 %v3857_v20  ;;  %5368 = vmatpush3.bf16.msra.mxu0 %v3905_v8 }
 0x92a   :  { %5373 = vmatprep.subr.bf16.mxu1 %v7456_v0  ;;  %5379 = vmatprep.subr.bf16.mxu0 %v7456_v0 }
 0x92c   :  { %v6960_v30 = vpop.f32.mrb[100].mxu0 }
 0x92d   :  { %v5299_v27 = vpop.f32.mrb[101].mxu0 }
 0x92e   :  { %v3165_v42 = vpop.f32.mrb[102].mxu0 }
 0x92f   :  { %v5300_v10 = vpop.f32.mrb[103].mxu0 }
 0x958   :  { %v6964_v40 = vpop.f32.mrb[96].mxu1 }
 0x959   :  { %v5305_v13 = vpop.f32.mrb[97].mxu1 }
 0x95a   :  { %v3213_v36 = vpop.f32.mrb[98].mxu1 }
 0x95b   :  { %v5306_v28 = vpop.f32.mrb[99].mxu1 }
 0x960   :  { %v3308_v6 = vpop.f32.mrb[100].mxu1  ;;  %v6966_v15 = vpop.f32.mrb[104].mxu0 }
 0x961   :  { %v3664_v44 = vmul.f32 0.35355338, %v3308_v6  ;;  %v5317_v9 = vpop.f32.mrb[101].mxu1  ;;  %v5311_v8 = vpop.f32.mrb[105].mxu0 }
 0x962   :  { %v3311_v1 = vpop.f32.mrb[102].mxu1  ;;  %v3261_v17 = vpop.f32.mrb[106].mxu0 }
 0x963   :  { %v3715_v35 = vadd.f32 %v3692_v22, %v3664_v44  ;;  %v5318_v27 = vpop.f32.mrb[103].mxu1  ;;  %v5312_v42 = vpop.f32.mrb[107].mxu0 }
 0x965   :  { %v4813_v10 = vclamps-f32 %v3715_v35, 5.0 }
 0x967   :  { %v6972_v13 = vsel %vm6004_vm10, 1e-28, %v4813_v10 }
 0x968   :  { %v3408_v36 = vpop.f32.mrb[104].mxu1  ;;  %v3747_v28 = vsel %vm346_vm3, %v6972_v13, -inf  ;;  %v3358_v6 = vpop.f32.mrb[108].mxu0 }
 0x969   :  { %v3666_v9 = vmul.f32 0.35355338, %v3408_v36  ;;  %v5329_v55 = vpop.f32.mrb[105].mxu1  ;;  %3748 = vmax.xlane.f32.xlu1 %v3747_v28  ;;  %v3665_v20 = vmul.f32 0.35355338, %v3358_v6  ;;  %v5323_v8 = vpop.f32.mrb[109].mxu0 }
 0x96a   :  { %v3411_v1 = vpop.f32.mrb[106].mxu1  ;;  %v3361_v17 = vpop.f32.mrb[110].mxu0 }
 0x96b   :  { %v3717_v22 = vadd.f32 %v3696_v59, %v3666_v9  ;;  %v5330_v44 = vpop.f32.mrb[107].mxu1  ;;  %v3716_v35 = vadd.f32 %v6932_v3, %v3665_v20  ;;  %v5324_v27 = vpop.f32.mrb[111].mxu0 }
 0x96d   :  { %v4814_v42 = vclamps-f32 %v3716_v35, 5.0  ;;  %v4815_v10 = vclamps-f32 %v3717_v22, 5.0 }
 0x96f   :  { %v6979_v0 = vsel %vm6042_vm13, 1e-28, %v4814_v42  ;;  %v6985_v3 = vsel %vm5993_vm9, 1e-28, %v4815_v10 }
 0x970   :  { %v3508_v29 = vpop.f32.mrb[108].mxu1  ;;  %v3458_v48 = vpop.f32.mrb[112].mxu0  ;;  %v3750_v28 = vsel %vm346_vm3, %v6979_v0, -inf  ;;  %v3753_v44 = vsel %vm346_vm3, %v6985_v3, -inf }
 0x971   :  { %v3668_v36 = vmul.f32 0.35355338, %v3508_v29  ;;  %v5341_v55 = vpop.f32.mrb[109].mxu1  ;;  %v3667_v6 = vmul.f32 0.35355338, %v3458_v48  ;;  %v5335_v59 = vpop.f32.mrb[113].mxu0  ;;  %3751 = vmax.xlane.f32.xlu0 %v3750_v28 }
 0x972   :  { %v3511_v9 = vpop.f32.mrb[110].mxu1  ;;  %v3461_v8 = vpop.f32.mrb[114].mxu0 }
 0x973   :  { %v3719_v20 = vadd.f32 %v6944_v46, %v3668_v36  ;;  %v5342_v1 = vpop.f32.mrb[111].mxu1  ;;  %v3718_v22 = vadd.f32 %v6934_v56, %v3667_v6  ;;  %v5336_v17 = vpop.f32.mrb[115].mxu0 }
 0x975   :  { %v4817_v29 = vclamps-f32 %v3719_v20, 5.0  ;;  %v4816_v35 = vclamps-f32 %v3718_v22, 5.0  ;;  %3754 = vmax.xlane.f32.xlu0 %v3753_v44 }
 0x977   :  { %v6993_v48 = vsel %vm6046_vm14, 1e-28, %v4817_v29  ;;  %v6997_v42 = vsel %vm6073_vm5, 1e-28, %v4816_v35 }
 0x978   :  { %v3608_v27 = vpop.f32.mrb[112].mxu1  ;;  %v3759_v46 = vsel %vm346_vm3, %v6993_v48, -inf  ;;  %v3558_v56 = vpop.f32.mrb[116].mxu0  ;;  %v3756_v55 = vsel %vm346_vm3, %v6997_v42, -inf }
 0x979   :  { %v3670_v10 = vmul.f32 0.35355338, %v3608_v27  ;;  %v5353_v36 = vpop.f32.mrb[113].mxu1  ;;  %v3669_v28 = vmul.f32 0.35355338, %v3558_v56  ;;  %v5347_v6 = vpop.f32.mrb[117].mxu0  ;;  %3757 = vmax.xlane.f32.xlu1 %v3756_v55  ;;  %3760 = vmax.xlane.f32.xlu0 %v3759_v46 }
 0x97a   :  { %v3611_v59 = vpop.f32.mrb[114].mxu1  ;;  %v3561_v20 = vpop.f32.mrb[118].mxu0 }
 0x97b   :  { %v3721_v9 = vadd.f32 %v6948_v4, %v3670_v10  ;;  %v5354_v8 = vpop.f32.mrb[115].mxu1  ;;  %v3720_v1 = vadd.f32 %v6942_v51, %v3669_v28  ;;  %v5348_v22 = vpop.f32.mrb[119].mxu0 }
 0x97d   :  { %v4819_v17 = vclamps-f32 %v3721_v9, 5.0  ;;  %v4818_v29 = vclamps-f32 %v3720_v1, 5.0 }
 0x97f   :  { %v7007_v44 = vsel %vm6077_vm6, 1e-28, %v4819_v17  ;;  %v7011_v35 = vsel %vm6104_vm8, 1e-28, %v4818_v29 }
 0x980   :  { %v3765_v27 = vsel %vm346_vm3, %v7007_v44, -inf  ;;  %v3658_v46 = vpop.f32.mrb[120].mxu0  ;;  %v3762_v4 = vsel %vm346_vm3, %v7011_v35, -inf }
 0x981   :  { %3766 = vmax.xlane.f32.xlu0 %v3765_v27  ;;  %v3671_v51 = vmul.f32 0.35355338, %v3658_v46  ;;  %v5359_v56 = vpop.f32.mrb[121].mxu0  ;;  %3763 = vmax.xlane.f32.xlu1 %v3762_v4 }
 0x982   :  { %v3661_v10 = vpop.f32.mrb[122].mxu0 }
 0x983   :  { %v3722_v36 = vadd.f32 %v6946_v54, %v3671_v51  ;;  %v5360_v55 = vpop.f32.mrb[123].mxu0 }
 0x985   :  { %v4820_v28 = vclamps-f32 %v3722_v36, 5.0 }
 0x987   :  { %v7020_v6 = vsel %vm6122_vm11, 1e-28, %v4820_v28 }
 0x988   :  { %v3768_v59 = vsel %vm346_vm3, %v7020_v6, -inf }
 0x989   :  { %3769 = vmax.xlane.f32.xlu1 %v3768_v59 }
 0x997   :  { %3995 = vrot.lane.b32.xlu0 %v5869_v26, %s5733_s7 }
 0x99a   :  { %3947 = vrot.lane.b32.xlu1 %v5863_v21, %s5733_s7 }
 0x9f6   :  { %v3749_v9 = vpop.xlane.xlu1 %3748 }
 0x9f7   :  { %v3771_v20 = vsub.f32 %v6972_v13, %v3749_v9 }
 0x9f9   :  { %v3779_v54 = vmul.f32 1.442695, %v3771_v20 }
 0x9fb   :  { %5684 = vpow2.f32 %v3779_v54 }
 0x9fe   :  { %v3752_v8 = vpop.xlane.xlu0 %3751 }
 0x9ff   :  { %v3772_v1 = vsub.f32 %v6979_v0, %v3752_v8 }
 0xa01   :  { %v3781_v22 = vmul.f32 1.442695, %v3772_v1 }
 0xa02   :  { %v3755_v17 = vpop.xlane.xlu0 %3754 }
 0xa03   :  { %5686 = vpow2.f32 %v3781_v22  ;;  %v3773_v29 = vsub.f32 %v6985_v3, %v3755_v17 }
 0xa05   :  { %v7031_v27 = vpop.eup %5684  ;;  %v3783_v46 = vmul.f32 1.442695, %v3773_v29 }
 0xa06   :  { %v3795_v26 = vsel %vm346_vm3, %v7031_v27, 0.0  ;;  %v3758_v10 = vpop.xlane.xlu1 %3757  ;;  %v3761_v36 = vpop.xlane.xlu0 %3760 }
 0xa07   :  { %3796 = vadd.xlane.f32.xlu0 %v3795_v26  ;;  %5688 = vpow2.f32 %v3783_v46  ;;  %v3774_v55 = vsub.f32 %v6997_v42, %v3758_v10  ;;  %v3775_v59 = vsub.f32 %v6993_v48, %v3761_v36 }
 0xa09   :  { %v3785_v9 = vmul.f32 1.442695, %v3774_v55  ;;  %v3787_v1 = vmul.f32 1.442695, %v3775_v59 }
 0xa0b   :  { %5690 = vpow2.f32 %v3785_v9 }
 0xa0c   :  { %5692 = vpow2.f32 %v3787_v1 }
 0xa0d   :  { %v7035_v21 = vpop.eup %5686 }
 0xa0e   :  { %v3798_v4 = vsel %vm346_vm3, %v7035_v21, 0.0  ;;  %v3764_v28 = vpop.xlane.xlu1 %3763  ;;  %v3767_v20 = vpop.xlane.xlu0 %3766 }
 0xa0f   :  { %3799 = vadd.xlane.f32.xlu1 %v3798_v4  ;;  %v3776_v54 = vsub.f32 %v7011_v35, %v3764_v28  ;;  %v3777_v22 = vsub.f32 %v7007_v44, %v3767_v20  ;;  %v7462_v20 = vpack.i.bf16 %v6645_v41, %v6633_v11  ;;  %v7464_v11 = vpack.i.bf16 %v6936_v60, %v6930_v45 }
 0xa10   :  { %v7466_v41 = vpack.i.bf16 %v6665_v18, %v6663_v16  ;;  %v7471_v16 = vpack.i.bf16 %v6960_v30, %v6952_v61  ;;  %v7472_v18 = vld [vmem:[#allocation22_spill] sm:$0xff] }
 0xa11   :  { %v7039_v51 = vpop.eup %5688 }
 0xa12   :  { %v3801_v56 = vsel %vm346_vm3, %v7039_v51, 0.0 }
 0xa13   :  { %3802 = vadd.xlane.f32.xlu0 %v3801_v56 }
 0xa15   :  { %v7052_v46 = vpop.eup %5690 }
 0xa16   :  { %v3770_v8 = vpop.xlane.xlu1 %3769  ;;  %v7054_v26 = vpop.eup %5692  ;;  %v3804_v4 = vsel %vm346_vm3, %v7052_v46, 0.0 }
 0xa17   :  { %v3778_v17 = vsub.f32 %v7020_v6, %v3770_v8  ;;  %v3807_v36 = vsel %vm346_vm3, %v7054_v26, 0.0  ;;  %v7463_v8 = vpack.i.bf16 %v6657_v49, %v6653_v53  ;;  %v7469_v53 = vld [vmem:[#allocation19_spill] sm:$0xff] }
 0xa19   :  { %v3793_v29 = vmul.f32 1.442695, %v3778_v17 }
 0xa1a   :  { %v3948_v60 = vpop.permute.xlu1 %3947 }
 0xa20   :  { %4043 = vrot.lane.b32.xlu1 %v5875_v34, %s5733_s7  ;;  %v3789_v34 = vmul.f32 1.442695, %v3776_v54  ;;  %v5455_v54 = vpack.i.bf16 %v6379_v47, %v6371_v32  ;;  %v7465_v32 = vpack.i.bf16 %v6950_v19, %v6940_v24  ;;  %v5485_v47 = vpack.i.bf16 %v6699_v31, %v6689_v2  ;;  %v7473_v2 = vld [vmem:[#allocation23_spill] sm:$0xff] }
 0xa21   :  { %v5505_v31 = vpack.i.bf16 %v6412_v5, %v6392_v14  ;;  %v5525_v14 = vpack.i.bf16 %v7473_v2, %v7472_v18  ;;  %v7474_v5 = vpack.i.bf16 %v6966_v15, %v6964_v40  ;;  %v3953_v40 = vsel %vm941_vm4, %v3948_v60, 0  ;;  %v7478_v2 = vld [vmem:[#allocation11_spill] sm:$0xff] }
 0xa22   :  { %5694 = vpow2.f32 %v3789_v34  ;;  %v7476_v15 = vmov 0.0  }
 0xa29   :  { %4091 = vrot.lane.b32.xlu0 %v5879_v38, %s5733_s7  ;;  %v3791_v38 = vmul.f32 1.442695, %v3777_v22 }
 0xa2b   :  { %5696 = vpow2.f32 %v3791_v38 }
 0xa2c   :  { %5698 = vpow2.f32 %v3793_v29  ;;  %v7058_v56 = vpop.eup %5694 }
 0xa2d   :  { %v3810_v55 = vsel %vm346_vm3, %v7058_v56, 0.0 }
 0xa35   :  { %v7060_v10 = vpop.eup %5696 }
 0xa36   :  { %v7066_v28 = vpop.eup %5698  ;;  %v3813_v59 = vsel %vm346_vm3, %v7060_v10, 0.0 }
 0xa37   :  { %v3816_v9 = vsel %vm346_vm3, %v7066_v28, 0.0 }
 0xa44   :  { %3805 = vadd.xlane.f32.xlu1 %v3804_v4 }
 0xa48   :  { %3808 = vadd.xlane.f32.xlu0 %v3807_v36  ;;  %3811 = vadd.xlane.f32.xlu1 %v3810_v55 }
 0xa4c   :  { %3814 = vadd.xlane.f32.xlu0 %v3813_v59  ;;  %3817 = vadd.xlane.f32.xlu1 %v3816_v9 }
 0xa5d   :  { %4139 = vrot.lane.b32.xlu1 %v5877_v37, %s5733_s7  ;;  %v5470_v37 = vpack.i.bf16 %v6397_v50, %v6385_v52  ;;  %v5490_v52 = vpack.i.bf16 %v6979_v0, %v6972_v13  ;;  %v5495_v50 = vpack.i.bf16 %v6997_v42, %v6985_v3  ;;  %v7467_v0 = vld [vmem:[#allocation21_spill] sm:$0xff]  ;;  %v7479_v13 = vld [vmem:[#allocation14_spill] sm:$0xff] }
 0xa5e   :  { %v7468_v49 = vpack.i.bf16 %v6671_v7, %v7467_v0  ;;  %v3996_v7 = vpop.permute.xlu0 %3995 }
 0xa5f   :  { %v4001_v29 = vsel %vm941_vm4, %v3996_v7, 0 }
 0xa61   :  { %5451 = vrot.lane.b32.xlu1 %v7462_v20, %s5724_s1 }
 0xa62   :  { %4187 = vrot.lane.b32.xlu0 %v5882_v39, %s5733_s7  ;;  %v5475_v39 = vpack.i.bf16 %v6685_v58, %v6677_v57  ;;  %v7470_v57 = vld [vmem:[#allocation20_spill] sm:$0xff] }
 0xa63   :  { %v5520_v58 = vpack.i.bf16 %v7470_v57, %v7469_v53 }
 0xa65   :  { %5461 = vrot.lane.b32.xlu1 %v7463_v8, %s5724_s1 }
 0xa66   :  { %5456 = vrot.lane.b32.xlu0 %v5455_v54, %s5724_s1 }
 0xa69   :  { %5471 = vrot.lane.b32.xlu1 %v5470_v37, %s5724_s1 }
 0xa6a   :  { %5466 = vrot.lane.b32.xlu0 %v7464_v11, %s5728_s21 }
 0xa6d   :  { %5481 = vrot.lane.b32.xlu1 %v7465_v32, %s5728_s21 }
 0xa6e   :  { %5476 = vrot.lane.b32.xlu0 %v5475_v39, %s5728_s21 }
 0xa71   :  { %5486 = vrot.lane.b32.xlu1 %v5485_v47, %s5728_s21 }
 0xa72   :  { %5491 = vrot.lane.b32.xlu0 %v5490_v52, %s5732_s24 }
 0xa75   :  { %5501 = vrot.lane.b32.xlu1 %v7466_v41, %s5724_s1 }
 0xa76   :  { %5496 = vrot.lane.b32.xlu0 %v5495_v50, %s5732_s24 }
 0xa79   :  { %5511 = vrot.lane.b32.xlu1 %v7468_v49, %s5724_s1 }
 0xa7a   :  { %5506 = vrot.lane.b32.xlu0 %v5505_v31, %s5724_s1 }
 0xa7d   :  { %5521 = vrot.lane.b32.xlu1 %v5520_v58, %s5724_s1  ;;  %v7477_v58 = vld [vmem:[#allocation12_spill] sm:$0xff] }
 0xa7e   :  { %5516 = vrot.lane.b32.xlu0 %v7471_v16, %s5728_s21 }
 0xa81   :  { %5531 = vrot.lane.b32.xlu1 %v7474_v5, %s5728_s21 }
 0xa82   :  { %5526 = vrot.lane.b32.xlu0 %v5525_v14, %s5728_s21 }
 0xa94   :  { %v3797_v45 = vpop.xlane.xlu0 %3796 }
 0xa95   :  { %5700 = vrcp.f32 %v3797_v45 }
 0xa9c   :  { %v3800_v24 = vpop.xlane.xlu1 %3799 }
 0xa9d   :  { %5702 = vrcp.f32 %v3800_v24 }
 0xa9f   :  { %v5701_v19 = vpop.eup %5700 }
 0xaa0   :  { %v3827_v61 = vmul.f32 %v5701_v19, %v7031_v27  ;;  %v3803_v30 = vpop.xlane.xlu0 %3802  ;;  %v4044_v4 = vpop.permute.xlu1 %4043 }
 0xaa1   :  { %5704 = vrcp.f32 %v3803_v30  ;;  %v4049_v23 = vsel %vm941_vm4, %v4044_v4, 0 }
 0xaa2   :  { %v3835_v3 = vsel %vm6004_vm10, 0.0, %v3827_v61 }
 0xaa3   :  { %v3843_v42 = vpack.c.bf16 %v3835_v3, %v3835_v3 }
 0xaa5   :  { %5364 = vmatmul.mubr.msk.bf16.vlgmr.msra.gmra.mrb[116].mxu1 %vm346_vm3, %v3843_v42 }
 0xaa6   :  { %5374 = vmatpush3.bf16.msra.mxu1 %v3953_v40  ;;  %5375 = vmatprep.mubr.msk.bf16.mxu1 %vm5718_vm2, %v7476_v15  ;;  %v5584_v40 = vld [vmem:[%s7396_s10] sm:$0xff]  }
 0xaa7   :  { %5385 = vmatprep.subr.bf16.mxu1 %v7476_v15  ;;  %v5703_v1 = vpop.eup %5702 }
 0xaa8   :  { %v3828_v22 = vmul.f32 %v5703_v1, %v7035_v21 }
 0xaaa   :  { %v3836_v27 = vsel %vm6042_vm13, 0.0, %v3828_v22  ;;  %v7480_v22 = vld [vmem:[#allocation13_spill] sm:$0xff] }
 0xaab   :  { %v5705_v34 = vpop.eup %5704  ;;  %v3844_v17 = vpack.c.bf16 %v3836_v27, %v3836_v27 }
 0xaac   :  { %v3829_v38 = vmul.f32 %v5705_v34, %v7039_v51  ;;  %v4092_v51 = vpop.permute.xlu0 %4091 }
 0xaad   :  { %5370 = vmatmul.mubr.msk.bf16.vlgmr.msra.gmra.mrb[124].mxu0 %vm346_vm3, %v3844_v17  ;;  %v4097_v0 = vsel %vm941_vm4, %v4092_v51, 0  ;;  %v7481_v51 = vld [vmem:[#allocation5_spill] sm:$0xff] }
 0xaae   :  { %5380 = vmatpush3.bf16.msra.mxu0 %v4001_v29  ;;  %v3837_v36 = vsel %vm5993_vm9, 0.0, %v3829_v38  ;;  %5381 = vmatprep.mubr.msk.bf16.mxu0 %vm5718_vm2, %v7476_v15  ;;  %vm4339_vm9 = vcmask 130048  }
 0xaaf   :  { %v3845_v21 = vpack.c.bf16 %v3837_v36, %v3837_v36  ;;  %5391 = vmatprep.subr.bf16.mxu0 %v7476_v15 }
 0xab1   :  { %5376 = vmatmul.mubr.msk.bf16.vlgmr.msra.gmra.mrb[120].mxu1 %vm346_vm3, %v3845_v21 }
 0xab2   :  { %5386 = vmatpush3.bf16.msra.mxu1 %v4049_v23  ;;  %5387 = vmatprep.mubr.msk.bf16.mxu1 %vm5718_vm2, %v7476_v15 }
 0xab3   :  { %5397 = vmatprep.subr.bf16.mxu1 %v7476_v15 }
 0xad1   :  { %v3806_v55 = vpop.xlane.xlu1 %3805 }
 0xad2   :  { %5706 = vrcp.f32 %v3806_v55 }
 0xad5   :  { %v3809_v43 = vpop.xlane.xlu0 %3808  ;;  %v3812_v59 = vpop.xlane.xlu1 %3811 }
 0xad6   :  { %5708 = vrcp.f32 %v3809_v43 }
 0xad7   :  { %5710 = vrcp.f32 %v3812_v59 }
 0xad9   :  { %v3815_v9 = vpop.xlane.xlu0 %3814  ;;  %v3818_v20 = vpop.xlane.xlu1 %3817 }
 0xada   :  { %5712 = vrcp.f32 %v3815_v9 }
 0xadb   :  { %5714 = vrcp.f32 %v3818_v20 }
 0xadc   :  { %v5707_v54 = vpop.eup %5706 }
 0xadd   :  { %v3830_v8 = vmul.f32 %v5707_v54, %v7052_v46  ;;  %v4188_v37 = vpop.permute.xlu0 %4187  ;;  %v4140_v11 = vpop.permute.xlu1 %4139 }
 0xade   :  { %v4145_v45 = vsel %vm941_vm4, %v4140_v11, 0  ;;  %v4193_v29 = vsel %vm941_vm4, %v4188_v37, 0  ;;  %vm4348_vm4 = vcmask 195584  }
 0xadf   :  { %v3838_v39 = vsel %vm6073_vm5, 0.0, %v3830_v8 }
 0xae0   :  { %v5709_v32 = vpop.eup %5708  ;;  %v3846_v47 = vpack.c.bf16 %v3838_v39, %v3838_v39 }
 0xae1   :  { %v5711_v52 = vpop.eup %5710  ;;  %v3831_v50 = vmul.f32 %v5709_v32, %v7054_v26  ;;  %v5457_v41 = vpop.permute.xlu0 %5456 }
 0xae2   :  { %v5452_v31 = vpop.permute.xlu1 %5451  ;;  %v3832_v49 = vmul.f32 %v5711_v52, %v7058_v56  ;;  %5382 = vmatmul.mubr.msk.bf16.vlgmr.msra.gmra.mrb[128].mxu0 %vm346_vm3, %v3846_v47  ;;  %v5458_v1 = vunpack.i.l.bf16 %v5457_v41 }
 0xae3   :  { %v5454_v53 = vunpack.i.h.bf16 %v5452_v31  ;;  %v5453_v46 = vunpack.i.l.bf16 %v5452_v31  ;;  %5392 = vmatpush3.bf16.msra.mxu0 %v4097_v0  ;;  %v3839_v62 = vsel %vm6046_vm14, 0.0, %v3831_v50  ;;  %5393 = vmatprep.mubr.msk.bf16.mxu0 %vm5718_vm2, %v7476_v15  ;;  %v5585_v31 = vld [vmem:[%s7396_s10 + $0x8] sm:$0xff]  }
 0xae4   :  { %v5713_v57 = vpop.eup %5712  ;;  %v3847_v16 = vpack.c.bf16 %v3839_v62, %v3839_v62  ;;  %5403 = vmatprep.subr.bf16.mxu0 %v7476_v15  ;;  %v3840_v7 = vsel %vm6104_vm8, 0.0, %v3832_v49  ;;  %v4565_v43 = vsel %vm346_vm3, %v7482_v63, %v5458_v1  ;;  %v5550_v63 = vpack.i.bf16 %v7011_v35, %v6993_v48  ;;  %v7487_v48 = vld [vmem:[#allocation24_spill] sm:$0xff]  ;;  %v7488_v35 = vld [vmem:[#allocation25_spill] sm:$0xff] }
 0xae5   :  { %v4332_v26 = vsel %vm346_vm3, %v7477_v58, %v5454_v53  ;;  %v5715_v18 = vpop.eup %5714  ;;  %v3833_v56 = vmul.f32 %v5713_v57, %v7060_v10  ;;  %v4331_v14 = vsel %vm346_vm3, %v7478_v2, %v5453_v46  ;;  %v5467_v5 = vpop.permute.xlu0 %5466  ;;  %v3848_v42 = vpack.c.bf16 %v3840_v7, %v3840_v7 }
 0xae6   :  { %v5462_v25 = vpop.permute.xlu1 %5461  ;;  %v5469_v60 = vunpack.i.h.bf16 %v5467_v5  ;;  %v5468_v24 = vunpack.i.l.bf16 %v5467_v5  ;;  %5388 = vmatmul.mubr.msk.bf16.vlgmr.msra.gmra.mrb[124].mxu1 %vm346_vm3, %v3847_v16  ;;  %v3834_v61 = vmul.f32 %v5715_v18, %v7066_v28  ;;  %v5459_v28 = vunpack.i.h.bf16 %v5457_v41  ;;  %v7484_v18 = vld [vmem:[#allocation3_spill] sm:$0xff] }
 0xae7   :  { %v5464_v19 = vunpack.i.h.bf16 %v5462_v25  ;;  %v5463_v30 = vunpack.i.l.bf16 %v5462_v25  ;;  %5398 = vmatpush3.bf16.msra.mxu1 %v4145_v45  ;;  %5399 = vmatprep.mubr.msk.bf16.mxu1 %vm5718_vm2, %v7476_v15  ;;  %v3841_v38 = vsel %vm6077_vm6, 0.0, %v3833_v56 }
 0xae8   :  { %v7184_v10 = vsel %vm4339_vm9, %v4331_v14, %v5468_v24  ;;  %v7187_v33 = vsel %vm4339_vm9, %v4332_v26, %v5469_v60  ;;  %v3849_v21 = vpack.c.bf16 %v3841_v38, %v3841_v38  ;;  %v3842_v23 = vsel %vm6122_vm11, 0.0, %v3834_v61  ;;  %v7483_v26 = vld [vmem:[#allocation7_spill] sm:$0xff] }
 0xae9   :  { %v4334_v3 = vsel %vm346_vm3, %v7479_v13, %v5464_v19  ;;  %v4333_v27 = vsel %vm346_vm3, %v7480_v22, %v5463_v30  ;;  %v5477_v34 = vpop.permute.xlu0 %5476  ;;  %v4566_v55 = vsel %vm346_vm3, %v7481_v51, %v5459_v28  ;;  %v3850_v32 = vpack.c.bf16 %v3842_v23, %v3842_v23 }
 0xaea   :  { %v5472_v17 = vpop.permute.xlu1 %5471  ;;  %5394 = vmatmul.mubr.msk.bf16.vlgmr.msra.gmra.mrb[132].mxu0 %vm346_vm3, %v3848_v42  ;;  %v5479_v4 = vunpack.i.h.bf16 %v5477_v34  ;;  %v5478_v36 = vunpack.i.l.bf16 %v5477_v34 }
 0xaeb   :  { %5404 = vmatpush3.bf16.msra.mxu0 %v4193_v29  ;;  %5405 = vmatprep.mubr.msk.bf16.mxu0 %vm5718_vm2, %v7476_v15  ;;  %v5474_v59 = vunpack.i.h.bf16 %v5472_v17  ;;  %v5473_v39 = vunpack.i.l.bf16 %v5472_v17 }
 0xaec   :  { %5421 = vmatprep.subr.bf16.mxu0 %v5584_v40  ;;  %v4573_v12 = vsel %vm4339_vm9, %v4565_v43, %v5478_v36  ;;  %v4574_v15 = vsel %vm4339_vm9, %v4566_v55, %v5479_v4  ;;  %v5586_v4 = vld [vmem:[%s7397_s8] sm:$0xff]  }
 0xaed   :  { %v5492_v9 = vpop.permute.xlu0 %5491  ;;  %v4568_v16 = vsel %vm346_vm3, %v7483_v26, %v5474_v59  ;;  %v4567_v56 = vsel %vm346_vm3, %v7484_v18, %v5473_v39  ;;  %5409 = vmatprep.subr.bf16.mxu1 %v5586_v4  ;;  %v5545_v39 = vpack.i.bf16 %v7488_v35, %v7487_v48 }
 0xaee   :  { %v5482_v20 = vpop.permute.xlu1 %5481  ;;  %v5494_v54 = vunpack.i.h.bf16 %v5492_v9  ;;  %v5493_v8 = vunpack.i.l.bf16 %v5492_v9  ;;  %5400 = vmatmul.mubr.msk.bf16.vlgmr.msra.gmra.mrb[128].mxu1 %vm346_vm3, %v3849_v21 }
 0xaef   :  { %v5484_v37 = vunpack.i.h.bf16 %v5482_v20  ;;  %v5483_v11 = vunpack.i.l.bf16 %v5482_v20  ;;  %5410 = vmatpush3.bf16.msra.mxu1 %v5586_v4  ;;  %v5587_v20 = vld [vmem:[%s7397_s8 + $0x8] sm:$0xff]  }
 0xaf0   :  { %v4581_v47 = vsel %vm4348_vm4, %v4573_v12, %v5493_v8  ;;  %v4582_v52 = vsel %vm4348_vm4, %v4574_v15, %v5494_v54  ;;  %5411 = vmatprep.subr.bf16.mxu1 %v5587_v20 }
 0xaf1   :  { %v7214_v50 = vsel %vm4339_vm9, %v4333_v27, %v5483_v11  ;;  %v7217_v41 = vsel %vm4339_vm9, %v4334_v3, %v5484_v37  ;;  %v4589_v0 = vpack.c.bf16 %v4582_v52, %v4581_v47  ;;  %v5497_v49 = vpop.permute.xlu0 %5496  ;;  %v7485_v3 = vld [vmem:[#allocation15_spill] sm:$0xff] }
 0xaf2   :  { %v5487_v53 = vpop.permute.xlu1 %5486  ;;  %v5499_v46 = vunpack.i.h.bf16 %v5497_v49  ;;  %v5498_v62 = vunpack.i.l.bf16 %v5497_v49  ;;  %5406 = vmatmul.mubr.msk.bf16.vlgmr.msra.gmra.mrb[136].mxu0 %vm346_vm3, %v3850_v32 }
 0xaf3   :  { %v5489_v57 = vunpack.i.h.bf16 %v5487_v53  ;;  %v5488_v58 = vunpack.i.l.bf16 %v5487_v53  ;;  %5422 = vmatpush3.bf16.msra.mxu0 %v5584_v40  ;;  %5425 = vmatprep.mubr.msk.bf16.mxu0 %vm95_vm0, %v4589_v0  ;;  %v7486_v40 = vld [vmem:[#allocation16_spill] sm:$0xff] }
 0xaf4   :  { %5423 = vmatprep.subr.bf16.mxu0 %v5585_v31  ;;  %5412 = vmatpush3.bf16.msra.mxu1 %v5587_v20 }
 0xaf5   :  { %v4575_v2 = vsel %vm4339_vm9, %v4567_v56, %v5488_v58  ;;  %v4576_v14 = vsel %vm4339_vm9, %v4568_v16, %v5489_v57  ;;  %v7232_v7 = vpop.permute.xlu0 %5506  ;;  %v5565_v57 = vpack.i.bf16 %v7020_v6, %v7007_v44 }
 0xaf6   :  { %v4583_v5 = vsel %vm4348_vm4, %v4575_v2, %v5498_v62  ;;  %v4584_v25 = vsel %vm4348_vm4, %v4576_v14, %v5499_v46  ;;  %v5502_v45 = vpop.permute.xlu1 %5501 }
 0xaf7   :  { %v5504_v60 = vunpack.i.h.bf16 %v5502_v45  ;;  %v5503_v24 = vunpack.i.l.bf16 %v5502_v45  ;;  %5424 = vmatpush3.bf16.msra.mxu0 %v5585_v31  ;;  %v4590_v19 = vpack.c.bf16 %v4584_v25, %v4583_v5  ;;  %v7267_v25 = vld [vmem:[%s7398_s11] ss:$0 sm:$0xff] }
 0xaf9   :  { %v5517_v61 = vpop.permute.xlu0 %5516  ;;  %v4336_v42 = vsel %vm346_vm3, %v7485_v3, %v5504_v60  ;;  %v4335_v28 = vsel %vm346_vm3, %v7486_v40, %v5503_v24  ;;  %v5508_v40 = vunpack.i.l.bf16 %v7232_v7 }
 0xafa   :  { %v5519_v30 = vunpack.i.h.bf16 %v5517_v61  ;;  %v5518_v13 = vunpack.i.l.bf16 %v5517_v61  ;;  %5426 = vmatmul.mubr.msk.bf16.vlgmr.msra.gmra.mrb[140].mxu0 %vm95_vm0, %v4590_v19  ;;  %v5512_v20 = vpop.permute.xlu1 %5511 }
 0xafc   :  { %v7240_v1 = vsel %vm4339_vm9, %v4335_v28, %v5518_v13  ;;  %v7243_v22 = vsel %vm4339_vm9, %v4336_v42, %v5519_v30  ;;  %v5509_v42 = vunpack.i.h.bf16 %v7232_v7 }
 0xafd   :  { %v5527_v13 = vpop.permute.xlu0 %5526 }
 0xb78   :  { %v3893_v27 = vpop.f32.mrb[116].mxu1 }
 0xb79   :  { %v5365_v34 = vpop.f32.mrb[117].mxu1 }
 0xb7a   :  { %v3896_v17 = vpop.f32.mrb[118].mxu1  ;;  %v5529_v34 = vunpack.i.h.bf16 %v5527_v13 }
 0xb7b   :  { %v5366_v38 = vpop.f32.mrb[119].mxu1  ;;  %v5528_v17 = vunpack.i.l.bf16 %v5527_v13 }
 0xb80   :  { %v3941_v29 = vpop.f32.mrb[124].mxu0 }
 0xb81   :  { %v5535_v36 = vpack.i.bf16 %v3941_v29, %v3893_v27  ;;  %v5371_v21 = vpop.f32.mrb[125].mxu0 }
 0xb82   :  { %v3944_v23 = vpop.f32.mrb[126].mxu0  ;;  %v7489_v21 = vld [vmem:[#allocation9_spill] sm:$0xff] }
 0xb83   :  { %5536 = vrot.lane.b32.xlu0 %v5535_v36, %s5732_s24  ;;  %v5372_v51 = vpop.f32.mrb[127].mxu0  ;;  %v4570_v23 = vsel %vm346_vm3, %v7489_v21, %v5509_v42 }
 0xb84   :  { %v3989_v55 = vpop.f32.mrb[120].mxu1  ;;  %v7490_v51 = vld [vmem:[#allocation6_spill] sm:$0xff] }
 0xb85   :  { %v5377_v43 = vpop.f32.mrb[121].mxu1 }
 0xb86   :  { %v3992_v59 = vpop.f32.mrb[122].mxu1 }
 0xb87   :  { %v5378_v9 = vpop.f32.mrb[123].mxu1  ;;  %5551 = vrot.lane.b32.xlu0 %v5550_v63, %s5732_s24  ;;  %v4578_v59 = vsel %vm4339_vm9, %v4570_v23, %v5529_v34 }
 0xbb5   :  { %v4037_v54 = vpop.f32.mrb[128].mxu0 }
 0xbb6   :  { %v5540_v8 = vpack.i.bf16 %v4037_v54, %v3989_v55  ;;  %v5383_v37 = vpop.f32.mrb[129].mxu0  ;;  %v4569_v55 = vsel %vm346_vm3, %v7490_v51, %v5508_v40  ;;  %v5522_v54 = vpop.permute.xlu1 %5521 }
 0xbb7   :  { %v4040_v11 = vpop.f32.mrb[130].mxu0  ;;  %v4577_v43 = vsel %vm4339_vm9, %v4569_v55, %v5528_v17 }
 0xbb8   :  { %5541 = vrot.lane.b32.xlu1 %v5540_v8, %s5732_s24  ;;  %v5384_v12 = vpop.f32.mrb[131].mxu0 }
 0xbb9   :  { %v4085_v15 = vpop.f32.mrb[124].mxu1 }
 0xbba   :  { %v5389_v32 = vpop.f32.mrb[125].mxu1  ;;  %v5532_v8 = vpop.permute.xlu1 %5531 }
 0xbbb   :  { %v4088_v47 = vpop.f32.mrb[126].mxu1 }
 0xbbc   :  { %v5390_v52 = vpop.f32.mrb[127].mxu1  ;;  %5546 = vrot.lane.b32.xlu1 %v5545_v39, %s5728_s21  ;;  %v5524_v47 = vunpack.i.h.bf16 %v5522_v54 }
 0xbbd   :  { %v4133_v31 = vpop.f32.mrb[132].mxu0  ;;  %v5523_v52 = vunpack.i.l.bf16 %v5522_v54 }
 0xbbe   :  { %v5555_v0 = vpack.i.bf16 %v4133_v31, %v4085_v15  ;;  %v5395_v49 = vpop.f32.mrb[133].mxu0 }
 0xbbf   :  { %v4136_v53 = vpop.f32.mrb[134].mxu0 }
 0xbc0   :  { %5556 = vrot.lane.b32.xlu0 %v5555_v0, %s5732_s24  ;;  %v5396_v46 = vpop.f32.mrb[135].mxu0 }
 0xbc1   :  { %v4181_v62 = vpop.f32.mrb[128].mxu1 }
 0xbc2   :  { %v5401_v58 = vpop.f32.mrb[129].mxu1 }
 0xbc3   :  { %v4184_v26 = vpop.f32.mrb[130].mxu1 }
 0xbc4   :  { %5566 = vrot.lane.b32.xlu0 %v5565_v57, %s5732_s24  ;;  %v5402_v16 = vpop.f32.mrb[131].mxu1  ;;  %v5513_v57 = vunpack.i.l.bf16 %v5512_v20  ;;  %v7491_v26 = vld [vmem:[#allocation10_spill] sm:$0xff] }
 0xbc5   :  { %v4229_v18 = vpop.f32.mrb[136].mxu0  ;;  %v4572_v16 = vsel %vm346_vm3, %v7491_v26, %v5524_v47 }
 0xbc6   :  { %v5560_v56 = vpack.i.bf16 %v4229_v18, %v4181_v62  ;;  %v5407_v2 = vpop.f32.mrb[137].mxu0  ;;  %v5514_v62 = vunpack.i.h.bf16 %v5512_v20  ;;  %v7492_v18 = vld [vmem:[#allocation8_spill] sm:$0xff] }
 0xbc7   :  { %v4232_v14 = vpop.f32.mrb[138].mxu0 }
 0xbc8   :  { %v5408_v5 = vpop.f32.mrb[139].mxu0  ;;  %5561 = vrot.lane.b32.xlu1 %v5560_v56, %s5732_s24  ;;  %v4571_v56 = vsel %vm346_vm3, %v7492_v18, %v5523_v52 }
 0xbc9   :  { %v5534_v5 = vunpack.i.h.bf16 %v5532_v8 }
 0xbcd   :  { %v5427_v45 = vpop.f32.mrb[140].mxu0 }
 0xbce   :  { %v4671_v44 = vadd.f32 %v5427_v45, %v7267_v25  ;;  %v4662_v6 = vpop.f32.mrb[141].mxu0  ;;  %v5533_v45 = vunpack.i.l.bf16 %v5532_v8 }
 0xbcf   :  { %v4663_v60 = vadd.f32 %v7267_v25, %v4662_v6  ;;  %v5428_v24 = vpop.f32.mrb[142].mxu0 }
 0xbd0   :  { %4695 = vst.msk [vmem:[%s7399_s13 + $0x10] sm:$0xff] %vm248_vm1, %v4671_v44  ;;  %v4674_v19 = vadd.f32 %v5428_v24, %v7267_v25  ;;  %v4665_v61 = vpop.f32.mrb[143].mxu0 }
 0xbd1   :  { %4693 = vst.msk [vmem:[%s7399_s13] sm:$0xff] %vm248_vm1, %v4663_v60  ;;  %v4666_v30 = vadd.f32 %v7267_v25, %v4665_v61 }
 0xbd2   :  { %4696 = vst.msk [vmem:[%s7399_s13 + $0x18] sm:$0xff] %vm248_vm1, %v4674_v19  ;;  %v7493_v19 = vld [vmem:[#allocation18_spill] sm:$0xff] }
 0xbd3   :  { %4694 = vst.msk [vmem:[%s7399_s13 + $0x8] sm:$0xff] %vm248_vm1, %v4666_v30  ;;  %v4338_v61 = vsel %vm346_vm3, %v7493_v19, %v5514_v62  ;;  %v7494_v30 = vld [vmem:[#allocation17_spill] sm:$0xff] }
 0xbd4   :  { %v4337_v13 = vsel %vm346_vm3, %v7494_v30, %v5513_v57 }
 0xbd5   :  { %v4346_v40 = vsel %vm4339_vm9, %v4337_v13, %v5533_v45 }
 0xbf5   :  { %v5537_v3 = vpop.permute.xlu0 %5536 }
 0xbf6   :  { %v5539_v28 = vunpack.i.h.bf16 %v5537_v3  ;;  %v5538_v27 = vunpack.i.l.bf16 %v5537_v3 }
 0xbf8   :  { %v4349_v38 = vsel %vm4348_vm4, %v7184_v10, %v5538_v27  ;;  %v4350_v29 = vsel %vm4348_vm4, %v7187_v33, %v5539_v28  ;;  %v4347_v28 = vsel %vm4339_vm9, %v4338_v61, %v5534_v5 }
 0xbf9   :  { %v4357_v4 = vpack.c.bf16 %v4350_v29, %v4349_v38  ;;  %v5552_v36 = vpop.permute.xlu0 %5551  ;;  %v4829_v38 = vld [vmem:[%s7400_s9] ss:$0 sm:$0xff] }
 0xbfa   :  { %v5554_v63 = vunpack.i.h.bf16 %v5552_v36  ;;  %v5553_v7 = vunpack.i.l.bf16 %v5552_v36 }
 0xbfb   :  { %5413 = vmatprep.mubr.msk.bf16.mxu1 %vm95_vm0, %v4357_v4 }
 0xbfc   :  { %v4586_v10 = vsel %vm4348_vm4, %v4578_v59, %v5554_v63  ;;  %v4585_v33 = vsel %vm4348_vm4, %v4577_v43, %v5553_v7 }
 0xbfd   :  { %v4591_v9 = vpack.c.bf16 %v4586_v10, %v4585_v33 }
 0xbff   :  { %5429 = vmatprep.mubr.msk.bf16.mxu0 %vm95_vm0, %v4591_v9 }
 0xc2a   :  { %v5542_v37 = vpop.permute.xlu1 %5541 }
 0xc2b   :  { %v5544_v11 = vunpack.i.h.bf16 %v5542_v37  ;;  %v5543_v12 = vunpack.i.l.bf16 %v5542_v37 }
 0xc2d   :  { %v4351_v15 = vsel %vm4348_vm4, %v7214_v50, %v5543_v12  ;;  %v4352_v48 = vsel %vm4348_vm4, %v7217_v41, %v5544_v11 }
 0xc2e   :  { %v4358_v35 = vpack.c.bf16 %v4352_v48, %v4351_v15  ;;  %v5547_v39 = vpop.permute.xlu1 %5546 }
 0xc2f   :  { %v5549_v49 = vunpack.i.h.bf16 %v5547_v39  ;;  %v5548_v53 = vunpack.i.l.bf16 %v5547_v39 }
 0xc30   :  { %5414 = vmatmul.mubr.msk.bf16.vlgmr.msra.gmra.mrb[132].mxu1 %vm95_vm0, %v4358_v35 }
 0xc31   :  { %v4579_v44 = vsel %vm4339_vm9, %v4571_v56, %v5548_v53 }
 0xc32   :  { %v5557_v32 = vpop.permute.xlu0 %5556 }
 0xc33   :  { %v5559_v31 = vunpack.i.h.bf16 %v5557_v32  ;;  %v5558_v0 = vunpack.i.l.bf16 %v5557_v32 }
 0xc35   :  { %v4353_v46 = vsel %vm4348_vm4, %v7240_v1, %v5558_v0  ;;  %v4354_v50 = vsel %vm4348_vm4, %v7243_v22, %v5559_v31  ;;  %v4580_v1 = vsel %vm4339_vm9, %v4572_v16, %v5549_v49 }
 0xc36   :  { %v4359_v41 = vpack.c.bf16 %v4354_v50, %v4353_v46  ;;  %v5567_v58 = vpop.permute.xlu0 %5566 }
 0xc37   :  { %v5569_v2 = vunpack.i.h.bf16 %v5567_v58  ;;  %v5568_v14 = vunpack.i.l.bf16 %v5567_v58 }
 0xc38   :  { %5417 = vmatprep.mubr.msk.bf16.mxu1 %vm95_vm0, %v4359_v41 }
 0xc39   :  { %v4587_v22 = vsel %vm4348_vm4, %v4579_v44, %v5568_v14  ;;  %v4588_v6 = vsel %vm4348_vm4, %v4580_v1, %v5569_v2 }
 0xc3a   :  { %v4592_v60 = vpack.c.bf16 %v4588_v6, %v4587_v22  ;;  %v5562_v24 = vpop.permute.xlu1 %5561 }
 0xc3b   :  { %v5564_v3 = vunpack.i.h.bf16 %v5562_v24  ;;  %v5563_v42 = vunpack.i.l.bf16 %v5562_v24 }
 0xc3c   :  { %5430 = vmatmul.mubr.msk.bf16.gmra.mrb[144].mxu0 %vm95_vm0, %v4592_v60 }
 0xc3d   :  { %v4355_v27 = vsel %vm4348_vm4, %v4346_v40, %v5563_v42  ;;  %v4356_v34 = vsel %vm4348_vm4, %v4347_v28, %v5564_v3 }
 0xc3e   :  { %v4360_v17 = vpack.c.bf16 %v4356_v34, %v4355_v27 }
 0xc40   :  { %5418 = vmatmul.mubr.msk.bf16.gmra.mrb[136].mxu1 %vm95_vm0, %v4360_v17 }
 0xd03   :  { %v5415_v29 = vpop.f32.mrb[132].mxu1 }
 0xd04   :  { %v4439_v4 = vadd.f32 %v5415_v29, %v4829_v38  ;;  %v4430_v36 = vpop.f32.mrb[133].mxu1 }
 0xd05   :  { %v4431_v21 = vadd.f32 %v4829_v38, %v4430_v36  ;;  %v5416_v23 = vpop.f32.mrb[134].mxu1 }
 0xd06   :  { %4463 = vst.msk [vmem:[%s7401_s12 + $0x10] sm:$0xff] %vm95_vm0, %v4439_v4  ;;  %v4442_v51 = vadd.f32 %v5416_v23, %v4829_v38  ;;  %v4433_v55 = vpop.f32.mrb[135].mxu1 }
 0xd07   :  { %4461 = vst.msk [vmem:[%s7401_s12] sm:$0xff] %vm95_vm0, %v4431_v21  ;;  %v4434_v63 = vadd.f32 %v4829_v38, %v4433_v55 }
 0xd08   :  { %4464 = vst.msk [vmem:[%s7401_s12 + $0x18] sm:$0xff] %vm95_vm0, %v4442_v51 }
 0xd09   :  { %4462 = vst.msk [vmem:[%s7401_s12 + $0x8] sm:$0xff] %vm95_vm0, %v4434_v63 }
 0xd0f   :  { %v5431_v7 = vpop.f32.mrb[144].mxu0 }
 0xd10   :  { %v4687_v43 = vadd.f32 %v5431_v7, %v7267_v25  ;;  %v4678_v59 = vpop.f32.mrb[145].mxu0 }
 0xd11   :  { %v4679_v10 = vadd.f32 %v7267_v25, %v4678_v59  ;;  %v5432_v33 = vpop.f32.mrb[146].mxu0 }
 0xd12   :  { %4699 = vst.msk [vmem:[%s7399_s13 + $0x30] sm:$0xff] %vm248_vm1, %v4687_v43  ;;  %v4690_v9 = vadd.f32 %v5432_v33, %v7267_v25  ;;  %v4681_v20 = vpop.f32.mrb[147].mxu0 }
 0xd13   :  { %4697 = vst.msk [vmem:[%s7399_s13 + $0x20] sm:$0xff] %vm248_vm1, %v4679_v10  ;;  %v4682_v54 = vadd.f32 %v7267_v25, %v4681_v20  ;;  %v5419_v8 = vpop.f32.mrb[136].mxu1 }
 0xd14   :  { %4700 = vst.msk [vmem:[%s7399_s13 + $0x38] sm:$0xff] %vm248_vm1, %v4690_v9  ;;  %v4455_v37 = vadd.f32 %v5419_v8, %v4829_v38  ;;  %v4446_v11 = vpop.f32.mrb[137].mxu1 }
 0xd15   :  { %4698 = vst.msk [vmem:[%s7399_s13 + $0x28] sm:$0xff] %vm248_vm1, %v4682_v54  ;;  %v4447_v12 = vadd.f32 %v4829_v38, %v4446_v11  ;;  %v5420_v15 = vpop.f32.mrb[138].mxu1 }
 0xd16   :  { %4467 = vst.msk [vmem:[%s7401_s12 + $0x30] sm:$0xff] %vm95_vm0, %v4455_v37  ;;  %v4458_v25 = vadd.f32 %v5420_v15, %v4829_v38  ;;  %v4449_v48 = vpop.f32.mrb[139].mxu1 }
 0xd17   :  { %4465 = vst.msk [vmem:[%s7401_s12 + $0x20] sm:$0xff] %vm95_vm0, %v4447_v12  ;;  %v4450_v35 = vadd.f32 %v4829_v38, %v4449_v48 }
 0xd18   :  { %4468 = vst.msk [vmem:[%s7401_s12 + $0x38] sm:$0xff] %vm95_vm0, %v4458_v25 }
 0xd19   :  { %4466 = vst.msk [vmem:[%s7401_s12 + $0x28] sm:$0xff] %vm95_vm0, %v4450_v35 }

</bundles_post_ra>
